<compile_context>
chip_gen: v6e
topology: v6e:2x2x1
jax: 0.10.0
libtpu: 0.0.40
codegen_flags: <defaults>
</compile_context>

<pallas_src>
import jax
import jax.numpy as jnp
import numpy as np
from jax import lax
from jax.experimental import pallas as pl
from jax.experimental.pallas import tpu as pltpu

EXPANSION = 4


def _bottleneck_kernel(x_ref, w1_ref, w2_ref, w3_ref,
                       s1_ref, b1_ref, s2_ref, b2_ref, s3_ref, b3_ref,
                       o_ref):
    # x_ref : (1, H, W, Cin)   f32 input tile (one image, true channel width)
    # w1    : (Cin, Pp) bf16   w2: (3, 3*Pp, Pp) bf16 (rows = [kw0;kw1;kw2])
    # w3    : (Pp, Cout) bf16
    # s*/b* : (1, Pp)/(1, Cout) f32 folded BatchNorm affine
    # o_ref : (1, H, W, Cout)  f32 output tile (true channel width)
    _, H, W, Cin = x_ref.shape
    Pp = w1_ref.shape[1]
    Cout = w3_ref.shape[1]
    HW = H * W

    x = x_ref[0].reshape(HW, Cin)                                    # f32

    # ---- stage 1: 1x1 conv + BN + ReLU (computed once per image) ----
    h1 = jnp.dot(x.astype(jnp.bfloat16), w1_ref[...],
                 preferred_element_type=jnp.float32)
    h1 = jnp.maximum(h1 * s1_ref[...] + b1_ref[...], 0.0)            # (HW, Pp) f32

    # ---- edge masks for the 3x3 "SAME" padding (iota-derived, no scratch) ----
    r = lax.broadcasted_iota(jnp.int32, (HW, 1), 0)                  # flat row idx
    if W & (W - 1) == 0:
        col = jnp.bitwise_and(r, W - 1)                              # fast path, W pow2
    else:
        col = r % W
    ok_up = r >= W                    # valid when dy == -1
    ok_dn = r < (H - 1) * W           # valid when dy == +1
    ok_lf = col >= 1                  # valid when dx == -1
    ok_rt = col <= W - 2              # valid when dx == +1

    def tap(dy, dx):
        # shifted[r] = h1[r + dy*W + dx], zero outside the image.
        s = dy * W + dx
        v = h1 if s == 0 else pltpu.roll(h1, (-s) % HW, axis=0)      # f32 roll (XLU)
        conds = []
        if dy == -1:
            conds.append(ok_up)
        if dy == 1:
            conds.append(ok_dn)
        if dx == -1:
            conds.append(ok_lf)
        if dx == 1:
            conds.append(ok_rt)
        if conds:
            m = conds[0]
            for c in conds[1:]:
                m = jnp.logical_and(m, c)
            v = jnp.where(m, v, 0.0)
        return v.astype(jnp.bfloat16)

    # ---- stage 2: 3x3 conv as 3 matmuls with K = 3*Pp (+ BN2 + ReLU) ----
    acc = None
    for kh, dy in enumerate((-1, 0, 1)):
        slab = jnp.concatenate([tap(dy, dx) for dx in (-1, 0, 1)], axis=-1)
        d = jnp.dot(slab, w2_ref[kh], preferred_element_type=jnp.float32)
        acc = d if acc is None else acc + d
    h2 = jnp.maximum(acc * s2_ref[...] + b2_ref[...], 0.0)           # (HW, Pp) f32

    # ---- stage 3: 1x1 conv + BN3, residual add, ReLU ----
    h3 = jnp.dot(h2.astype(jnp.bfloat16), w3_ref[...],
                 preferred_element_type=jnp.float32)
    h3 = h3 * s3_ref[...] + b3_ref[...]
    out = jnp.maximum(h3 + x, 0.0)                                   # identity = x
    o_ref[0] = out.reshape(H, W, Cout).astype(o_ref.dtype)


def _round_up(c, m=128):
    return ((c + m - 1) // m) * m


def prepare_params(p):
    """One-time parameter prep: pad middle-channel dims to 128 lanes, cast weights
    to bf16, and fuse the 3x3 weight per kernel row (dy) into (3*Pp, Pp) slabs.
    Padded channels are exactly zero end-to-end, so results are unchanged."""
    Cin, P = p["w1"].shape
    Cout = p["w3"].shape[1]
    Pp = _round_up(P)

    w1 = jnp.pad(p["w1"], ((0, 0), (0, Pp - P))).astype(jnp.bfloat16)       # (Cin, Pp)
    w2p = jnp.pad(p["w2"], ((0, 0), (0, 0), (0, Pp - P), (0, Pp - P)))      # (3,3,Pp,Pp) HWIO
    w2 = w2p.reshape(3, 3 * Pp, Pp).astype(jnp.bfloat16)                    # rows = kw*Pp + cin
    w3 = jnp.pad(p["w3"], ((0, Pp - P), (0, 0))).astype(jnp.bfloat16)       # (Pp, Cout)

    pc = lambda a: jnp.pad(a, ((0, 0), (0, Pp - a.shape[1])))
    return dict(w1=w1, w2=w2, w3=w3,
                s1=pc(p["s1"]), b1=pc(p["b1"]),
                s2=pc(p["s2"]), b2=pc(p["b2"]),
                s3=p["s3"], b3=p["b3"])


def bottleneck_pallas(x_nhwc, pp):
    """x_nhwc: (N, H, W, Cin) float32 with Cin == planes*EXPANSION. Returns same shape."""
    N, H, W, Cin = x_nhwc.shape
    Pp = pp["w1"].shape[1]
    Cout = pp["w3"].shape[1]
    assert Cin == Cout, "identity residual requires inplanes == planes*expansion"

    grid_spec = pltpu.PrefetchScalarGridSpec(
        num_scalar_prefetch=0,
        grid=(N,),
        in_specs=[
            pl.BlockSpec((1, H, W, Cin), lambda n: (n, 0, 0, 0)),    # x (true width)
            pl.BlockSpec((Cin, Pp), lambda n: (0, 0)),               # w1
            pl.BlockSpec((3, 3 * Pp, Pp), lambda n: (0, 0, 0)),      # w2 (per-dy slabs)
            pl.BlockSpec((Pp, Cout), lambda n: (0, 0)),              # w3
            pl.BlockSpec((1, Pp), lambda n: (0, 0)),                 # s1
            pl.BlockSpec((1, Pp), lambda n: (0, 0)),                 # b1
            pl.BlockSpec((1, Pp), lambda n: (0, 0)),                 # s2
            pl.BlockSpec((1, Pp), lambda n: (0, 0)),                 # b2
            pl.BlockSpec((1, Cout), lambda n: (0, 0)),               # s3
            pl.BlockSpec((1, Cout), lambda n: (0, 0)),               # b3
        ],
        out_specs=pl.BlockSpec((1, H, W, Cout), lambda n: (n, 0, 0, 0)),
    )

    return pl.pallas_call(
        _bottleneck_kernel,
        out_shape=jax.ShapeDtypeStruct((N, H, W, Cout), jnp.float32),
        grid_spec=grid_spec,
        compiler_params=pltpu.CompilerParams(
            dimension_semantics=("parallel",),
            vmem_limit_bytes=32 * 1024 * 1024),
    )(x_nhwc, pp["w1"], pp["w2"], pp["w3"],
      pp["s1"], pp["b1"], pp["s2"], pp["b2"], pp["s3"], pp["b3"])


def init_params(key, inplanes, planes, expansion=EXPANSION, eps=1e-5):
    """Deterministic synthetic parameters; BatchNorm folded to (scale, bias)."""
    P, Cout = planes, planes * expansion
    ks = jax.random.split(key, 15)
    w1 = 0.2 * jax.random.normal(ks[0], (inplanes, P), jnp.float32)
    w2 = 0.2 * jax.random.normal(ks[1], (3, 3, P, P), jnp.float32)    # HWIO
    w3 = 0.2 * jax.random.normal(ks[2], (P, Cout), jnp.float32)

    def bn(kg, kb, km, kv, c):
        gamma = 1.0 + 0.1 * jax.random.normal(kg, (c,), jnp.float32)
        beta = 0.1 * jax.random.normal(kb, (c,), jnp.float32)
        mean = 0.1 * jax.random.normal(km, (c,), jnp.float32)
        var = jax.nn.softplus(jax.random.normal(kv, (c,), jnp.float32)) + 0.5
        scale = gamma / jnp.sqrt(var + eps)
        bias = beta - mean * scale
        return scale.reshape(1, c), bias.reshape(1, c)

    s1, b1 = bn(ks[3], ks[4], ks[5], ks[6], P)
    s2, b2 = bn(ks[7], ks[8], ks[9], ks[10], P)
    s3, b3 = bn(ks[11], ks[12], ks[13], ks[14], Cout)
    return dict(w1=w1, w2=w2, w3=w3, s1=s1, b1=b1, s2=s2, b2=b2, s3=s3, b3=b3)


def bottleneck_ref(x, p):
    """Pure-JAX f32 reference (NHWC) mirroring the PyTorch Bottleneck forward."""
    h = jnp.einsum("nhwc,cd->nhwd", x, p["w1"]) * p["s1"] + p["b1"]
    h = jnp.maximum(h, 0.0)
    h = lax.conv_general_dilated(h, p["w2"], (1, 1), "SAME",
                                 dimension_numbers=("NHWC", "HWIO", "NHWC"))
    h = jnp.maximum(h * p["s2"] + p["b2"], 0.0)
    h = jnp.einsum("nhwc,cd->nhwd", h, p["w3"]) * p["s3"] + p["b3"]
    return jnp.maximum(h + x, 0.0)


if __name__ == "__main__":
    key = jax.random.PRNGKey(0)
    kx, kp = jax.random.split(key)

    N, inplanes, H, W = 2, 16, 16, 16          # inplanes = planes * expansion
    planes = inplanes // EXPANSION

    # PyTorch-style NCHW input, transposed to the kernel's NHWC layout.
    x_nchw = jax.random.normal(kx, (N, inplanes, H, W), jnp.float32)
    x_nhwc = jnp.transpose(x_nchw, (0, 2, 3, 1))

    params = init_params(kp, inplanes, planes)
    prepped = prepare_params(params)           # one-time pad / cast / tap-fuse

    out = bottleneck_pallas(x_nhwc, prepped)
    out = jax.block_until_ready(out)
    assert out.shape == (N, H, W, planes * EXPANSION)

    ref = bottleneck_ref(x_nhwc, params)
    # bf16 matmuls with f32 accumulation -> loose-ish tolerance vs. f32 reference.
    np.testing.assert_allclose(np.asarray(out), np.asarray(ref),
                               rtol=5e-2, atol=5e-2)
    print("KERNEL_OK")
</pallas_src>

<mosaic_0001>
module attributes {stable_mosaic.version = 11 : i64} {
  func.func @_bottleneck_kernel(%arg0: i32, %arg1: memref<1x16x16x16xf32, #tpu.memory_space<vmem>>, %arg2: memref<16x128xbf16, #tpu.memory_space<vmem>>, %arg3: memref<3x384x128xbf16, #tpu.memory_space<vmem>>, %arg4: memref<128x16xbf16, #tpu.memory_space<vmem>>, %arg5: memref<1x128xf32, #tpu.memory_space<vmem>>, %arg6: memref<1x128xf32, #tpu.memory_space<vmem>>, %arg7: memref<1x128xf32, #tpu.memory_space<vmem>>, %arg8: memref<1x128xf32, #tpu.memory_space<vmem>>, %arg9: memref<1x16xf32, #tpu.memory_space<vmem>>, %arg10: memref<1x16xf32, #tpu.memory_space<vmem>>, %arg11: memref<1x16x16x16xf32, #tpu.memory_space<vmem>>) attributes {dimension_semantics = [#tpu.dimension_semantics<parallel>], iteration_bounds = array<i64: 2>, scalar_prefetch = 0 : i64, scratch_operands = 0 : i64, tpu.core_type = #tpu.core_type<tc>, window_params = [{transform_indices = @transform_0, window_bounds = array<i64: 1, 16, 16, 16>}, {pipeline_mode = #tpu.pipeline_mode<synchronous>, transform_indices = @transform_1, window_bounds = array<i64: 16, 128>}, {pipeline_mode = #tpu.pipeline_mode<synchronous>, transform_indices = @transform_2, window_bounds = array<i64: 3, 384, 128>}, {pipeline_mode = #tpu.pipeline_mode<synchronous>, transform_indices = @transform_3, window_bounds = array<i64: 128, 16>}, {pipeline_mode = #tpu.pipeline_mode<synchronous>, transform_indices = @transform_4, window_bounds = array<i64: 1, 128>}, {pipeline_mode = #tpu.pipeline_mode<synchronous>, transform_indices = @transform_5, window_bounds = array<i64: 1, 128>}, {pipeline_mode = #tpu.pipeline_mode<synchronous>, transform_indices = @transform_6, window_bounds = array<i64: 1, 128>}, {pipeline_mode = #tpu.pipeline_mode<synchronous>, transform_indices = @transform_7, window_bounds = array<i64: 1, 128>}, {pipeline_mode = #tpu.pipeline_mode<synchronous>, transform_indices = @transform_8, window_bounds = array<i64: 1, 16>}, {pipeline_mode = #tpu.pipeline_mode<synchronous>, transform_indices = @transform_9, window_bounds = array<i64: 1, 16>}, {transform_indices = @transform_10, window_bounds = array<i64: 1, 16, 16, 16>}]} {
    %c0 = arith.constant 0 : index
    %c0_0 = arith.constant 0 : index
    %c0_1 = arith.constant 0 : index
    %c0_2 = arith.constant 0 : index
    %0 = vector.load %arg1[%c0, %c0_0, %c0_1, %c0_2] : memref<1x16x16x16xf32, #tpu.memory_space<vmem>>, vector<1x16x16x16xf32>
    %1 = vector.shape_cast %0 : vector<1x16x16x16xf32> to vector<16x16x16xf32>
    %2 = vector.shape_cast %1 : vector<16x16x16xf32> to vector<256x16xf32>
    %3 = arith.truncf %2 : vector<256x16xf32> to vector<256x16xbf16>
    %c0_3 = arith.constant 0 : index
    %c0_4 = arith.constant 0 : index
    %4 = vector.load %arg2[%c0_3, %c0_4] : memref<16x128xbf16, #tpu.memory_space<vmem>>, vector<16x128xbf16>
    %cst = arith.constant dense<0.000000e+00> : vector<256x128xf32>
    %5 = tpu.matmul %3, %4, %cst {dimension_numbers = #tpu.dot_dimension_numbers<[1], [0], [0], [1], [0, 0, 1, 1], [], []>} : vector<256x16xbf16>, vector<16x128xbf16>, vector<256x128xf32> -> vector<256x128xf32>
    %c0_5 = arith.constant 0 : index
    %c0_6 = arith.constant 0 : index
    %6 = vector.load %arg5[%c0_5, %c0_6] : memref<1x128xf32, #tpu.memory_space<vmem>>, vector<1x128xf32>
    %7 = vector.broadcast %6 : vector<1x128xf32> to vector<256x128xf32>
    %8 = arith.mulf %5, %7 : vector<256x128xf32>
    %c0_7 = arith.constant 0 : index
    %c0_8 = arith.constant 0 : index
    %9 = vector.load %arg6[%c0_7, %c0_8] : memref<1x128xf32, #tpu.memory_space<vmem>>, vector<1x128xf32>
    %10 = vector.broadcast %9 : vector<1x128xf32> to vector<256x128xf32>
    %11 = arith.addf %8, %10 : vector<256x128xf32>
    %cst_9 = arith.constant 0.000000e+00 : f32
    %12 = vector.broadcast %cst_9 : f32 to vector<256x128xf32>
    %13 = arith.maximumf %11, %12 : vector<256x128xf32>
    %14 = tpu.iota {dimensions = array<i32: 0>} : vector<256x1xi32>
    %c15_i32 = arith.constant 15 : i32
    %15 = vector.broadcast %c15_i32 : i32 to vector<256x1xi32>
    %16 = arith.andi %14, %15 : vector<256x1xi32>
    %c16_i32 = arith.constant 16 : i32
    %17 = vector.broadcast %c16_i32 : i32 to vector<256x1xi32>
    %18 = arith.cmpi sge, %14, %17 : vector<256x1xi32>
    %c240_i32 = arith.constant 240 : i32
    %19 = vector.broadcast %c240_i32 : i32 to vector<256x1xi32>
    %20 = arith.cmpi slt, %14, %19 : vector<256x1xi32>
    %c1_i32 = arith.constant 1 : i32
    %21 = vector.broadcast %c1_i32 : i32 to vector<256x1xi32>
    %22 = arith.cmpi sge, %16, %21 : vector<256x1xi32>
    %c14_i32 = arith.constant 14 : i32
    %23 = vector.broadcast %c14_i32 : i32 to vector<256x1xi32>
    %24 = arith.cmpi sle, %16, %23 : vector<256x1xi32>
    %c17_i32 = arith.constant 17 : i32
    %25 = tpu.dynamic_rotate %13 by %c17_i32 dim 0 : vector<256x128xf32>, i32 -> vector<256x128xf32>
    %26 = arith.andi %18, %22 : vector<256x1xi1>
    %cst_10 = arith.constant 0.000000e+00 : f32
    %27 = vector.shape_cast %26 : vector<256x1xi1> to vector<256x1xi1>
    %28 = vector.broadcast %27 : vector<256x1xi1> to vector<256x128xi1>
    %29 = vector.broadcast %cst_10 : f32 to vector<256x128xf32>
    %30 = arith.select %28, %25, %29 : vector<256x128xi1>, vector<256x128xf32>
    %31 = arith.truncf %30 : vector<256x128xf32> to vector<256x128xbf16>
    %c16_i32_11 = arith.constant 16 : i32
    %32 = tpu.dynamic_rotate %13 by %c16_i32_11 dim 0 : vector<256x128xf32>, i32 -> vector<256x128xf32>
    %cst_12 = arith.constant 0.000000e+00 : f32
    %33 = vector.shape_cast %18 : vector<256x1xi1> to vector<256x1xi1>
    %34 = vector.broadcast %33 : vector<256x1xi1> to vector<256x128xi1>
    %35 = vector.broadcast %cst_12 : f32 to vector<256x128xf32>
    %36 = arith.select %34, %32, %35 : vector<256x128xi1>, vector<256x128xf32>
    %37 = arith.truncf %36 : vector<256x128xf32> to vector<256x128xbf16>
    %c15_i32_13 = arith.constant 15 : i32
    %38 = tpu.dynamic_rotate %13 by %c15_i32_13 dim 0 : vector<256x128xf32>, i32 -> vector<256x128xf32>
    %39 = arith.andi %18, %24 : vector<256x1xi1>
    %cst_14 = arith.constant 0.000000e+00 : f32
    %40 = vector.shape_cast %39 : vector<256x1xi1> to vector<256x1xi1>
    %41 = vector.broadcast %40 : vector<256x1xi1> to vector<256x128xi1>
    %42 = vector.broadcast %cst_14 : f32 to vector<256x128xf32>
    %43 = arith.select %41, %38, %42 : vector<256x128xi1>, vector<256x128xf32>
    %44 = arith.truncf %43 : vector<256x128xf32> to vector<256x128xbf16>
    %45 = tpu.concatenate %31, %37, %44 in 1 : vector<256x128xbf16>, vector<256x128xbf16>, vector<256x128xbf16> -> vector<256x384xbf16>
    %c0_15 = arith.constant 0 : index
    %c0_16 = arith.constant 0 : index
    %c0_17 = arith.constant 0 : index
    %46 = vector.load %arg3[%c0_15, %c0_16, %c0_17] : memref<3x384x128xbf16, #tpu.memory_space<vmem>>, vector<1x384x128xbf16>
    %47 = vector.shape_cast %46 : vector<1x384x128xbf16> to vector<384x128xbf16>
    %cst_18 = arith.constant dense<0.000000e+00> : vector<256x128xf32>
    %48 = tpu.matmul %45, %47, %cst_18 {dimension_numbers = #tpu.dot_dimension_numbers<[1], [0], [0], [1], [0, 0, 1, 1], [], []>} : vector<256x384xbf16>, vector<384x128xbf16>, vector<256x128xf32> -> vector<256x128xf32>
    %c1_i32_19 = arith.constant 1 : i32
    %49 = tpu.dynamic_rotate %13 by %c1_i32_19 dim 0 : vector<256x128xf32>, i32 -> vector<256x128xf32>
    %cst_20 = arith.constant 0.000000e+00 : f32
    %50 = vector.shape_cast %22 : vector<256x1xi1> to vector<256x1xi1>
    %51 = vector.broadcast %50 : vector<256x1xi1> to vector<256x128xi1>
    %52 = vector.broadcast %cst_20 : f32 to vector<256x128xf32>
    %53 = arith.select %51, %49, %52 : vector<256x128xi1>, vector<256x128xf32>
    %54 = arith.truncf %53 : vector<256x128xf32> to vector<256x128xbf16>
    %55 = arith.truncf %13 : vector<256x128xf32> to vector<256x128xbf16>
    %c255_i32 = arith.constant 255 : i32
    %56 = tpu.dynamic_rotate %13 by %c255_i32 dim 0 : vector<256x128xf32>, i32 -> vector<256x128xf32>
    %cst_21 = arith.constant 0.000000e+00 : f32
    %57 = vector.shape_cast %24 : vector<256x1xi1> to vector<256x1xi1>
    %58 = vector.broadcast %57 : vector<256x1xi1> to vector<256x128xi1>
    %59 = vector.broadcast %cst_21 : f32 to vector<256x128xf32>
    %60 = arith.select %58, %56, %59 : vector<256x128xi1>, vector<256x128xf32>
    %61 = arith.truncf %60 : vector<256x128xf32> to vector<256x128xbf16>
    %62 = tpu.concatenate %54, %55, %61 in 1 : vector<256x128xbf16>, vector<256x128xbf16>, vector<256x128xbf16> -> vector<256x384xbf16>
    %c1 = arith.constant 1 : index
    %c0_22 = arith.constant 0 : index
    %c0_23 = arith.constant 0 : index
    %63 = vector.load %arg3[%c1, %c0_22, %c0_23] : memref<3x384x128xbf16, #tpu.memory_space<vmem>>, vector<1x384x128xbf16>
    %64 = vector.shape_cast %63 : vector<1x384x128xbf16> to vector<384x128xbf16>
    %cst_24 = arith.constant dense<0.000000e+00> : vector<256x128xf32>
    %65 = tpu.matmul %62, %64, %cst_24 {dimension_numbers = #tpu.dot_dimension_numbers<[1], [0], [0], [1], [0, 0, 1, 1], [], []>} : vector<256x384xbf16>, vector<384x128xbf16>, vector<256x128xf32> -> vector<256x128xf32>
    %66 = arith.addf %48, %65 : vector<256x128xf32>
    %c241_i32 = arith.constant 241 : i32
    %67 = tpu.dynamic_rotate %13 by %c241_i32 dim 0 : vector<256x128xf32>, i32 -> vector<256x128xf32>
    %68 = arith.andi %20, %22 : vector<256x1xi1>
    %cst_25 = arith.constant 0.000000e+00 : f32
    %69 = vector.shape_cast %68 : vector<256x1xi1> to vector<256x1xi1>
    %70 = vector.broadcast %69 : vector<256x1xi1> to vector<256x128xi1>
    %71 = vector.broadcast %cst_25 : f32 to vector<256x128xf32>
    %72 = arith.select %70, %67, %71 : vector<256x128xi1>, vector<256x128xf32>
    %73 = arith.truncf %72 : vector<256x128xf32> to vector<256x128xbf16>
    %c240_i32_26 = arith.constant 240 : i32
    %74 = tpu.dynamic_rotate %13 by %c240_i32_26 dim 0 : vector<256x128xf32>, i32 -> vector<256x128xf32>
    %cst_27 = arith.constant 0.000000e+00 : f32
    %75 = vector.shape_cast %20 : vector<256x1xi1> to vector<256x1xi1>
    %76 = vector.broadcast %75 : vector<256x1xi1> to vector<256x128xi1>
    %77 = vector.broadcast %cst_27 : f32 to vector<256x128xf32>
    %78 = arith.select %76, %74, %77 : vector<256x128xi1>, vector<256x128xf32>
    %79 = arith.truncf %78 : vector<256x128xf32> to vector<256x128xbf16>
    %c239_i32 = arith.constant 239 : i32
    %80 = tpu.dynamic_rotate %13 by %c239_i32 dim 0 : vector<256x128xf32>, i32 -> vector<256x128xf32>
    %81 = arith.andi %20, %24 : vector<256x1xi1>
    %cst_28 = arith.constant 0.000000e+00 : f32
    %82 = vector.shape_cast %81 : vector<256x1xi1> to vector<256x1xi1>
    %83 = vector.broadcast %82 : vector<256x1xi1> to vector<256x128xi1>
    %84 = vector.broadcast %cst_28 : f32 to vector<256x128xf32>
    %85 = arith.select %83, %80, %84 : vector<256x128xi1>, vector<256x128xf32>
    %86 = arith.truncf %85 : vector<256x128xf32> to vector<256x128xbf16>
    %87 = tpu.concatenate %73, %79, %86 in 1 : vector<256x128xbf16>, vector<256x128xbf16>, vector<256x128xbf16> -> vector<256x384xbf16>
    %c2 = arith.constant 2 : index
    %c0_29 = arith.constant 0 : index
    %c0_30 = arith.constant 0 : index
    %88 = vector.load %arg3[%c2, %c0_29, %c0_30] : memref<3x384x128xbf16, #tpu.memory_space<vmem>>, vector<1x384x128xbf16>
    %89 = vector.shape_cast %88 : vector<1x384x128xbf16> to vector<384x128xbf16>
    %cst_31 = arith.constant dense<0.000000e+00> : vector<256x128xf32>
    %90 = tpu.matmul %87, %89, %cst_31 {dimension_numbers = #tpu.dot_dimension_numbers<[1], [0], [0], [1], [0, 0, 1, 1], [], []>} : vector<256x384xbf16>, vector<384x128xbf16>, vector<256x128xf32> -> vector<256x128xf32>
    %91 = arith.addf %66, %90 : vector<256x128xf32>
    %c0_32 = arith.constant 0 : index
    %c0_33 = arith.constant 0 : index
    %92 = vector.load %arg7[%c0_32, %c0_33] : memref<1x128xf32, #tpu.memory_space<vmem>>, vector<1x128xf32>
    %93 = vector.broadcast %92 : vector<1x128xf32> to vector<256x128xf32>
    %94 = arith.mulf %91, %93 : vector<256x128xf32>
    %c0_34 = arith.constant 0 : index
    %c0_35 = arith.constant 0 : index
    %95 = vector.load %arg8[%c0_34, %c0_35] : memref<1x128xf32, #tpu.memory_space<vmem>>, vector<1x128xf32>
    %96 = vector.broadcast %95 : vector<1x128xf32> to vector<256x128xf32>
    %97 = arith.addf %94, %96 : vector<256x128xf32>
    %cst_36 = arith.constant 0.000000e+00 : f32
    %98 = vector.broadcast %cst_36 : f32 to vector<256x128xf32>
    %99 = arith.maximumf %97, %98 : vector<256x128xf32>
    %100 = arith.truncf %99 : vector<256x128xf32> to vector<256x128xbf16>
    %c0_37 = arith.constant 0 : index
    %c0_38 = arith.constant 0 : index
    %101 = vector.load %arg4[%c0_37, %c0_38] : memref<128x16xbf16, #tpu.memory_space<vmem>>, vector<128x16xbf16>
    %cst_39 = arith.constant dense<0.000000e+00> : vector<256x16xf32>
    %102 = tpu.matmul %100, %101, %cst_39 {dimension_numbers = #tpu.dot_dimension_numbers<[1], [0], [0], [1], [0, 0, 1, 1], [], []>} : vector<256x128xbf16>, vector<128x16xbf16>, vector<256x16xf32> -> vector<256x16xf32>
    %c0_40 = arith.constant 0 : index
    %c0_41 = arith.constant 0 : index
    %103 = vector.load %arg9[%c0_40, %c0_41] : memref<1x16xf32, #tpu.memory_space<vmem>>, vector<1x16xf32>
    %104 = vector.broadcast %103 : vector<1x16xf32> to vector<256x16xf32>
    %105 = arith.mulf %102, %104 : vector<256x16xf32>
    %c0_42 = arith.constant 0 : index
    %c0_43 = arith.constant 0 : index
    %106 = vector.load %arg10[%c0_42, %c0_43] : memref<1x16xf32, #tpu.memory_space<vmem>>, vector<1x16xf32>
    %107 = vector.broadcast %106 : vector<1x16xf32> to vector<256x16xf32>
    %108 = arith.addf %105, %107 : vector<256x16xf32>
    %109 = arith.addf %108, %2 : vector<256x16xf32>
    %cst_44 = arith.constant 0.000000e+00 : f32
    %110 = vector.broadcast %cst_44 : f32 to vector<256x16xf32>
    %111 = arith.maximumf %109, %110 : vector<256x16xf32>
    %112 = vector.shape_cast %111 : vector<256x16xf32> to vector<16x16x16xf32>
    %c0_45 = arith.constant 0 : index
    %c0_46 = arith.constant 0 : index
    %c0_47 = arith.constant 0 : index
    %c0_48 = arith.constant 0 : index
    %113 = vector.load %arg11[%c0_45, %c0_46, %c0_47, %c0_48] : memref<1x16x16x16xf32, #tpu.memory_space<vmem>>, vector<1x16x16x16xf32>
    %114 = vector.shape_cast %113 : vector<1x16x16x16xf32> to vector<16x16x16xf32>
    %115 = vector.shape_cast %112 : vector<16x16x16xf32> to vector<1x16x16x16xf32>
    tpu.vector_store %arg11[%c0_45, %c0_46, %c0_47, %c0_48], %115 {strides = array<i32>} : memref<1x16x16x16xf32, #tpu.memory_space<vmem>>, vector<1x16x16x16xf32>,
    return
  }
  func.func @transform_0(%arg0: i32) -> (i32, i32, i32, i32) {
    %c0_i32 = arith.constant 0 : i32
    %c0_i32_0 = arith.constant 0 : i32
    %c0_i32_1 = arith.constant 0 : i32
    %c0_i32_2 = arith.constant 0 : i32
    return %arg0, %c0_i32, %c0_i32_0, %c0_i32_1 : i32, i32, i32, i32
  }
  func.func @transform_1(%arg0: i32) -> (i32, i32) {
    %c0_i32 = arith.constant 0 : i32
    %c0_i32_0 = arith.constant 0 : i32
    %c0_i32_1 = arith.constant 0 : i32
    return %c0_i32, %c0_i32_0 : i32, i32
  }
  func.func @transform_2(%arg0: i32) -> (i32, i32, i32) {
    %c0_i32 = arith.constant 0 : i32
    %c0_i32_0 = arith.constant 0 : i32
    %c0_i32_1 = arith.constant 0 : i32
    %c0_i32_2 = arith.constant 0 : i32
    return %c0_i32, %c0_i32_0, %c0_i32_1 : i32, i32, i32
  }
  func.func @transform_3(%arg0: i32) -> (i32, i32) {
    %c0_i32 = arith.constant 0 : i32
    %c0_i32_0 = arith.constant 0 : i32
    %c0_i32_1 = arith.constant 0 : i32
    return %c0_i32, %c0_i32_0 : i32, i32
  }
  func.func @transform_4(%arg0: i32) -> (i32, i32) {
    %c0_i32 = arith.constant 0 : i32
    %c0_i32_0 = arith.constant 0 : i32
    %c0_i32_1 = arith.constant 0 : i32
    return %c0_i32, %c0_i32_0 : i32, i32
  }
  func.func @transform_5(%arg0: i32) -> (i32, i32) {
    %c0_i32 = arith.constant 0 : i32
    %c0_i32_0 = arith.constant 0 : i32
    %c0_i32_1 = arith.constant 0 : i32
    return %c0_i32, %c0_i32_0 : i32, i32
  }
  func.func @transform_6(%arg0: i32) -> (i32, i32) {
    %c0_i32 = arith.constant 0 : i32
    %c0_i32_0 = arith.constant 0 : i32
    %c0_i32_1 = arith.constant 0 : i32
    return %c0_i32, %c0_i32_0 : i32, i32
  }
  func.func @transform_7(%arg0: i32) -> (i32, i32) {
    %c0_i32 = arith.constant 0 : i32
    %c0_i32_0 = arith.constant 0 : i32
    %c0_i32_1 = arith.constant 0 : i32
    return %c0_i32, %c0_i32_0 : i32, i32
  }
  func.func @transform_8(%arg0: i32) -> (i32, i32) {
    %c0_i32 = arith.constant 0 : i32
    %c0_i32_0 = arith.constant 0 : i32
    %c0_i32_1 = arith.constant 0 : i32
    return %c0_i32, %c0_i32_0 : i32, i32
  }
  func.func @transform_9(%arg0: i32) -> (i32, i32) {
    %c0_i32 = arith.constant 0 : i32
    %c0_i32_0 = arith.constant 0 : i32
    %c0_i32_1 = arith.constant 0 : i32
    return %c0_i32, %c0_i32_0 : i32, i32
  }
  func.func @transform_10(%arg0: i32) -> (i32, i32, i32, i32) {
    %c0_i32 = arith.constant 0 : i32
    %c0_i32_0 = arith.constant 0 : i32
    %c0_i32_1 = arith.constant 0 : i32
    %c0_i32_2 = arith.constant 0 : i32
    return %arg0, %c0_i32, %c0_i32_0, %c0_i32_1 : i32, i32, i32, i32
  }
}

</mosaic_0001>

<bundles_post_ra>
// kernel: tpu_custom_call.1
= control target key start
LH: loop header
LB: loop body
LE: loop exit
PB: predicated region body
PF: predicated region fallthrough
CT: control target
= control target key end

     0   :  { %s7907_s0 = inlined_call_operand.hbm [shape: f32[2,16,16,16], index: 0, kind: input, shape index: {}]   ;;  %s7908_s1 = inlined_call_operand.vmem [shape: bf16[16,128], index: 1, kind: input, shape index: {}]   ;;  %s7909_s2 = inlined_call_operand.hbm [shape: bf16[3,384,128], index: 2, kind: input, shape index: {}]   ;;  %s7910_s3 = inlined_call_operand.vmem [shape: bf16[128,16], index: 3, kind: input, shape index: {}]   ;;  %s7911_s4 = inlined_call_operand.vmem [shape: f32[1,128], index: 4, kind: input, shape index: {}]   ;;  %s7912_s5 = inlined_call_operand.vmem [shape: f32[1,128], index: 5, kind: input, shape index: {}]   ;;  %s7913_s6 = inlined_call_operand.vmem [shape: f32[1,128], index: 6, kind: input, shape index: {}]   ;;  %s7914_s7 = inlined_call_operand.vmem [shape: f32[1,128], index: 7, kind: input, shape index: {}]   ;;  %s7915_s8 = inlined_call_operand.vmem [shape: f32[1,16], index: 8, kind: input, shape index: {}]   ;;  %s7916_s9 = inlined_call_operand.vmem [shape: f32[1,16], index: 9, kind: input, shape index: {}]   ;;  %s7917_s10 = inlined_call_operand.hbm [shape: f32[2,16,16,16], index: 10, kind: output, shape index: {}]  }
   0x1   :  { %8043 = sst [smem:[#allocation54_spill]] %s7909_s2 }
   0x2   :  { %15 = vsyncpa [#allocation3], 0 }
   0x3   :  { %17 = vsyncpa [#allocation3 + $0x1], 0 }
   0x4   :  { %18 = vsyncpa [#allocation6], 0 }
   0x5   :  { %19 = vsyncpa [#allocation4], 0 }
   0x6   :  { %21 = vsyncpa [#allocation4 + $0x1], 0  ;;  %s5773_s13 = smov 0   ;;  %s5775_s14 = smov 0  }
   0x7   :  { %s5777_s15 = smov 0   ;;  %s5779_s16 = smov 0  }
   0x8 LB: > { %8044 = sst [smem:[#allocation11_spill]] %s5693_s13  ;;  %s5794_s17 = sadd.s32 4294967295, %s5705_s16   ;;  %s5705_s16 = sphi %s5779_s16, %s8411_s16   ;;  %s5701_s15 = sphi %s5777_s15, %s8414_s15   ;;  %s5697_s14 = sphi %s5775_s14, %s8413_s14   ;;  %s5693_s13 = sphi %s5773_s13, %s8412_s13  }
   0x9   : > { %s4331_s18 = sadd.s32 4294967294, %s5705_s16   ;;  %p47_p0 = scmp.ne.s32.totalorder %s5697_s14, %s5693_s13 }
   0xa   : > { %p7922_p1 = scmp.eq.s32.totalorder %s5794_s17, 0  ;;  %p266_p3 = scmp.eq.s32.totalorder %s4331_s18, 1 }
   0xb   : > { %p4332_p5 = scmp.ge.s32.totalorder %s5705_s16, 1  ;;  %p273_p7 = scmp.lt.s32.totalorder %s5705_s16, 3 }
   0xc   : > { %p5803_p4 = por %p7922_p1, %p47_p0  ;;  %p5808_p6 = por %p266_p3, %p47_p0 }
   0xd   : > { %p5813_p8 = pnand %p4332_p5, %p273_p7  ;;  %s5707_s22 = smov [#allocation5]  }
   0xe   : > { %s8045_s19 = scalar_select %p5803_p4, 1, 0 }
   0xf   : > { %s8046_s20 = scalar_select %p5808_p6, 1, 0 }
  0x10   : > { %s8048_s21 = scalar_select %p5813_p8, 1, 0 }
  0x11   : > { %8047 = sst [smem:[#allocation12_spill]] %s8046_s20  ;;  %s288_s23 = sshll.u32 %s5707_s22, 4  ;;  %s289_s23 = int_to_ptr.vmem [resolvable:$true] %s288_s23 }
  0x12   : > { %p5413_p9 = pneg %p5813_p8  ;;  %s5827_s25 = sadd.s32 1, %s5705_s16  }
  0x13   : > { %8050 = sst [smem:[#allocation13_spill]] %s5827_s25  ;;  %s34_s26 = sadd.s32 1, %s5701_s15 }
  0x14   : > { %p5822_p11 = pnand %p5413_p9, %p7922_p1  ;;  %s31_s27 = ssub.s32 %s5705_s16, %s5827_s25 }
  0x15   : > { %s5594_s28 = scalar_lea.vmem %s289_s23, 9216  ;;  %p5602_p5 = scmp.lt.s32.totalorder %s289_s23, %s289_s23 }
  0x16   : > { %p5585_p12 = pneg %p5822_p11  ;;  %p5595_p13 = scmp.ne.s32.totalorder %s289_s23, %s5594_s28 }
  0x17   : > { %p5603_p7 = scmp.lt.s32.totalorder %s5594_s28, %s5594_s28 }
  0x18   : > { %p5597_p0 = pnand %p5595_p13, %p5585_p12 }
  0x19   : > { %p5604_p10 = por %p5603_p7, %p5602_p5 }
  0x1a   : > { %p5598_p3 = pneg %p5597_p0 }
  0x1c   : > { %p5605_p2 = pnand %p5604_p10, %p5598_p3 }
  0x1e   : > { %5608 = shalt.err (!%p5605_p2)
}
  0x1f   : > { %s5708_s29 = smov 64   ;;  %s5709_s30 = smov 4  }
  0x20   : > { %s8051_s2 = sld [smem:[#allocation54_spill]]  ;;  %p32_p9 = scmp.eq.s32.totalorder %s31_s27, 0 }
  0x21   : > { %p41_p12 = scmp.ne.s32.totalorder %s5701_s15, %s5697_s14  ;;  %p42_p10 = scmp.eq.s32.totalorder %s5705_s16, 0 }
  0x22   : > { %p5426_p2 = scmp.lt.s32.totalorder %s5705_s16, 2  ;;  %p8052_p0 = scmp.eq.s32.totalorder %s5794_s17, 1 }
  0x23   : > { %s5844_s18 = scalar_select %p32_p9, %s5701_s15, %s34_s26  }
  0x24   : > { %p43_p13 = por %p42_p10, %p41_p12  ;;  %p5848_p3 = por %p8052_p0, %p41_p12 }
  0x25   : > { %s323_s28 = sand.u32 1, %s5701_s15   ;;  %s4726_s25 = sshll.u32 %s5705_s16, 12 }
  0x26   : > { %5416 = dma.hbm_to_vmem [thread:$0]  (!%p5822_p11), %s8051_s2, 9216, %s289_s23, [#allocation6], %s5708_s29, %s5708_s29, %s5709_s30  }
  0x27   : > { %s8053_s22 = scalar_select %p5848_p3, 1, 0 }
  0x28   : > { %s4335_s20 = sshll.u32 %s323_s28, 8  ;;  %s5857_s11 = scalar_lea.hbm %s7907_s0, %s4726_s25 }
  0x29   : > { %s327_s23 = scalar_lea.vmem [#allocation2], %s4335_s20  ;;  %p5859_p11 = pnand %p5426_p2, %p43_p13 }
  0x2a   : > { %s334_s26 = sshll.u32 %s327_s23, 4  ;;  %s5865_s29 = scalar_lea.sflag [#allocation3], %s323_s28  ;;  %s5863_s26 = int_to_ptr.vmem [resolvable:$true] %s334_s26 }
  0x2b   : > { %s5609_s30 = scalar_lea.hbm %s5857_s11, 4096  ;;  %p5611_p7 = pneg %p5859_p11 }
  0x2c   : > { %p5610_p5 = scmp.ne.s32.totalorder %s5857_s11, %s5609_s30  ;;  %s5614_s20 = scalar_lea.hbm %s7907_s0, 8192 }
  0x2d   : > { %p5615_p10 = scmp.lt.s32.totalorder %s5857_s11, %s7907_s0  ;;  %p5616_p2 = scmp.lt.s32.totalorder %s5614_s20, %s5609_s30 }
  0x2e   : > { %p5612_p9 = pnand %p5611_p7, %p5610_p5 }
  0x2f   : > { %p5617_p13 = por %p5616_p2, %p5615_p10 }
  0x30   : > { %p5613_p12 = pneg %p5612_p9 }
  0x32   : > { %p5618_p0 = pnand %p5617_p13, %p5613_p12 }
  0x34   : > { %5621 = shalt.err (!%p5618_p0)
}
  0x35   : > { %s5622_s28 = scalar_lea.vmem %s5863_s26, 4096  ;;  %s5710_s23 = smov [#allocation2]  }
  0x36   : > { %p5623_p1 = scmp.ne.s32.totalorder %s5863_s26, %s5622_s28  ;;  %s5627_s2 = sshll.u32 %s5710_s23, 4  ;;  %s5628_s2 = int_to_ptr.vmem [resolvable:$false] %s5627_s2 }
  0x37   : > { %s5629_s13 = scalar_lea.vmem %s5628_s2, 8192  ;;  %p5630_p9 = scmp.lt.s32.totalorder %s5863_s26, %s5628_s2 }
  0x38   : > { %p5625_p6 = pnand %p5623_p1, %p5611_p7  ;;  %p5631_p3 = scmp.lt.s32.totalorder %s5629_s13, %s5622_s28 }
  0x3a   : > { %p5626_p5 = pneg %p5625_p6  ;;  %p5632_p4 = por %p5631_p3, %p5630_p9 }
  0x3c   : > { %p5633_p8 = pnand %p5632_p4, %p5626_p5 }
  0x3e   : > { %5636 = shalt.err (!%p5633_p8)
}
  0x3f   : > { %s5711_s30 = smov 128   ;;  %s5712_s25 = smov 8  }
  0x40   : > { %5420 = dma.hbm_to_vmem [thread:$0]  (!%p5859_p11), %s5857_s11, 4096, %s5863_s26, %s5865_s29, %s5711_s30, %s5711_s30, %s5712_s25  }
  0x41   : > { %p8055_p1 = scmp.ne.s32.totalorder %s8048_s21, 0 }
  0x43   : > { %346 = sbr.rel (%p8055_p1) target bundleno = 1078 (0x436), region = 60 }
  0x48   : > { %s5889_s20 = sand.u32 1, %s5697_s14   ;;  %p8056_p4 = scmp.ne.s32.totalorder %s8045_s19, 0 }
  0x49   : > { %s4339_s2 = sshll.u32 %s5889_s20, 8  ;;  %s349_s12 = scalar_lea.sflag [#allocation3], %s5889_s20 }
  0x4a   : > { %s5895_s24 = scalar_lea.vmem [#allocation2], %s4339_s2 }
  0x4b   : > { %5680 = dma.done.wait (%p8056_p4), %s349_s12, 4096  }
  0x4c   : > { %5682 = vsyncadd (%p8056_p4), %s349_s12, 4294963200  ;;  %p8057_p6 = scmp.eq.s32.totalorder %s5794_s17, 0 }
  0x4e   : > { %5684 = dma.done.wait (%p8057_p6), [#allocation6], 9216   ;;  %p8058_p8 = pmov %p8057_p6 }
  0x4f   : > { %v5470_v0 = vld [vmem:[%s7908_s1] sm:$0xff]   ;;  %v395_v2 = vld [vmem:[%s5895_s24 + $0x8] sm:$0xff]  ;;  %vm7944_vm0 = vcmask 130048   ;;  %v396_v6 = vld [vmem:[%s5895_s24 + $0x10] sm:$0xff]  ;;  %vm7951_vm5 = vmmov 1   ;;  %s7704_s28 = scalar_lea.vmem [#allocation7], %s4339_s2 }
  0x50   : > { %5686 = vsyncadd (%p8058_p8), [#allocation6], 4294958080  ;;  %v394_v1 = vld [vmem:[%s5895_s24] sm:$0xff]  ;;  %5177 = vmatprep.subr.bf16.mxu0 %v5470_v0  ;;  %5403 = vmatprep.subr.bf16.mxu1 %v5470_v0  ;;  %v411_v5 = vld [vmem:[%s5895_s24 + $0x88] sm:$0xff]  ;;  %s4727_s2 = sshll.u32 %s5794_s17, 12  ;;  %s4248_s23 = sshll.u32 %s7704_s28, 4  ;;  %s7860_s23 = int_to_ptr.vmem [resolvable:$true] %s4248_s23 }
  0x51   : > { %v410_v3 = vld [vmem:[%s5895_s24 + $0x80] sm:$0xff]  ;;  %v426_v4 = vpack.c.bf16 %v395_v2, %v394_v1  ;;  %v397_v7 = vld [vmem:[%s5895_s24 + $0x18] sm:$0xff]  ;;  %5178 = vmatpush3.bf16.msra.mxu0 %v5470_v0  ;;  %5404 = vmatpush3.bf16.msra.mxu1 %v5470_v0  ;;  %v412_v10 = vld [vmem:[%s5895_s24 + $0x90] sm:$0xff]  ;;  %s7858_s25 = scalar_lea.hbm %s7917_s10, %s4727_s2  ;;  %s4235_s17 = scalar_lea.sflag [#allocation4], %s5889_s20 }
  0x52   : > { %v434_v8 = vpack.c.bf16 %v411_v5, %v410_v3  ;;  %v427_v9 = vpack.c.bf16 %v397_v7, %v396_v6  ;;  %v413_v11 = vld [vmem:[%s5895_s24 + $0x98] sm:$0xff]  ;;  %v398_v12 = vld [vmem:[%s5895_s24 + $0x20] sm:$0xff]  ;;  %v399_v14 = vld [vmem:[%s5895_s24 + $0x28] sm:$0xff]  ;;  %s5637_s12 = scalar_lea.vmem %s7860_s23, 4096  ;;  %p8406_p11 = scmp.ne.s32.totalorder %s8053_s22, 0 }
  0x53   : > { %5179 = vmatprep.mubr.msk.bf16.mxu0 %vm7944_vm0, %v426_v4  ;;  %v435_v13 = vpack.c.bf16 %v413_v11, %v412_v10  ;;  %v414_v15 = vld [vmem:[%s5895_s24 + $0xa0] sm:$0xff]  ;;  %v415_v16 = vld [vmem:[%s5895_s24 + $0xa8] sm:$0xff]  ;;  %v428_v17 = vpack.c.bf16 %v399_v14, %v398_v12  ;;  %v400_v19 = vld [vmem:[%s5895_s24 + $0x30] sm:$0xff]  ;;  %p5638_p3 = scmp.ne.s32.totalorder %s7860_s23, %s5637_s12 }
  0x54   : > { %5195 = vmatprep.mubr.msk.bf16.mxu1 %vm7944_vm0, %v434_v8  ;;  %v436_v18 = vpack.c.bf16 %v415_v16, %v414_v15  ;;  %5180 = vmatmul.mubr.msk.bf16.vlgmr.msra.gmra.mxu0 %vm7944_vm0, %v427_v9  ;;  %v401_v20 = vld [vmem:[%s5895_s24 + $0x38] sm:$0xff]  ;;  %v416_v21 = vld [vmem:[%s5895_s24 + $0xb0] sm:$0xff]  ;;  %v402_v23 = vld [vmem:[%s5895_s24 + $0x40] sm:$0xff] }
  0x55   : > { %5196 = vmatmul.mubr.msk.bf16.vlgmr.msra.gmra.mxu1 %vm7944_vm0, %v435_v13  ;;  %5183 = vmatprep.mubr.msk.bf16.mxu0 %vm7944_vm0, %v428_v17  ;;  %v417_v22 = vld [vmem:[%s5895_s24 + $0xb8] sm:$0xff]  ;;  %v403_v24 = vld [vmem:[%s5895_s24 + $0x48] sm:$0xff]  ;;  %v418_v25 = vld [vmem:[%s5895_s24 + $0xc0] sm:$0xff]  ;;  %v429_v27 = vpack.c.bf16 %v401_v20, %v400_v19  ;;  %v770_v17 = vlaneseq  ;;  %p5639_p7 = pnand %p5638_p3, %p8406_p11 }
  0x56   : > { %5199 = vmatprep.mubr.msk.bf16.mxu1 %vm7944_vm0, %v436_v18  ;;  %v419_v26 = vld [vmem:[%s5895_s24 + $0xc8] sm:$0xff]  ;;  %v437_v28 = vpack.c.bf16 %v417_v22, %v416_v21  ;;  %v430_v29 = vpack.c.bf16 %v403_v24, %v402_v23  ;;  %v5471_v31 = vld [vmem:[#allocation5 + $0x178] sm:$0xff]   ;;  %v404_v32 = vld [vmem:[%s5895_s24 + $0x50] sm:$0xff] }
  0x57   : > { %v438_v30 = vpack.c.bf16 %v419_v26, %v418_v25  ;;  %v405_v33 = vld [vmem:[%s5895_s24 + $0x58] sm:$0xff]  ;;  %v420_v34 = vld [vmem:[%s5895_s24 + $0xd0] sm:$0xff]  ;;  %v406_v36 = vld [vmem:[%s5895_s24 + $0x60] sm:$0xff]  ;;  %5211 = vmatprep.subr.bf16.mxu0 %v5471_v31  ;;  %v5972_v23 = vshrl.u32 %v770_v17, 7  ;;  %p5640_p12 = pneg %p5639_p7 }
  0x58   : > { %v421_v35 = vld [vmem:[%s5895_s24 + $0xd8] sm:$0xff]  ;;  %v407_v37 = vld [vmem:[%s5895_s24 + $0x68] sm:$0xff]  ;;  %v422_v38 = vld [vmem:[%s5895_s24 + $0xe0] sm:$0xff]  ;;  %5212 = vmatpush3.bf16.msra.mxu0 %v5471_v31  ;;  %v431_v41 = vpack.c.bf16 %v405_v33, %v404_v32 }
  0x59   : > { %v423_v39 = vld [vmem:[%s5895_s24 + $0xe8] sm:$0xff]  ;;  %v5472_v40 = vld [vmem:[#allocation5 + $0x170] sm:$0xff]   ;;  %v439_v42 = vpack.c.bf16 %v421_v35, %v420_v34  ;;  %v432_v44 = vpack.c.bf16 %v407_v37, %v406_v36  ;;  %v409_v47 = vld [vmem:[%s5895_s24 + $0x78] sm:$0xff]  ;;  %v774_v33 = vadd.s32 24, %v5972_v23  ;;  %v5992_v35 = vadd.s32 40, %v5972_v23 }
  0x5a   : > { %5213 = vmatprep.subr.bf16.mxu0 %v5472_v40  ;;  %v5473_v43 = vld [vmem:[#allocation5 + $0x168] sm:$0xff]   ;;  %v440_v45 = vpack.c.bf16 %v423_v39, %v422_v38  ;;  %v408_v46 = vld [vmem:[%s5895_s24 + $0x70] sm:$0xff]  ;;  %v425_v49 = vld [vmem:[%s5895_s24 + $0xf8] sm:$0xff]  ;;  %v5995_v36 = vadd.s32 56, %v5972_v23  ;;  %vm7957_vm1 = vcmp.lt.s32.totalorder %v5972_v23, 7  ;;  %vm7950_vm11 = vcmp.lt.s32.totalorder %v5972_v23, 1 }
  0x5b   : > { %v424_v48 = vld [vmem:[%s5895_s24 + $0xf0] sm:$0xff]  ;;  %v433_v50 = vpack.c.bf16 %v409_v47, %v408_v46  ;;  %v5474_v52 = vld [vmem:[#allocation5 + $0x160] sm:$0xff]   ;;  %v5475_v53 = vld [vmem:[#allocation5 + $0x158] sm:$0xff]  }
  0x5c   : > { %5184 = vmatmul.mubr.msk.bf16.gmra.mxu0 %vm7944_vm0, %v429_v27  ;;  %v441_v51 = vpack.c.bf16 %v425_v49, %v424_v48  ;;  %v5476_v54 = vld [vmem:[#allocation5 + $0x138] sm:$0xff]   ;;  %v5478_v56 = vld [vmem:[#allocation5 + $0x150] sm:$0xff]   ;;  %v5481_v59 = vld [vmem:[#allocation5 + $0x148] sm:$0xff]   ;;  %v806_v49 = vand.u32 15, %v774_v33 }
  0x5d   : > { %5200 = vmatmul.mubr.msk.bf16.gmra.mxu1 %vm7944_vm0, %v437_v28  ;;  %5187 = vmatprep.mubr.msk.bf16.mxu0 %vm7944_vm0, %v430_v29  ;;  %v5477_v55 = vld [vmem:[#allocation5 + $0xf8] sm:$0xff]   ;;  %v5479_v57 = vld [vmem:[#allocation5 + $0x130] sm:$0xff]   ;;  %v5482_v60 = vld [vmem:[#allocation5 + $0x128] sm:$0xff]   ;;  %v772_v28 = vadd.s32 8, %v5972_v23 }
  0x5e   : > { %5203 = vmatprep.mubr.msk.bf16.mxu1 %vm7944_vm0, %v438_v30  ;;  %5214 = vmatpush3.bf16.msra.mxu0 %v5472_v40  ;;  %v5480_v58 = vld [vmem:[#allocation5 + $0xf0] sm:$0xff]   ;;  %v5483_v61 = vld [vmem:[#allocation5 + $0xe8] sm:$0xff]   ;;  %v5484_v62 = vld [vmem:[#allocation5 + $0x140] sm:$0xff]   ;;  %vm6041_vm3 = vcmp.le.s32.totalorder %v806_v49, 14 }
  0x5f   : > { %5215 = vmatprep.subr.bf16.mxu0 %v5473_v43  ;;  %4745 = vmatprep.subr.bf16.mxu1 %v5476_v54  ;;  %v5485_v63 = vld [vmem:[#allocation5 + $0x120] sm:$0xff]   ;;  %v5487_v1 = vld [vmem:[#allocation5 + $0x118] sm:$0xff]   ;;  %v5489_v3 = vld [vmem:[#allocation5 + $0x110] sm:$0xff]  }
  0x60   : > { %4746 = vmatpush3.bf16.msra.mxu1 %v5477_v55  ;;  %v5486_v0 = vld [vmem:[#allocation5 + $0xe0] sm:$0xff]   ;;  %v5488_v2 = vld [vmem:[#allocation5 + $0xd8] sm:$0xff]   ;;  %v5490_v4 = vld [vmem:[#allocation5 + $0xd0] sm:$0xff]  }
  0x61   : > { %4747 = vmatprep.subr.bf16.mxu1 %v5479_v57  ;;  %v5491_v5 = vld [vmem:[#allocation5 + $0x108] sm:$0xff]   ;;  %v5493_v7 = vld [vmem:[#allocation5 + $0x100] sm:$0xff]   ;;  %v5956_v9 = vld [vmem:[#allocation5 + $0xb8] sm:$0xff]  }
  0x62   : > { %5216 = vmatpush3.bf16.msra.mxu0 %v5473_v43  ;;  %v5492_v6 = vld [vmem:[#allocation5 + $0xc8] sm:$0xff]   ;;  %v5494_v8 = vld [vmem:[#allocation5 + $0xc0] sm:$0xff]   ;;  %v5496_v10 = vld [vmem:[#allocation5 + $0x78] sm:$0xff]  }
  0x63   : > { %5217 = vmatprep.subr.bf16.mxu0 %v5474_v52  ;;  %v5970_v22 = vld [vmem:[%s7911_s4] ss:$0 sm:$0xff]  ;;  %vm6148_vm7 = vmpackc.low %vm6041_vm3, %vm7951_vm5 }
  0x64   : > { %5188 = vmatmul.mubr.msk.bf16.gmra.mxu0 %vm7944_vm0, %v431_v41  ;;  %4748 = vmatpush3.bf16.msra.mxu1 %v5480_v58  ;;  %v5989_v34 = vld [vmem:[%s7912_s5] ss:$0 sm:$0xff]  ;;  %v6002_v41 = vadd.s32 72, %v5972_v23  ;;  %v6025_v58 = vadd.s32 120, %v5972_v23 }
  0x65   : > { %5204 = vmatmul.mubr.msk.bf16.gmra.mxu1 %vm7944_vm0, %v439_v42  ;;  %5191 = vmatprep.mubr.msk.bf16.mxu0 %vm7944_vm0, %v432_v44  ;;  %v804_v44 = vand.u32 15, %v772_v28 }
  0x66   : > { %5207 = vmatprep.mubr.msk.bf16.mxu1 %vm7944_vm0, %v440_v45  ;;  %5218 = vmatpush3.bf16.msra.mxu0 %v5474_v52  ;;  %v6007_v45 = vadd.s32 88, %v5972_v23  ;;  %v810_v52 = vand.u32 15, %v5995_v36  ;;  %v8080_v36 = vand.u32 15, %v6002_v41  ;;  %v5500_v41 = vld [vmem:[#allocation5 + $0x30] sm:$0xff]  }
  0x67   : > { %5219 = vmatprep.subr.bf16.mxu0 %v5475_v53  ;;  %4749 = vmatprep.subr.bf16.mxu1 %v5482_v60  ;;  %vm6031_vm2 = vcmp.le.s32.totalorder %v804_v44, 14 }
  0x68   : > { %4750 = vmatpush3.bf16.msra.mxu1 %v5483_v61  ;;  %vm6134_vm6 = vmpackc.low %vm6031_vm2, %vm7951_vm5  ;;  %v5497_v61 = vld [vmem:[#allocation5 + $0x38] sm:$0xff]   ;;  %vm6167_vm8 = vcmp.le.s32.totalorder %v810_v52, 14  ;;  %vm6184_vm9 = vcmp.le.s32.totalorder %v8080_v36, 14  ;;  %v8109_v52 = vmov 0 }
  0x69   : > { %4751 = vmatprep.subr.bf16.mxu1 %v5485_v63  ;;  %vm6284_vm2 = vmpackc.low %vm6167_vm8, %vm7951_vm5 }
  0x6a   : > { %5220 = vmatpush3.bf16.msra.mxu0 %v5475_v53  ;;  %vm6300_vm3 = vmpackc.low %vm6184_vm9, %vm7951_vm5 }
  0x6b   : > { %5221 = vmatprep.subr.bf16.mxu0 %v5478_v56 }
  0x6c   : > { %5192 = vmatmul.mubr.msk.bf16.gmra.mxu0 %vm7944_vm0, %v433_v50  ;;  %4752 = vmatpush3.bf16.msra.mxu1 %v5486_v0  ;;  %v6013_v50 = vadd.s32 104, %v5972_v23 }
  0x6d   : > { %5208 = vmatmul.mubr.msk.bf16.gmra.mxu1 %vm7944_vm0, %v441_v51  ;;  %4753 = vmatprep.subr.bf16.mxu1 %v5487_v1  ;;  %v808_v51 = vand.u32 15, %v5992_v35  ;;  %v6079_v35 = vadd.s32 200, %v5972_v23 }
  0x6e   : > { %5222 = vmatpush3.bf16.msra.mxu0 %v5478_v56 }
  0x6f   : > { %5223 = vmatprep.subr.bf16.mxu0 %v5481_v59  ;;  %8064 = vst [vmem:[#allocation15_spill] sm:$0xff] %v6079_v35  ;;  %vm6116_vm4 = vcmp.le.s32.totalorder %v808_v51, 14 }
  0x70   : > { %4754 = vmatpush3.bf16.msra.mxu1 %v5488_v2  ;;  %vm6233_vm12 = vmpackc.low %vm6116_vm4, %vm7951_vm5 }
  0x71   : > { %4755 = vmatprep.subr.bf16.mxu1 %v5489_v3 }
  0x72   : > { %5224 = vmatpush3.bf16.msra.mxu0 %v5481_v59 }
  0x73   : > { %5225 = vmatprep.subr.bf16.mxu0 %v5484_v62 }
  0x74   : > { %4756 = vmatpush3.bf16.msra.mxu1 %v5490_v4  ;;  %v6047_v4 = vadd.s32 136, %v5972_v23 }
  0x75   : > { %4757 = vmatprep.subr.bf16.mxu1 %v5491_v5  ;;  %v6050_v5 = vadd.s32 16, %v5972_v23 }
  0x76   : > { %5226 = vmatpush3.bf16.msra.mxu0 %v5484_v62 }
  0x77   : > { %4881 = vmatprep.subr.bf16.mxu0 %v5496_v10  ;;  %v6057_v10 = vadd.s32 168, %v5972_v23 }
  0x78   : > { %4758 = vmatpush3.bf16.msra.mxu1 %v5492_v6 }
  0x79   : > { %4759 = vmatprep.subr.bf16.mxu1 %v5493_v7 }
  0x7c   : > { %4760 = vmatpush3.bf16.msra.mxu1 %v5494_v8  ;;  %v6054_v8 = vadd.s32 152, %v5972_v23 }
  0x7d   : > { %5259 = vmatprep.subr.bf16.mxu1 %v5956_v9 }
 0x114   : > { %v5181_v11 = vpop.f32.mrf.mxu0 }
 0x115   : > { %v5197_v12 = vpop.f32.mrf.mxu1  ;;  %v669_v24 = vmul.f32 %v5181_v11, %v5970_v22  ;;  %v6060_v11 = vadd.s32 32, %v5972_v23 }
 0x116   : > { %v533_v13 = vpop.f32.mrf.mxu0  ;;  %v685_v6 = vmul.f32 %v5197_v12, %v5970_v22  ;;  %v6069_v12 = vadd.s32 184, %v5972_v23 }
 0x117   : > { %v5959_v14 = vpop.f32.mrf.mxu1  ;;  %v708_v37 = vadd.f32 %v5989_v34, %v669_v24  ;;  %v667_v38 = vmul.f32 %v5970_v22, %v533_v13 }
 0x118   : > { %v5182_v15 = vpop.f32.mrf.mxu0  ;;  %8063 = vst [vmem:[#allocation14_spill] sm:$0xff] %v6069_v12  ;;  %v8092_v12 = vand.u32 15, %v6007_v45  ;;  %v8101_v45 = vmov 0 }
 0x119   : > { %v5961_v16 = vpop.f32.mrf.mxu1  ;;  %v670_v27 = vmul.f32 %v5182_v15, %v5970_v22  ;;  %v6017_v53 = vmax.f32 %v708_v37, 0.0  ;;  %v706_v54 = vadd.f32 %v5989_v34, %v667_v38  ;;  %v724_v37 = vadd.f32 %v5989_v34, %v685_v6 }
 0x11a   : > { %v536_v18 = vpop.f32.mrf.mxu0  ;;  %vm6245_vm13 = vcmp.le.s32.totalorder %v8092_v12, 14  ;;  %v8102_v45 = vsel %vm6284_vm2, 4294967295, %v8101_v45 }
 0x11b   : > { %v5963_v19 = vpop.f32.mrf.mxu1  ;;  %v668_v29 = vmul.f32 %v5970_v22, %v536_v18  ;;  %v709_v42 = vadd.f32 %v5989_v34, %v670_v27  ;;  %v1286_v13 = vrot.slane %v6017_v53, 1  ;;  %v6063_v15 = vmax.f32 %v706_v54, 0.0  ;;  %8103 = vst [vmem:[#allocation26_spill] sm:$0xff] %v8102_v45  ;;  %vm6394_vm0 = vmpackc.low %vm6245_vm13, %vm7951_vm5 }
 0x11c   : > { %v5185_v20 = vpop.f32.mrf.mxu0  ;;  %v6107_v54 = vadd.s32 216, %v5972_v23  ;;  %v6109_v18 = vmax.f32 %v724_v37, 0.0 }
 0x11d   : > { %v5965_v21 = vpop.f32.mrf.mxu1  ;;  %v707_v46 = vadd.f32 %v5989_v34, %v668_v29  ;;  %v6027_v59 = vmax.f32 %v709_v42, 0.0  ;;  %v7926_v44 = vrot.slane %v6063_v15, 1 }
 0x11e   : > { %v549_v25 = vpop.f32.mrf.mxu0  ;;  %8065 = vst [vmem:[#allocation16_spill] sm:$0xff] %v6107_v54  ;;  %v8186_v45 = vrot.slane %v6109_v18, 1 }
 0x11f   : > { %v5975_v26 = vpop.f32.mrf.mxu1  ;;  %v671_v30 = vmul.f32 %v5970_v22, %v549_v25  ;;  %v6037_v0 = vmax.f32 %v707_v46, 0.0  ;;  %v1287_v24 = vrot.slane %v6027_v59, 1  ;;  %v673_v25 = vmul.f32 %v5185_v20, %v5970_v22 }
 0x120   : > { %v5981_v31 = vpop.f32.mrf.mxu0 }
 0x121   : > { %v5983_v32 = vpop.f32.mrf.mxu1  ;;  %v710_v43 = vadd.f32 %v5989_v34, %v671_v30  ;;  %v1285_v29 = vrot.slane %v6037_v0, 1  ;;  %v674_v46 = vmul.f32 %v5981_v31, %v5970_v22  ;;  %v1345_v6 = vsel %vm7957_vm1, %v1286_v13, %v1287_v24 }
 0x122   : > { %v552_v39 = vpop.f32.mrf.mxu0  ;;  %v712_v30 = vadd.f32 %v5989_v34, %v673_v25  ;;  %v683_v25 = vmul.f32 %v5970_v22, %v5959_v14  ;;  %v6121_v31 = vadd.s32 64, %v5972_v23 }
 0x123   : > { %v5999_v40 = vpop.f32.mrf.mxu1  ;;  %v6029_v60 = vmax.f32 %v710_v43, 0.0  ;;  %v672_v28 = vmul.f32 %v5970_v22, %v552_v39  ;;  %v1346_v39 = vsel %vm7957_vm1, %v1285_v29, %v1286_v13  ;;  %v713_v37 = vadd.f32 %v5989_v34, %v674_v46 }
 0x124   : > { %v5189_v47 = vpop.f32.mrf.mxu0  ;;  %8068 = vst [vmem:[#allocation17_spill] sm:$0xff] %v6121_v31  ;;  %v1347_v14 = vsel %vm7957_vm1, %v7926_v44, %v1285_v29  ;;  %v6138_v51 = vmax.f32 %v712_v30, 0.0  ;;  %v8074_v29 = vmov 0  ;;  %v5499_v44 = vld [vmem:[#allocation5 + $0x70] sm:$0xff]  }
 0x125   : > { %v6010_v48 = vpop.f32.mrf.mxu1  ;;  %v7927_v27 = vrot.slane %v6029_v60, 1  ;;  %v711_v20 = vadd.f32 %v5989_v34, %v672_v28  ;;  %v6142_v46 = vpack.c.bf16 %v1346_v39, %v1347_v14  ;;  %v8075_v29 = vsel %vm6148_vm7, 4294967295, %v8074_v29 }
 0x126   : > { %v565_v55 = vpop.f32.mrf.mxu0  ;;  %8076 = vst [vmem:[#allocation21_spill] sm:$0xff] %v8075_v29  ;;  %v6157_v39 = vadd.s32 232, %v5972_v23  ;;  %v6175_v63 = vmax.f32 %v713_v37, 0.0  ;;  %v8083_v37 = vand.u32 15, %v5972_v23  ;;  %v963_v29 = vrot.slane %v6063_v15, 7 }
 0x127   : > { %v6021_v56 = vpop.f32.mrf.mxu1  ;;  %v675_v49 = vmul.f32 %v5970_v22, %v565_v55  ;;  %v1344_v43 = vsel %vm7957_vm1, %v1287_v24, %v7927_v27  ;;  %v6104_v55 = vadd.s32 48, %v5972_v23  ;;  %v677_v24 = vmul.f32 %v5189_v47, %v5970_v22  ;;  %8073 = vst [vmem:[#allocation20_spill] sm:$0xff] %v6142_v46  ;;  %5227 = vmatprep.mubr.msk.bf16.mxu0 %vm6134_vm6, %v6142_v46 }
 0x128   : > { %v5190_v7 = vpop.f32.mrf.mxu0  ;;  %v6123_v3 = vpack.c.bf16 %v1344_v43, %v1345_v6  ;;  %v8070_v47 = vmov 0  ;;  %v6140_v43 = vmax.f32 %v711_v20, 0.0  ;;  %v686_v6 = vmul.f32 %v5961_v16, %v5970_v22  ;;  %8077 = vst [vmem:[#allocation22_spill] sm:$0xff] %v6157_v39 }
 0x129   : > { %v6039_v1 = vpop.f32.mrf.mxu1  ;;  %v714_v62 = vadd.f32 %v5989_v34, %v675_v49  ;;  %v8071_v47 = vsel %vm6134_vm6, 4294967295, %v8070_v47  ;;  %v678_v30 = vmul.f32 %v5190_v7, %v5970_v22  ;;  %v716_v2 = vadd.f32 %v5989_v34, %v677_v24 }
 0x12a   : > { %v568_v38 = vpop.f32.mrf.mxu0  ;;  %8069 = vst [vmem:[#allocation18_spill] sm:$0xff] %v6123_v3  ;;  %8072 = vst [vmem:[#allocation19_spill] sm:$0xff] %v8071_v47  ;;  %v684_v24 = vmul.f32 %v5970_v22, %v5963_v19  ;;  %5228 = vmatmul.mubr.msk.bf16.vlgmr.msra.gmra.mxu0 %vm6148_vm7, %v6123_v3  ;;  %v1290_v20 = vrot.slane %v6138_v51, 1  ;;  %v689_v19 = vmul.f32 %v5965_v21, %v5970_v22  ;;  %vm6195_vm10 = vcmp.ge.s32.totalorder %v8083_v37, 1  ;;  %v5501_v21 = vld [vmem:[#allocation5 + $0x68] sm:$0xff]  }
 0x12b   : > { %v6065_v17 = vpop.f32.mrf.mxu1  ;;  %v676_v49 = vmul.f32 %v5970_v22, %v568_v38  ;;  %v722_v38 = vadd.f32 %v5989_v34, %v683_v25  ;;  %v6177_v57 = vmax.f32 %v714_v62, 0.0  ;;  %v1289_v62 = vrot.slane %v6140_v43, 1  ;;  %4882 = vmatpush3.bf16.msra.mxu0 %v5497_v61  ;;  %vm6318_vm4 = vmpackc.low %vm7951_vm5, %vm6195_vm10  ;;  %v5498_v25 = vld [vmem:[#allocation5 + $0xb0] sm:$0xff]  }
 0x12c   : > { %v5193_v33 = vpop.f32.mrf.mxu0  ;;  %v725_v36 = vadd.f32 %v5989_v34, %v686_v6  ;;  %v717_v47 = vadd.f32 %v5989_v34, %v678_v30  ;;  %4883 = vmatprep.subr.bf16.mxu0 %v5499_v44  ;;  %v6207_v37 = vmax.f32 %v716_v2, 0.0  ;;  %v723_v6 = vadd.f32 %v5989_v34, %v684_v24 }
 0x12d   : > { %v6082_v42 = vpop.f32.mrf.mxu1  ;;  %v715_v14 = vadd.f32 %v5989_v34, %v676_v49  ;;  %v6204_v46 = vmax.f32 %v722_v38, 0.0  ;;  %v1291_v30 = vrot.slane %v6175_v63, 1  ;;  %v728_v44 = vadd.f32 %v5989_v34, %v689_v19 }
 0x12e   : > { %v581_v27 = vpop.f32.mrf.mxu0  ;;  %8086 = vst [vmem:[#allocation23_spill] sm:$0xff] %v6207_v37  ;;  %v681_v39 = vmul.f32 %v5193_v33, %v5970_v22  ;;  %v1342_v2 = vsel %vm7957_vm1, %v1289_v62, %v1290_v20  ;;  %v6220_v31 = vmax.f32 %v725_v36, 0.0  ;;  %v6222_v24 = vmax.f32 %v717_v47, 0.0  ;;  %v5503_v33 = vld [vmem:[#allocation5 + $0x60] sm:$0xff]  }
 0x12f   : > { %v6114_v28 = vpop.f32.mrf.mxu1  ;;  %v679_v49 = vmul.f32 %v5970_v22, %v581_v27  ;;  %v6209_v61 = vmax.f32 %v715_v14, 0.0  ;;  %v1292_v27 = vrot.slane %v6177_v57, 1  ;;  %4884 = vmatpush3.bf16.msra.mxu0 %v5500_v41  ;;  %v5502_v14 = vld [vmem:[#allocation5 + $0x28] sm:$0xff]   ;;  %v1294_v41 = vrot.slane %v6207_v37, 1 }
 0x130   : > { %v5194_v38 = vpop.f32.mrf.mxu0  ;;  %4885 = vmatprep.subr.bf16.mxu0 %v5501_v21  ;;  %v687_v21 = vmul.f32 %v5970_v22, %v5975_v26  ;;  %v6262_v12 = vmax.f32 %v723_v6, 0.0  ;;  %v6264_v13 = vmax.f32 %v728_v44, 0.0  ;;  %v720_v26 = vadd.f32 %v5989_v34, %v681_v39 }
 0x131   : > { %v5210_v16 = vpop.f32.mrf.mxu1  ;;  %v1293_v47 = vrot.slane %v6209_v61, 1  ;;  %v1340_v37 = vsel %vm7957_vm1, %v1291_v30, %v1292_v27  ;;  %v1341_v39 = vsel %vm7957_vm1, %v1290_v20, %v1291_v30  ;;  %v8105_v7 = vmov 0 }
 0x132   : > { %v698_v3 = vmul.f32 %v5210_v16, %v5970_v22  ;;  %v718_v16 = vadd.f32 %v5989_v34, %v679_v49  ;;  %v8087_v49 = vrot.slane %v6029_v60, 1  ;;  %v8106_v7 = vsel %vm6300_vm3, 4294967295, %v8105_v7 }
 0x133   : > { %4886 = vmatpush3.bf16.msra.mxu0 %v5502_v14  ;;  %v6292_v14 = vpack.c.bf16 %v6037_v0, %v6063_v15  ;;  %v1338_v20 = vsel %vm7957_vm1, %v1293_v47, %v1294_v41  ;;  %8107 = vst [vmem:[#allocation28_spill] sm:$0xff] %v8106_v7  ;;  %v8108_v30 = vrot.slane %v6037_v0, 7  ;;  %v8110_v52 = vsel %vm6318_vm4, 4294967295, %v8109_v52 }
 0x134   : > { %v737_v54 = vadd.f32 %v5989_v34, %v698_v3  ;;  %v6224_v35 = vmax.f32 %v718_v16, 0.0  ;;  %v1343_v19 = vsel %vm7957_vm1, %v8087_v49, %v1289_v62  ;;  %v8088_v3 = vmov 0  ;;  %4887 = vmatprep.subr.bf16.mxu0 %v5503_v33  ;;  %8111 = vst [vmem:[#allocation29_spill] sm:$0xff] %v8110_v52  ;;  %v648_v52 = vpop.f32.mrf.mxu1 }
 0x135   : > { %v8089_v3 = vsel %vm6233_vm12, 4294967295, %v8088_v3  ;;  %v6241_v16 = vpack.c.bf16 %v1342_v2, %v1343_v19  ;;  %v682_v49 = vmul.f32 %v5194_v38, %v5970_v22  ;;  %v8095_v2 = vand.u32 15, %v6013_v50  ;;  %2006 = vmatprep.mubr.bf16.mxu1 %v6292_v14 }
 0x136   : > { %8090 = vst [vmem:[#allocation24_spill] sm:$0xff] %v8089_v3  ;;  %v6239_v36 = vmax.f32 %v737_v54, 0.0  ;;  %v584_v54 = vpop.f32.mrf.mxu0  ;;  %v8098_v38 = vand.u32 15, %v6050_v5  ;;  %v5504_v5 = vld [vmem:[#allocation5 + $0x20] sm:$0xff]   ;;  %v8131_v7 = vrot.slane %v6224_v35, 1  ;;  %v8136_v19 = vmov 0 }
 0x137   : > { %8091 = vst [vmem:[#allocation25_spill] sm:$0xff] %v6241_v16  ;;  %vm6257_vm14 = vcmp.le.s32.totalorder %v8095_v2, 14  ;;  %5231 = vmatprep.mubr.msk.bf16.mxu0 %vm6233_vm12, %v6241_v16  ;;  %v1295_v2 = vrot.slane %v6222_v24, 1  ;;  %v680_v6 = vmul.f32 %v5970_v22, %v584_v54  ;;  %v721_v33 = vadd.f32 %v5989_v34, %v682_v49  ;;  %4888 = vmatpush3.bf16.msra.mxu0 %v5504_v5 }
 0x138   : > { %vm6272_vm15 = vcmp.ge.s32.totalorder %v8098_v38, 1  ;;  %v7941_v44 = vrot.slane %v6239_v36, 7  ;;  %v6288_v38 = vpack.c.bf16 %v1340_v37, %v1341_v39  ;;  %v1026_v37 = vsel %vm7950_vm11, %v963_v29, %v8108_v30  ;;  %vm6422_vm13 = vmpackc.low %vm6257_vm14, %vm7951_vm5 }
 0x139   : > { %v1339_v39 = vsel %vm7957_vm1, %v1292_v27, %v1293_v47  ;;  %v6322_v16 = vmax.f32 %v720_v26, 0.0  ;;  %v5505_v47 = vld [vmem:[#allocation5 + $0x58] sm:$0xff]   ;;  %v726_v49 = vadd.f32 %v5989_v34, %v687_v21  ;;  %v690_v21 = vmul.f32 %v5983_v32, %v5970_v22 }
 0x13a   : > { %8104 = vst [vmem:[#allocation27_spill] sm:$0xff] %v6288_v38  ;;  %v1027_v54 = vsel %vm7950_vm11, %v7941_v44, %v963_v29  ;;  %5232 = vmatmul.mubr.msk.bf16.gmra.mxu0 %vm6284_vm2, %v6288_v38  ;;  %v719_v29 = vadd.f32 %v5989_v34, %v680_v6  ;;  %v6331_v27 = vpack.c.bf16 %v1338_v20, %v1339_v39  ;;  %v8113_v44 = vrot.slane %v6224_v35, 1  ;;  %v5506_v6 = vld [vmem:[#allocation5 + $0x18] sm:$0xff]  }
 0x13b   : > { %v6324_v30 = vpack.c.bf16 %v1026_v37, %v1027_v54  ;;  %v1337_v37 = vsel %vm7957_vm1, %v1294_v41, %v1295_v2  ;;  %v6342_v54 = vpack.c.bf16 %v6027_v59, %v6017_v53  ;;  %v8114_v41 = vand.u32 15, %v6025_v58  ;;  %4889 = vmatprep.subr.bf16.mxu0 %v5505_v47 }
 0x13c   : > { %8112 = vst [vmem:[#allocation30_spill] sm:$0xff] %v6331_v27  ;;  %v1336_v26 = vsel %vm7957_vm1, %v1295_v2, %v8113_v44  ;;  %v6348_v38 = vmax.f32 %v719_v29, 0.0  ;;  %5235 = vmatprep.mubr.msk.bf16.mxu0 %vm6300_vm3, %v6331_v27  ;;  %v5508_v44 = vld [vmem:[#allocation5 + $0x50] sm:$0xff]   ;;  %v6365_v39 = vmax.f32 %v721_v33, 0.0  ;;  %v8117_v20 = vand.u32 15, %v6047_v4  ;;  %4890 = vmatpush3.bf16.msra.mxu0 %v5506_v6 }
 0x13d   : > { %4387 = vmatmul.mubr.msk.bf16.vlgmr.msra.gmra.mxu1 %vm6318_vm4, %v6324_v30  ;;  %vm6358_vm8 = vcmp.le.s32.totalorder %v8114_v41, 14  ;;  %v688_v41 = vmul.f32 %v5970_v22, %v5999_v40  ;;  %v1298_v5 = vrot.slane %v6322_v16, 1  ;;  %v6379_v29 = vpack.c.bf16 %v1336_v26, %v1337_v37  ;;  %4891 = vmatprep.subr.bf16.mxu0 %v5508_v44 }
 0x13e   : > { %5260 = vmatpush3.bf16.msra.mxu1 %v5956_v9  ;;  %2014 = vmatprep.mubr.bf16.mxu1 %v6342_v54  ;;  %vm6371_vm9 = vcmp.le.s32.totalorder %v8117_v20, 14  ;;  %v1297_v32 = vrot.slane %v6348_v38, 1  ;;  %v8121_v9 = vand.u32 15, %v6060_v11  ;;  %v6387_v4 = vmax.f32 %v726_v49, 0.0 }
 0x13f   : > { %8120 = vst [vmem:[#allocation31_spill] sm:$0xff] %v6379_v29  ;;  %5261 = vmatprep.subr.bf16.mxu1 %v5498_v25  ;;  %v693_v20 = vmul.f32 %v6010_v48, %v5970_v22  ;;  %v8124_v40 = vmov 0  ;;  %v8127_v26 = vrot.slane %v6027_v59, 7  ;;  %v8128_v11 = vrot.slane %v6017_v53, 7 }
 0x140   : > { %vm6383_vm10 = vcmp.ge.s32.totalorder %v8121_v9, 1  ;;  %v8125_v40 = vsel %vm6394_vm0, 4294967295, %v8124_v40  ;;  %v8130_v49 = vrot.slane %v6037_v0, 7  ;;  %v729_v62 = vadd.f32 %v5989_v34, %v690_v21 }
 0x141   : > { %8126 = vst [vmem:[#allocation32_spill] sm:$0xff] %v8125_v40  ;;  %v1024_v37 = vsel %vm7950_vm11, %v8128_v11, %v8127_v26  ;;  %v8129_v47 = vmov %v8128_v11  ;;  %v691_v9 = vmul.f32 %v5970_v22, %v6021_v56  ;;  %v1334_v27 = vsel %vm7957_vm1, %v1297_v32, %v1298_v5 }
 0x142   : > { %v1025_v48 = vsel %vm7950_vm11, %v8130_v49, %v8129_v47  ;;  %v1335_v53 = vsel %vm7957_vm1, %v8131_v7, %v1297_v32  ;;  %v8132_v0 = vmov 0  ;;  %v694_v56 = vmul.f32 %v6039_v1, %v5970_v22  ;;  %vm6436_vm11 = vmpackc.low %vm7951_vm5, %vm6272_vm15  ;;  %5262 = vmatpush3.bf16.msra.mxu1 %v5498_v25  ;;  %5236 = vmatmul.mubr.msk.bf16.gmra.mxu0 %vm6394_vm0, %v6379_v29  ;;  %v5514_v47 = vld [vmem:[#allocation5 + $0xa0] sm:$0xff]  }
 0x143   : > { %v8133_v0 = vsel %vm6422_vm13, 4294967295, %v8132_v0  ;;  %v692_v6 = vmul.f32 %v5970_v22, %v6065_v17  ;;  %v1299_v21 = vrot.slane %v6365_v39, 1  ;;  %v6431_v26 = vpack.c.bf16 %v1334_v27, %v1335_v53  ;;  %v5507_v27 = vld [vmem:[#allocation5 + $0xa8] sm:$0xff]  }
 0x144   : > { %8134 = vst [vmem:[#allocation33_spill] sm:$0xff] %v8133_v0  ;;  %v8137_v19 = vsel %vm6436_vm11, 4294967295, %v8136_v19  ;;  %v967_v44 = vrot.slane %v6029_v60, 7  ;;  %v727_v1 = vadd.f32 %v5989_v34, %v688_v41  ;;  %v6446_v17 = vpack.c.bf16 %v1024_v37, %v1025_v48  ;;  %v5509_v41 = vld [vmem:[#allocation5 + $0x10] sm:$0xff]   ;;  %5263 = vmatprep.subr.bf16.mxu1 %v5507_v27 }
 0x145   : > { %8135 = vst [vmem:[#allocation34_spill] sm:$0xff] %v6431_v26  ;;  %v732_v32 = vadd.f32 %v5989_v34, %v693_v20  ;;  %v696_v11 = vmul.f32 %v5970_v22, %v648_v52  ;;  %5239 = vmatprep.mubr.msk.bf16.mxu0 %vm6422_vm13, %v6431_v26  ;;  %v6456_v25 = vpack.c.bf16 %v6140_v43, %v6029_v60  ;;  %v6459_v37 = vmax.f32 %v729_v62, 0.0  ;;  %v5510_v60 = vld [vmem:[#allocation5 + $0x48] sm:$0xff]  }
 0x146   : > { %v730_v49 = vadd.f32 %v5989_v34, %v691_v9  ;;  %v695_v20 = vmul.f32 %v5970_v22, %v6114_v28  ;;  %4390 = vmatmul.mubr.msk.bf16.gmra.mxu1 %vm6436_vm11, %v6446_v17  ;;  %v8138_v52 = vand.u32 15, %v6054_v8  ;;  %v733_v53 = vadd.f32 %v5989_v34, %v694_v56  ;;  %4892 = vmatpush3.bf16.msra.mxu0 %v5509_v41  ;;  %v5517_v26 = vld [vmem:[#allocation5 + $0x88] sm:$0xff]  }
 0x147   : > { %v731_v62 = vadd.f32 %v5989_v34, %v692_v6  ;;  %v8141_v9 = vrot.slane %v6204_v46, 1  ;;  %v1333_v7 = vsel %vm7957_vm1, %v1298_v5, %v1299_v21  ;;  %2022 = vmatprep.mubr.bf16.mxu1 %v6456_v25  ;;  %v8142_v8 = vand.u32 15, %v6057_v10  ;;  %5264 = vmatpush3.bf16.msra.mxu1 %v5507_v27 }
 0x148   : > { %vm6469_vm14 = vcmp.le.s32.totalorder %v8138_v52, 14  ;;  %v6488_v56 = vmax.f32 %v727_v1, 0.0  ;;  %v697_v6 = vmul.f32 %v6082_v42, %v5970_v22  ;;  %v8145_v50 = vrot.slane %v6109_v18, 1  ;;  %4893 = vmatprep.subr.bf16.mxu0 %v5510_v60  ;;  %5265 = vmatprep.subr.bf16.mxu1 %v5514_v47 }
 0x149   : > { %v1332_v28 = vsel %vm7957_vm1, %v1299_v21, %v8141_v9  ;;  %vm6484_vm15 = vcmp.le.s32.totalorder %v8142_v8, 14  ;;  %v8146_v9 = vrot.slane %v6262_v12, 1  ;;  %v8148_v10 = vrot.slane %v6204_v46, 1 }
 0x14a   : > { %v8149_v1 = vand.u32 15, %v6104_v55  ;;  %v6510_v22 = vmax.f32 %v732_v32, 0.0  ;;  %v735_v42 = vadd.f32 %v5989_v34, %v696_v11  ;;  %vm8152_vm4 = vmmov 1   ;;  %v5511_v11 = vld [vmem:[#allocation5 + $0x8] sm:$0xff]  }
 0x14b   : > { %v1330_v5 = vsel %vm7957_vm1, %v8146_v9, %v8145_v50  ;;  %v8147_v21 = vmov %v8146_v9  ;;  %vm6516_vm6 = vmpackc.low %vm6358_vm8, %vm8152_vm4  ;;  %v8153_v50 = vmov 0  ;;  %v8156_v9 = vrot.slane %v6140_v43, 7  ;;  %4894 = vmatpush3.bf16.msra.mxu0 %v5511_v11  ;;  %v6588_v11 = vld [vmem:[#allocation5 + $0x238] sm:$0xff]   ;;  %5266 = vmatpush3.bf16.msra.mxu1 %v5514_v47 }
 0x14c   : > { %v1331_v8 = vsel %vm7957_vm1, %v8148_v10, %v8147_v21  ;;  %vm6506_vm5 = vcmp.ge.s32.totalorder %v8149_v1, 1  ;;  %v8154_v50 = vsel %vm6516_vm6, 4294967295, %v8153_v50  ;;  %vm8157_vm1 = vcmp.lt.s32.totalorder %v5972_v23, 1  ;;  %vm6551_vm8 = vmpackc.low %vm8152_vm4, %vm6383_vm10 }
 0x14d   : > { %8155 = vst [vmem:[#allocation35_spill] sm:$0xff] %v8154_v50  ;;  %v1022_v55 = vsel %vm8157_vm1, %v967_v44, %v8156_v9  ;;  %v8158_v21 = vrot.slane %v6027_v59, 7  ;;  %vm8159_vm13 = vmmov %vm8157_vm1  ;;  %v6529_v2 = vmax.f32 %v730_v49, 0.0  ;;  %v734_v1 = vadd.f32 %v5989_v34, %v695_v20  ;;  %v5512_v59 = vld [vmem:[#allocation5 + $0x40] sm:$0xff]  }
 0x14e   : > { %v6532_v0 = vpack.c.bf16 %v1332_v28, %v1333_v7  ;;  %vm6537_vm1 = vmpackc.low %vm6371_vm9, %vm8152_vm4  ;;  %v8162_v9 = vmov 0  ;;  %v6542_v27 = vmax.f32 %v733_v53, 0.0  ;;  %v6544_v41 = vmax.f32 %v731_v62, 0.0  ;;  %v5515_v62 = vld [vmem:[#allocation5 + $0x98] sm:$0xff]   ;;  %4895 = vmatprep.subr.bf16.mxu0 %v5512_v59 }
 0x14f   : > { %v1023_v32 = vsel %vm8159_vm13, %v8158_v21, %v967_v44  ;;  %8160 = vst [vmem:[#allocation36_spill] sm:$0xff] %v6529_v2  ;;  %v8163_v9 = vsel %vm6537_vm1, 4294967295, %v8162_v9  ;;  %v986_v44 = vrot.slane %v6459_v37, 7  ;;  %v6546_v49 = vpack.c.bf16 %v1330_v5, %v1331_v8  ;;  %5267 = vmatprep.subr.bf16.mxu1 %v5515_v62 }
 0x150   : > { %8161 = vst [vmem:[#allocation37_spill] sm:$0xff] %v6532_v0  ;;  %8164 = vst [vmem:[#allocation38_spill] sm:$0xff] %v8163_v9  ;;  %v8167_v7 = vmov 0  ;;  %v1305_v20 = vrot.slane %v6488_v56, 1  ;;  %v736_v60 = vadd.f32 %v5989_v34, %v697_v6  ;;  %5240 = vmatmul.mubr.msk.bf16.gmra.mxu0 %vm6516_vm6, %v6532_v0  ;;  %v6561_v53 = vpack.c.bf16 %v1022_v55, %v1023_v32  ;;  %v5513_v6 = vld [vmem:[#allocation5] sm:$0xff]   ;;  %5268 = vmatpush3.bf16.msra.mxu1 %v5515_v62 }
 0x151   : > { %8165 = vst [vmem:[#allocation39_spill] sm:$0xff] %v6544_v41  ;;  %8166 = vst [vmem:[#allocation40_spill] sm:$0xff] %v6546_v49  ;;  %v8168_v7 = vsel %vm6551_vm8, 4294967295, %v8167_v7  ;;  %v989_v28 = vrot.slane %v6510_v22, 7  ;;  %v6565_v5 = vmax.f32 %v735_v42, 0.0  ;;  %5243 = vmatprep.mubr.msk.bf16.mxu0 %vm6537_vm1, %v6546_v49  ;;  %v6572_v34 = vpack.c.bf16 %v6175_v63, %v6138_v51  ;;  %v8170_v42 = vld [vmem:[#allocation14_spill] sm:$0xff]  ;;  %4896 = vmatpush3.bf16.msra.mxu0 %v5513_v6 }
 0x152   : > { %v987_v55 = vrot.slane %v6529_v2, 7  ;;  %v1308_v21 = vrot.slane %v6529_v2, 1  ;;  %v6577_v32 = vmax.f32 %v734_v1, 0.0  ;;  %4393 = vmatmul.mubr.msk.bf16.gmra.mxu1 %vm6551_vm8, %v6561_v53  ;;  %v8171_v58 = vand.u32 15, %v8170_v42  ;;  %5307 = vmatprep.subr.bf16.mxu0 %v6588_v11 }
 0x153   : > { %8169 = vst [vmem:[#allocation41_spill] sm:$0xff] %v6572_v34  ;;  %v990_v8 = vrot.slane %v6542_v27, 7  ;;  %v988_v1 = vrot.slane %v6544_v41, 7  ;;  %v8174_v49 = vrot.slane %v6387_v4, 1  ;;  %v8175_v9 = vrot.slane %v6220_v31, 1  ;;  %2030 = vmatprep.mubr.bf16.mxu1 %v6572_v34 }
 0x154   : > { %vm6584_vm9 = vcmp.le.s32.totalorder %v8171_v58, 14  ;;  %vm8176_vm10 = vcmp.lt.s32.totalorder %v5972_v23, 7  ;;  %v8177_v58 = vld [vmem:[#allocation15_spill] sm:$0xff]  ;;  %v1309_v10 = vrot.slane %v6544_v41, 1  ;;  %v6607_v50 = vmax.f32 %v736_v60, 0.0 }
 0x155   : > { %v1328_v42 = vsel %vm8176_vm10, %v8175_v9, %v8174_v49  ;;  %v8178_v0 = vand.u32 15, %v8177_v58  ;;  %v8181_v29 = vrot.slane %v6264_v13, 1  ;;  %vm8182_vm1 = vmmov %vm8176_vm10  ;;  %v8183_v9 = vmov %v8174_v49 }
 0x156   : > { %vm8184_vm10 = vmmov %vm8182_vm1  ;;  %v992_v58 = vrot.slane %v6565_v5, 7  ;;  %v8185_v47 = vrot.slane %v6220_v31, 1  ;;  %v8195_v2 = vrot.slane %v6140_v43, 7  ;;  %v991_v48 = vrot.slane %v6577_v32, 7 }
 0x157   : > { %vm6602_vm13 = vcmp.le.s32.totalorder %v8178_v0, 14  ;;  %v1326_v40 = vsel %vm8182_vm1, %v1305_v20, %v8181_v29  ;;  %v1327_v49 = vsel %vm8184_vm10, %v8183_v9, %v1305_v20  ;;  %v5516_v0 = vld [vmem:[#allocation5 + $0x90] sm:$0xff]   ;;  %vm8187_vm6 = vmmov %vm8182_vm1  ;;  %v8188_v29 = vmov 0 }
 0x158   : > { %v1329_v60 = vsel %vm8187_vm6, %v8186_v45, %v8185_v47  ;;  %vm6627_vm1 = vmpackc.low %vm6469_vm14, %vm8152_vm4  ;;  %v8191_v20 = vrot.slane %v6175_v63, 7  ;;  %v8192_v9 = vrot.slane %v6138_v51, 7  ;;  %vm8193_vm10 = vcmp.lt.s32.totalorder %v5972_v23, 1  ;;  %5269 = vmatprep.subr.bf16.mxu1 %v5516_v0 }
 0x159   : > { %v8189_v29 = vsel %vm6627_vm1, 4294967295, %v8188_v29  ;;  %vm8196_vm6 = vmmov %vm8193_vm10  ;;  %v6644_v47 = vpack.c.bf16 %v1328_v42, %v1329_v60  ;;  %v8198_v34 = vmov 0  ;;  %v6664_v6 = vpack.c.bf16 %v1326_v40, %v1327_v49  ;;  %5270 = vmatpush3.bf16.msra.mxu1 %v5516_v0 }
 0x15a   : > { %8190 = vst [vmem:[#allocation14_spill] sm:$0xff] %v8189_v29  ;;  %v1020_v3 = vsel %vm8193_vm10, %v8192_v9, %v8191_v20  ;;  %v8194_v41 = vmov %v8192_v9  ;;  %vm6649_vm14 = vmpackc.low %vm6484_vm15, %vm8152_vm4  ;;  %v8201_v20 = vrot.slane %v6264_v13, 7  ;;  %v8206_v52 = vmov 0  ;;  %5271 = vmatprep.subr.bf16.mxu1 %v5517_v26 }
 0x15b   : > { %v1021_v45 = vsel %vm8196_vm6, %v8195_v2, %v8194_v41  ;;  %8197 = vst [vmem:[#allocation15_spill] sm:$0xff] %v6644_v47  ;;  %v8199_v34 = vsel %vm6649_vm14, 4294967295, %v8198_v34  ;;  %vm8202_vm10 = vmmov %vm8196_vm6  ;;  %v8204_v2 = vrot.slane %v6488_v56, 7  ;;  %5244 = vmatmul.mubr.msk.bf16.gmra.mxu0 %vm6627_vm1, %v6644_v47  ;;  %v8233_v47 = vrot.slane %v6175_v63, 7  ;;  %v8239_v63 = vld [vmem:[#allocation22_spill] sm:$0xff] }
 0x15c   : > { %8200 = vst [vmem:[#allocation42_spill] sm:$0xff] %v8199_v34  ;;  %v1004_v51 = vsel %vm8202_vm10, %v8201_v20, %v986_v44  ;;  %v8203_v43 = vmov %v8201_v20  ;;  %8205 = vst [vmem:[#allocation43_spill] sm:$0xff] %v6664_v6  ;;  %v993_v20 = vrot.slane %v6607_v50, 7  ;;  %v6683_v40 = vpack.c.bf16 %v1020_v3, %v1021_v45  ;;  %5247 = vmatprep.mubr.msk.bf16.mxu0 %vm6649_vm14, %v6664_v6 }
 0x15d   : > { %v1005_v41 = vsel %vm8196_vm6, %v8204_v2, %v8203_v43  ;;  %vm6669_vm15 = vmpackc.low %vm8152_vm4, %vm6506_vm5  ;;  %v6700_v3 = vpack.c.bf16 %v6565_v5, %v6577_v32  ;;  %v8228_v34 = vmov 0  ;;  %v8236_v29 = vmov 0  ;;  %5272 = vmatpush3.bf16.msra.mxu1 %v5517_v26 }
 0x15e   : > { %v8207_v52 = vsel %vm6669_vm15, 4294967295, %v8206_v52  ;;  %v6673_v42 = vpack.c.bf16 %v1004_v51, %v1005_v41  ;;  %vm8208_vm10 = vmmov %vm8196_vm6  ;;  %v1310_v51 = vrot.slane %v6510_v22, 1  ;;  %4396 = vmatmul.mubr.msk.bf16.gmra.mxu1 %vm6669_vm15, %v6683_v40  ;;  %v1313_v59 = vrot.slane %v6565_v5, 1 }
 0x15f   : > { %v1002_v60 = vsel %vm8208_vm10, %v987_v55, %v988_v1  ;;  %vm8209_vm0 = vmmov %vm8196_vm6  ;;  %8211 = vst [vmem:[#allocation44_spill] sm:$0xff] %v6700_v3  ;;  %v974_v6 = vrot.slane %v6222_v24, 7  ;;  %v1314_v26 = vrot.slane %v6607_v50, 1 }
 0x160   : > { %v1003_v9 = vsel %vm8209_vm0, %v986_v44, %v987_v55  ;;  %vm8210_vm5 = vmmov %vm8209_vm0  ;;  %v6694_v44 = vpack.c.bf16 %v6209_v61, %v6177_v57  ;;  %v1001_v55 = vsel %vm8209_vm0, %v988_v1, %v989_v28  ;;  %v8215_v1 = vrot.slane %v6459_v37, 1 }
 0x161   : > { %v6685_v49 = vpack.c.bf16 %v1002_v60, %v1003_v9  ;;  %v1000_v62 = vsel %vm8210_vm5, %v989_v28, %v990_v8  ;;  %vm8212_vm6 = vmmov %vm8209_vm0  ;;  %v6714_v28 = vpack.c.bf16 %v6239_v36, %v6607_v50  ;;  %vm8216_vm5 = vcmp.lt.s32.totalorder %v5972_v23, 7  ;;  %v8217_v60 = vld [vmem:[#allocation17_spill] sm:$0xff] }
 0x162   : > { %v998_v45 = vsel %vm8212_vm6, %v991_v48, %v992_v58  ;;  %v6708_v43 = vpack.c.bf16 %v1000_v62, %v1001_v55  ;;  %vm8213_vm10 = vmmov %vm8209_vm0  ;;  %v1324_v41 = vsel %vm8216_vm5, %v8215_v1, %v1308_v21  ;;  %2038 = vmatprep.mubr.bf16.mxu1 %v6694_v44  ;;  %v8218_v9 = vand.u32 15, %v8217_v60 }
 0x163   : > { %v999_v2 = vsel %vm8213_vm10, %v990_v8, %v991_v48  ;;  %8214 = vst [vmem:[#allocation45_spill] sm:$0xff] %v6714_v28  ;;  %v8222_v8 = vrot.slane %v6239_v36, 7  ;;  %vm8223_vm10 = vmmov %vm8216_vm5  ;;  %v1323_v1 = vsel %vm8216_vm5, %v1308_v21, %v1309_v10  ;;  %v781_v60 = vadd.s32 80, %v5972_v23  ;;  %v8238_v28 = vld [vmem:[#allocation16_spill] sm:$0xff] }
 0x164   : > { %vm6723_vm0 = vcmp.ge.s32.totalorder %v8218_v9, 1  ;;  %v6727_v62 = vpack.c.bf16 %v998_v45, %v999_v2  ;;  %v1322_v55 = vsel %vm8223_vm10, %v1309_v10, %v1310_v51  ;;  %v5518_v9 = vld [vmem:[#allocation5 + $0x80] sm:$0xff]   ;;  %vm8224_vm14 = vmmov %vm8212_vm6  ;;  %v8225_v45 = vrot.slane %v6459_v37, 1 }
 0x165   : > { %v996_v48 = vsel %vm8212_vm6, %v993_v20, %v8222_v8  ;;  %v997_v0 = vsel %vm8224_vm14, %v992_v58, %v993_v20  ;;  %v8226_v2 = vrot.slane %v6264_v13, 1  ;;  %vm8227_vm1 = vmmov %vm8216_vm5  ;;  %v8230_v10 = vrot.slane %v6209_v61, 7  ;;  %5273 = vmatprep.subr.bf16.mxu1 %v5518_v9 }
 0x166   : > { %8221 = vst [vmem:[#allocation17_spill] sm:$0xff] %v6727_v62  ;;  %vm6749_vm6 = vmpackc.low %vm6584_vm9, %vm8152_vm4  ;;  %v8231_v21 = vrot.slane %v6177_v57, 7  ;;  %v1312_v57 = vrot.slane %v6577_v32, 1  ;;  %v832_v62 = vand.u32 15, %v8239_v63  ;;  %v813_v32 = vand.u32 15, %v781_v60  ;;  %5274 = vmatpush3.bf16.msra.mxu1 %v5518_v9 }
 0x167   : > { %v1325_v8 = vsel %vm8227_vm1, %v8226_v2, %v8225_v45  ;;  %v8229_v34 = vsel %vm6749_vm6, 4294967295, %v8228_v34  ;;  %vm8234_vm1 = vmmov %vm8224_vm14  ;;  %v6765_v2 = vpack.c.bf16 %v996_v48, %v997_v0  ;;  %v8242_v48 = vld [vmem:[#allocation23_spill] sm:$0xff]  ;;  %v802_v60 = vadd.s32 248, %v5972_v23 }
 0x168   : > { %v1018_v58 = vsel %vm8224_vm14, %v8231_v21, %v8230_v10  ;;  %v8232_v20 = vmov %v8231_v21  ;;  %v6767_v33 = vpack.c.bf16 %v1324_v41, %v1325_v8  ;;  %vm6772_vm9 = vmpackc.low %vm6602_vm13, %vm8152_vm4  ;;  %v830_v10 = vand.u32 15, %v8238_v28  ;;  %v5519_v41 = vld [vmem:[#allocation5 + $0x1f8] sm:$0xff]  }
 0x169   : > { %v1019_v45 = vsel %vm8234_vm1, %v8233_v47, %v8232_v20  ;;  %8235 = vst [vmem:[#allocation46_spill] sm:$0xff] %v6765_v2  ;;  %v8237_v29 = vsel %vm6772_vm9, 4294967295, %v8236_v29  ;;  %v6778_v21 = vpack.c.bf16 %v1322_v55, %v1323_v1  ;;  %vm6784_vm10 = vmpackc.low %vm8152_vm4, %vm6723_vm0  ;;  %v8240_v47 = vmov 0  ;;  %5017 = vmatprep.subr.bf16.mxu1 %v5519_v41 }
 0x16a   : > { %v8241_v47 = vsel %vm6784_vm10, 4294967295, %v8240_v47  ;;  %5248 = vmatmul.mubr.msk.bf16.gmra.mxu0 %vm6749_vm6, %v6767_v33  ;;  %v6792_v28 = vpack.c.bf16 %v1018_v58, %v1019_v45  ;;  %v973_v55 = vrot.slane %v8242_v48, 7  ;;  %v1311_v1 = vrot.slane %v6542_v27, 1  ;;  %vm8243_vm0 = vmmov %vm8216_vm5 }
 0x16b   : > { %5251 = vmatprep.mubr.msk.bf16.mxu0 %vm6772_vm9, %v6778_v21  ;;  %v6802_v5 = vpack.c.bf16 %v6222_v24, %v8242_v48  ;;  %vm958_vm13 = vcmp.le.s32.totalorder %v830_v10, 14  ;;  %vm960_vm5 = vcmp.le.s32.totalorder %v832_v62, 14  ;;  %vm8244_vm14 = vmmov %vm8243_vm0  ;;  %vm909_vm9 = vcmp.ge.s32.totalorder %v813_v32, 1 }
 0x16c   : > { %4399 = vmatmul.mubr.msk.bf16.gmra.mxu1 %vm6784_vm10, %v6792_v28  ;;  %v1320_v0 = vsel %vm8243_vm0, %v1311_v1, %v1312_v57  ;;  %v1318_v24 = vsel %vm8244_vm14, %v1313_v59, %v1314_v26  ;;  %vm8245_vm1 = vmmov %vm8243_vm0  ;;  %v783_v8 = vadd.s32 96, %v5972_v23  ;;  %v8250_v9 = vrot.slane %v6209_v61, 7 }
 0x16d   : > { %2046 = vmatprep.mubr.bf16.mxu1 %v6802_v5  ;;  %v1319_v50 = vsel %vm8245_vm1, %v1312_v57, %v1313_v59  ;;  %vm8246_vm6 = vmmov %vm8243_vm0  ;;  %vm8249_vm0 = vcmp.lt.s32.totalorder %v5972_v23, 1  ;;  %v8252_v57 = vmov 0  ;;  %v1315_v63 = vrot.slane %v6239_v36, 1 }
 0x16e   : > { %v1321_v58 = vsel %vm8246_vm6, %v1310_v51, %v1311_v1  ;;  %vm6820_vm3 = vmpackc.low %vm958_vm13, %vm8152_vm4  ;;  %v1016_v62 = vsel %vm8249_vm0, %v973_v55, %v974_v6  ;;  %v834_v51 = vand.u32 15, %v802_v60  ;;  %v6838_v59 = vpack.c.bf16 %v1318_v24, %v1319_v50 }
 0x16f   : > { %vm8251_vm14 = vmmov %vm8249_vm0  ;;  %v6830_v10 = vpack.c.bf16 %v1320_v0, %v1321_v58  ;;  %v8254_v32 = vmov 0  ;;  %v815_v41 = vand.u32 15, %v783_v8  ;;  %v975_v48 = vrot.slane %v6224_v35, 7 }
 0x170   : > { %v1017_v45 = vsel %vm8251_vm14, %v8250_v9, %v973_v55  ;;  %vm6833_vm1 = vmpackc.low %vm960_vm5, %vm8152_vm4  ;;  %v976_v55 = vrot.slane %v6348_v38, 7  ;;  %v6857_v36 = vpack.c.bf16 %v6348_v38, %v6224_v35  ;;  %vm8256_vm13 = vcmp.lt.s32.totalorder %v5972_v23, 7 }
 0x171   : > { %v8253_v57 = vsel %vm6833_vm1, 4294967295, %v8252_v57  ;;  %vm6841_vm6 = vmpackc.low %vm8152_vm4, %vm909_vm9  ;;  %v6848_v61 = vpack.c.bf16 %v1016_v62, %v1017_v45  ;;  %vm962_vm9 = vcmp.le.s32.totalorder %v834_v51, 14  ;;  %v1317_v1 = vsel %vm8256_vm13, %v1314_v26, %v1315_v63 }
 0x172   : > { %v8255_v32 = vsel %vm6841_vm6, 4294967295, %v8254_v32  ;;  %5252 = vmatmul.mubr.msk.bf16.gmra.mxu0 %vm6820_vm3, %v6830_v10  ;;  %v8257_v60 = vrot.slane %v6063_v15, 1  ;;  %vm8258_vm5 = vmmov %vm8256_vm13  ;;  %vm911_vm0 = vcmp.ge.s32.totalorder %v815_v41, 1  ;;  %v785_v24 = vadd.s32 112, %v5972_v23 }
 0x173   : > { %5255 = vmatprep.mubr.msk.bf16.mxu0 %vm6833_vm1, %v6838_v59  ;;  %vm6871_vm14 = vmpackc.low %vm962_vm9, %vm8152_vm4  ;;  %v8259_v35 = vmov 0  ;;  %vm8261_vm1 = vcmp.lt.s32.totalorder %v5972_v23, 1  ;;  %v8263_v50 = vmov 0  ;;  %v977_v62 = vrot.slane %v6322_v16, 7 }
 0x174   : > { %4402 = vmatmul.mubr.msk.bf16.gmra.mxu1 %vm6841_vm6, %v6848_v61  ;;  %v1348_v0 = vsel %vm8258_vm5, %v1315_v63, %v8257_v60  ;;  %v8260_v35 = vsel %vm6871_vm14, 4294967295, %v8259_v35  ;;  %v1014_v38 = vsel %vm8261_vm1, %v975_v48, %v976_v55  ;;  %vm8262_vm13 = vmmov %vm8261_vm1  ;;  %v817_v58 = vand.u32 15, %v785_v24 }
 0x175   : > { %2054 = vmatprep.mubr.bf16.mxu1 %v6857_v36  ;;  %v1015_v26 = vsel %vm8262_vm13, %v974_v6, %v975_v48  ;;  %v6879_v15 = vpack.c.bf16 %v1348_v0, %v1317_v1  ;;  %vm6882_vm5 = vmpackc.low %vm8152_vm4, %vm911_vm0  ;;  %v8017_v9 = vmov 0.0|0.0   ;;  %v6895_v6 = vpack.c.bf16 %v6365_v39, %v6322_v16  ;;  %v5526_v48 = vld [vmem:[#allocation5 + $0x230] sm:$0xff]  }
 0x176   : > { %v8264_v50 = vsel %vm6882_vm5, 4294967295, %v8263_v50  ;;  %v6889_v8 = vpack.c.bf16 %v1014_v38, %v1015_v26  ;;  %v978_v45 = vrot.slane %v6365_v39, 7  ;;  %vm913_vm1 = vcmp.ge.s32.totalorder %v817_v58, 1  ;;  %vm8265_vm9 = vmmov %vm8262_vm13 }
 0x177   : > { %v787_v51 = vadd.s32 128, %v5972_v23  ;;  %vm8266_vm0 = vmmov %vm8265_vm9  ;;  %v8267_v16 = vmov 0  ;;  %v6918_v60 = vpack.c.bf16 %v6262_v12, %v6204_v46  ;;  %v979_v0 = vrot.slane %v6204_v46, 7 }
 0x178   : > { %v1012_v63 = vsel %vm8265_vm9, %v977_v62, %v978_v45  ;;  %v1013_v41 = vsel %vm8266_vm0, %v976_v55, %v977_v62  ;;  %vm6908_vm13 = vmpackc.low %vm8152_vm4, %vm913_vm1  ;;  %v5527_v55 = vld [vmem:[#allocation5 + $0x228] sm:$0xff]   ;;  %v980_v24 = vrot.slane %v6262_v12, 7  ;;  %v8271_v58 = vmov 0 }
 0x179   : > { %v8268_v16 = vsel %vm6908_vm13, 4294967295, %v8267_v16  ;;  %v6913_v39 = vpack.c.bf16 %v1012_v63, %v1013_v41  ;;  %v819_v1 = vand.u32 15, %v787_v51  ;;  %vm8270_vm9 = vmmov %vm8266_vm0  ;;  %v6945_v62 = vpack.c.bf16 %v6220_v31, %v6109_v18 }
 0x17a   : > { %5256 = vmatmul.mubr.msk.bf16.gmra.mxu0 %vm6871_vm14, %v6879_v15  ;;  %8269 = vst [vmem:[#allocation16_spill] sm:$0xff] %v8268_v16  ;;  %v1011_v38 = vsel %vm8270_vm9, %v978_v45, %v979_v0  ;;  %v1010_v26 = vsel %vm8266_vm0, %v979_v0, %v980_v24  ;;  %v5531_v45 = vld [vmem:[#allocation5 + $0x218] sm:$0xff]   ;;  %v981_v51 = vrot.slane %v6109_v18, 7  ;;  %v791_v63 = vadd.s32 160, %v5972_v23  ;;  %vm8275_vm9 = vmmov %vm8266_vm0  ;;  %v8326_v16 = vld [vmem:[#allocation38_spill] sm:$0xff] }
 0x17b   : > { %2472 = vmatprep.mubr.bf16.mxu0 %v8017_v9  ;;  %vm915_vm1 = vcmp.ge.s32.totalorder %v819_v1, 1  ;;  %v6940_v46 = vpack.c.bf16 %v1010_v26, %v1011_v38  ;;  %8274 = vst [vmem:[#allocation23_spill] sm:$0xff] %v6945_v62  ;;  %v6971_v0 = vpack.c.bf16 %v6488_v56, %v6387_v4  ;;  %v793_v38 = vadd.s32 176, %v5972_v23 }
 0x17c   : > { %4405 = vmatmul.mubr.msk.bf16.gmra.mxu1 %vm6882_vm5, %v6889_v8  ;;  %vm6933_vm14 = vmpackc.low %vm8152_vm4, %vm915_vm1  ;;  %v1009_v41 = vsel %vm8275_vm9, %v980_v24, %v981_v51  ;;  %v5535_v24 = vld [vmem:[#allocation5 + $0x208] sm:$0xff]  }
 0x17d   : > { %2062 = vmatprep.mubr.bf16.mxu1 %v6895_v6  ;;  %v8272_v58 = vsel %vm6933_vm14, 4294967295, %v8271_v58  ;;  %8280 = vst [vmem:[#allocation49_spill] sm:$0xff] %v6971_v0  ;;  %vm8282_vm9 = vmmov %vm8266_vm0 }
 0x17e   : > { %8273 = vst [vmem:[#allocation22_spill] sm:$0xff] %v8272_v58  ;;  %v5533_v58 = vld [vmem:[#allocation5 + $0x198] sm:$0xff]  }
 0x182   : > { %2473 = vmatmul.mubr.bf16.vlgmr.msra.gmra.mxu0 %v8017_v9 }
 0x183   : > { %2480 = vmatprep.mubr.bf16.mxu0 %v6292_v14  ;;  %5308 = vmatpush3.bf16.msra.mxu0 %v6588_v11  ;;  %v789_v14 = vadd.s32 144, %v5972_v23  ;;  %v5530_v11 = vld [vmem:[#allocation5 + $0x220] sm:$0xff]  }
 0x184   : > { %4408 = vmatmul.mubr.msk.bf16.gmra.mxu1 %vm6908_vm13, %v6913_v39  ;;  %5309 = vmatprep.subr.bf16.mxu0 %v5526_v48 }
 0x185   : > { %2070 = vmatprep.mubr.bf16.mxu1 %v6918_v60  ;;  %v821_v12 = vand.u32 15, %v789_v14  ;;  %v983_v14 = vrot.slane %v6387_v4, 7 }
 0x187   : > { %5310 = vmatpush3.bf16.msra.mxu0 %v5526_v48  ;;  %vm917_vm1 = vcmp.ge.s32.totalorder %v821_v12, 1  ;;  %v5534_v48 = vld [vmem:[#allocation5 + $0x210] sm:$0xff]   ;;  %v5538_v12 = vld [vmem:[#allocation5 + $0x200] sm:$0xff]  }
 0x188   : > { %5311 = vmatprep.subr.bf16.mxu0 %v5527_v55 }
 0x18a   : > { %4507 = vmatmul.mubr.msk.bf16.gmra.mxu0 %vm6436_vm11, %v6324_v30  ;;  %v982_v30 = vrot.slane %v6220_v31, 7  ;;  %vm6959_vm11 = vmpackc.low %vm8152_vm4, %vm917_vm1  ;;  %v823_v31 = vand.u32 15, %v791_v63  ;;  %v8287_v63 = vld [vmem:[#allocation41_spill] sm:$0xff] }
 0x18b   : > { %2488 = vmatprep.mubr.bf16.mxu0 %v6342_v54  ;;  %5312 = vmatpush3.bf16.msra.mxu0 %v5527_v55  ;;  %v8276_v55 = vmov 0 }
 0x18c   : > { %4411 = vmatmul.mubr.msk.bf16.gmra.mxu1 %vm6933_vm14, %v6940_v46  ;;  %5313 = vmatprep.subr.bf16.mxu0 %v5530_v11  ;;  %v1008_v1 = vsel %vm8266_vm0, %v981_v51, %v982_v30  ;;  %v8277_v55 = vsel %vm6959_vm11, 4294967295, %v8276_v55  ;;  %vm919_vm1 = vcmp.ge.s32.totalorder %v823_v31, 1  ;;  %v8283_v51 = vmov 0 }
 0x18d   : > { %2078 = vmatprep.mubr.bf16.mxu1 %v6945_v62  ;;  %8278 = vst [vmem:[#allocation47_spill] sm:$0xff] %v8277_v55  ;;  %v6966_v18 = vpack.c.bf16 %v1008_v1, %v1009_v41  ;;  %v6998_v41 = vpack.c.bf16 %v6459_v37, %v6264_v13  ;;  %v8292_v37 = vld [vmem:[#allocation36_spill] sm:$0xff]  ;;  %v8293_v1 = vld [vmem:[#allocation39_spill] sm:$0xff] }
 0x18e   : > { %v7016_v31 = vpack.c.bf16 %v8293_v1, %v8292_v37  ;;  %v5520_v37 = vld [vmem:[#allocation5 + $0x1b8] sm:$0xff]   ;;  %v5522_v1 = vld [vmem:[#allocation5 + $0x1f0] sm:$0xff]  }
 0x18f   : > { %5314 = vmatpush3.bf16.msra.mxu0 %v5530_v11  ;;  %8279 = vst [vmem:[#allocation48_spill] sm:$0xff] %v6966_v18  ;;  %v8281_v11 = vrot.slane %v6488_v56, 7  ;;  %v825_v56 = vand.u32 15, %v793_v38  ;;  %8288 = vst [vmem:[#allocation41_spill] sm:$0xff] %v6998_v41  ;;  %v8314_v55 = vld [vmem:[#allocation28_spill] sm:$0xff] }
 0x190   : > { %5315 = vmatprep.subr.bf16.mxu0 %v5531_v45 }
 0x191   : > { %v1006_v26 = vsel %vm8282_vm9, %v983_v14, %v8281_v11  ;;  %v7034_v11 = vpack.c.bf16 %v6542_v27, %v6510_v22  ;;  %v801_v27 = vadd.s32 240, %v5972_v23 }
 0x192   : > { %4510 = vmatmul.mubr.msk.bf16.gmra.mxu0 %vm6551_vm8, %v6446_v17  ;;  %vm6986_vm8 = vmpackc.low %vm8152_vm4, %vm919_vm1  ;;  %vm921_vm1 = vcmp.ge.s32.totalorder %v825_v56, 1 }
 0x193   : > { %2496 = vmatprep.mubr.bf16.mxu0 %v6456_v25  ;;  %5316 = vmatpush3.bf16.msra.mxu0 %v5531_v45  ;;  %v1007_v45 = vsel %vm8266_vm0, %v982_v30, %v983_v14  ;;  %v8284_v51 = vsel %vm6986_vm8, 4294967295, %v8283_v51  ;;  %v795_v30 = vadd.s32 192, %v5972_v23  ;;  %vm7006_vm9 = vmpackc.low %vm8152_vm4, %vm921_vm1  ;;  %v8294_v14 = vmov 0 }
 0x194   : > { %4414 = vmatmul.mubr.msk.bf16.gmra.mxu1 %vm6959_vm11, %v6966_v18  ;;  %5317 = vmatprep.subr.bf16.mxu0 %v5534_v48  ;;  %8285 = vst [vmem:[#allocation50_spill] sm:$0xff] %v8284_v51  ;;  %v6993_v4 = vpack.c.bf16 %v1006_v26, %v1007_v45  ;;  %v799_v26 = vadd.s32 224, %v5972_v23  ;;  %v8300_v45 = vmov 0  ;;  %v833_v56 = vand.u32 15, %v801_v27  ;;  %v5523_v27 = vld [vmem:[#allocation5 + $0x1b0] sm:$0xff]   ;;  %v8316_v51 = vld [vmem:[#allocation30_spill] sm:$0xff] }
 0x195   : > { %2086 = vmatprep.mubr.bf16.mxu1 %v6971_v0  ;;  %v827_v13 = vand.u32 15, %v795_v30  ;;  %v8303_v30 = vld [vmem:[#allocation17_spill] sm:$0xff] }
 0x196   : > { %8286 = vst [vmem:[#allocation51_spill] sm:$0xff] %v6993_v4  ;;  %v831_v22 = vand.u32 15, %v799_v26  ;;  %v8309_v26 = vld [vmem:[#allocation18_spill] sm:$0xff] }
 0x197   : > { %5318 = vmatpush3.bf16.msra.mxu0 %v5534_v48  ;;  %v8289_v48 = vmov 0  ;;  %vm923_vm0 = vcmp.ge.s32.totalorder %v827_v13, 1  ;;  %v8304_v13 = vld [vmem:[#allocation45_spill] sm:$0xff] }
 0x198   : > { %5319 = vmatprep.subr.bf16.mxu0 %v5535_v24  ;;  %v8290_v48 = vsel %vm7006_vm9, 4294967295, %v8289_v48  ;;  %vm7024_vm1 = vmpackc.low %vm8152_vm4, %vm923_vm0 }
 0x199   : > { %8291 = vst [vmem:[#allocation52_spill] sm:$0xff] %v8290_v48  ;;  %v8295_v14 = vsel %vm7024_vm1, 4294967295, %v8294_v14  ;;  %v8322_v48 = vld [vmem:[#allocation34_spill] sm:$0xff] }
 0x19a   : > { %4513 = vmatmul.mubr.msk.bf16.gmra.mxu0 %vm6669_vm15, %v6561_v53  ;;  %8296 = vst [vmem:[#allocation36_spill] sm:$0xff] %v8295_v14  ;;  %v8332_v14 = vld [vmem:[#allocation42_spill] sm:$0xff] }
 0x19b   : > { %2504 = vmatprep.mubr.bf16.mxu0 %v8287_v63  ;;  %5320 = vmatpush3.bf16.msra.mxu0 %v5535_v24  ;;  %v797_v24 = vadd.s32 208, %v5972_v23 }
 0x19c   : > { %4417 = vmatmul.mubr.msk.bf16.gmra.mxu1 %vm6986_vm8, %v6993_v4  ;;  %5321 = vmatprep.subr.bf16.mxu0 %v5538_v12 }
 0x19d   : > { %2094 = vmatprep.mubr.bf16.mxu1 %v6998_v41  ;;  %v829_v38 = vand.u32 15, %v797_v24  ;;  %v8307_v24 = vld [vmem:[#allocation20_spill] sm:$0xff] }
 0x19f   : > { %5322 = vmatpush3.bf16.msra.mxu0 %v5538_v12  ;;  %vm925_vm0 = vcmp.ge.s32.totalorder %v829_v38, 1  ;;  %v8297_v12 = vmov 0 }
 0x1a2   : > { %4516 = vmatmul.mubr.msk.bf16.gmra.mxu0 %vm6784_vm10, %v6683_v40  ;;  %vm7042_vm10 = vmpackc.low %vm8152_vm4, %vm925_vm0 }
 0x1a3   : > { %2512 = vmatprep.mubr.bf16.mxu0 %v6694_v44  ;;  %v8298_v12 = vsel %vm7042_vm10, 4294967295, %v8297_v12 }
 0x1a4   : > { %4420 = vmatmul.mubr.msk.bf16.gmra.mxu1 %vm7006_vm9, %v6673_v42  ;;  %8299 = vst [vmem:[#allocation39_spill] sm:$0xff] %v8298_v12 }
 0x1a5   : > { %2102 = vmatprep.mubr.bf16.mxu1 %v7016_v31 }
 0x1aa   : > { %4519 = vmatmul.mubr.msk.bf16.gmra.mxu0 %vm6841_vm6, %v6792_v28  ;;  %vm927_vm6 = vcmp.ge.s32.totalorder %v831_v22, 1  ;;  %v8341_v22 = vld [vmem:[#allocation29_spill] sm:$0xff] }
 0x1ab   : > { %2520 = vmatprep.mubr.bf16.mxu0 %v6802_v5  ;;  %vm7056_vm0 = vmpackc.low %vm8152_vm4, %vm927_vm6 }
 0x1ac   : > { %4423 = vmatmul.mubr.msk.bf16.gmra.mxu1 %vm7024_vm1, %v6685_v49  ;;  %v8301_v45 = vsel %vm7056_vm0, 4294967295, %v8300_v45 }
 0x1ad   : > { %2110 = vmatprep.mubr.bf16.mxu1 %v7034_v11  ;;  %8302 = vst [vmem:[#allocation53_spill] sm:$0xff] %v8301_v45 }
 0x1b2   : > { %4522 = vmatmul.mubr.msk.bf16.gmra.mxu0 %vm6882_vm5, %v6848_v61  ;;  %vm929_vm5 = vcmp.ge.s32.totalorder %v833_v56, 1  ;;  %v5524_v56 = vld [vmem:[#allocation5 + $0x1e8] sm:$0xff]  }
 0x1b3   : > { %2528 = vmatprep.mubr.bf16.mxu0 %v6857_v36  ;;  %vm7069_vm15 = vmpackc.low %vm8152_vm4, %vm929_vm5  ;;  %vm8315_vm4 = vnez %v8314_v55 }
 0x1b4   : > { %4426 = vmatmul.mubr.msk.bf16.gmra.mxu1 %vm7042_vm10, %v6708_v43 }
 0x1b5   : > { %2118 = vmatprep.mubr.bf16.mxu1 %v6700_v3 }
 0x1ba   : > { %4525 = vmatmul.mubr.msk.bf16.gmra.mxu0 %vm6908_vm13, %v6889_v8 }
 0x1bb   : > { %2536 = vmatprep.mubr.bf16.mxu0 %v6895_v6 }
 0x1bc   : > { %4429 = vmatmul.mubr.msk.bf16.gmra.mxu1 %vm7056_vm0, %v8303_v30 }
 0x1bd   : > { %2126 = vmatprep.mubr.bf16.mxu1 %v8304_v13  ;;  %v8311_v13 = vld [vmem:[#allocation25_spill] sm:$0xff] }
 0x1c2   : > { %4528 = vmatmul.mubr.msk.bf16.gmra.mxu0 %vm6933_vm14, %v6913_v39  ;;  %vm8335_vm14 = vnez %v8229_v34 }
 0x1c3   : > { %2544 = vmatprep.mubr.bf16.mxu0 %v6918_v60 }
 0x1c4   : > { %4432 = vmatmul.mubr.msk.bf16.gmra.mxu1 %vm7069_vm15, %v6765_v2  ;;  %v5528_v2 = vld [vmem:[#allocation5 + $0x1e0] sm:$0xff]  }
 0x1c5   : > { %5275 = vmatprep.mubr.bf16.mxu1 %v8017_v9  ;;  %v5525_v9 = vld [vmem:[#allocation5 + $0x1a8] sm:$0xff]  }
 0x1ca   : > { %4531 = vmatmul.mubr.msk.bf16.gmra.mxu0 %vm6959_vm11, %v6940_v46  ;;  %vm8333_vm11 = vnez %v8332_v14 }
 0x1cb   : > { %2552 = vmatprep.mubr.bf16.mxu0 %v6945_v62  ;;  %v8320_v62 = vld [vmem:[#allocation33_spill] sm:$0xff] }
 0x1cc   : > { %5276 = vmatmul.mubr.msk.bf16.vlgmr.msra.gmra.mxu1 %vm6148_vm7, %v8307_v24  ;;  %vm8321_vm5 = vnez %v8320_v62 }
 0x1cd   : > { %5018 = vmatpush3.bf16.msra.mxu1 %v5520_v37  ;;  %5279 = vmatprep.mubr.msk.bf16.mxu1 %vm6233_vm12, %v8309_v26  ;;  %v8313_v37 = vld [vmem:[#allocation27_spill] sm:$0xff] }
 0x1ce   : > { %5019 = vmatprep.subr.bf16.mxu1 %v5522_v1  ;;  %v5529_v1 = vld [vmem:[#allocation5 + $0x1a0] sm:$0xff]  }
 0x1d1   : > { %5020 = vmatpush3.bf16.msra.mxu1 %v5523_v27  ;;  %v5532_v27 = vld [vmem:[#allocation5 + $0x1d8] sm:$0xff]  }
 0x1d2   : > { %4534 = vmatmul.mubr.msk.bf16.gmra.mxu0 %vm6986_vm8, %v6966_v18  ;;  %5021 = vmatprep.subr.bf16.mxu1 %v5524_v56  ;;  %v5536_v56 = vld [vmem:[#allocation5 + $0x1d0] sm:$0xff]   ;;  %v8319_v18 = vld [vmem:[#allocation31_spill] sm:$0xff]  ;;  %vm8327_vm8 = vnez %v8326_v16 }
 0x1d3   : > { %2560 = vmatprep.mubr.bf16.mxu0 %v6971_v0  ;;  %v8317_v0 = vld [vmem:[#allocation32_spill] sm:$0xff] }
 0x1d4   : > { %5280 = vmatmul.mubr.msk.bf16.gmra.mxu1 %vm6284_vm2, %v8311_v13  ;;  %vm8318_vm6 = vnez %v8317_v0 }
 0x1d5   : > { %5283 = vmatprep.mubr.msk.bf16.mxu1 %vm8315_vm4, %v8313_v37  ;;  %5022 = vmatpush3.bf16.msra.mxu1 %v5525_v9  ;;  %v5539_v9 = vld [vmem:[#allocation5 + $0x1c8] sm:$0xff]  }
 0x1d6   : > { %5023 = vmatprep.subr.bf16.mxu1 %v5528_v2  ;;  %v5537_v2 = vld [vmem:[#allocation5 + $0x190] sm:$0xff]  }
 0x1d9   : > { %5024 = vmatpush3.bf16.msra.mxu1 %v5529_v1  ;;  %v5540_v1 = vld [vmem:[#allocation5 + $0x188] sm:$0xff]  }
 0x1da   : > { %4537 = vmatmul.mubr.msk.bf16.gmra.mxu0 %vm7006_vm9, %v6993_v4  ;;  %5025 = vmatprep.subr.bf16.mxu1 %v5532_v27  ;;  %v5541_v27 = vld [vmem:[#allocation5 + $0x1c0] sm:$0xff]   ;;  %v8325_v4 = vld [vmem:[#allocation37_spill] sm:$0xff] }
 0x1db   : > { %2568 = vmatprep.mubr.bf16.mxu0 %v6998_v41  ;;  %v8323_v41 = vld [vmem:[#allocation35_spill] sm:$0xff] }
 0x1dc   : > { %5284 = vmatmul.mubr.msk.bf16.gmra.mxu1 %vm8318_vm6, %v8316_v51  ;;  %vm8324_vm9 = vnez %v8323_v41 }
 0x1dd   : > { %5287 = vmatprep.mubr.msk.bf16.mxu1 %vm8321_vm5, %v8319_v18  ;;  %5026 = vmatpush3.bf16.msra.mxu1 %v5533_v58  ;;  %v5542_v58 = vld [vmem:[#allocation5 + $0x180] sm:$0xff]  }
 0x1de   : > { %5027 = vmatprep.subr.bf16.mxu1 %v5536_v56  ;;  %v8328_v56 = vld [vmem:[#allocation40_spill] sm:$0xff] }
 0x1e1   : > { %5028 = vmatpush3.bf16.msra.mxu1 %v5537_v2  ;;  %v8329_v2 = vld [vmem:[#allocation14_spill] sm:$0xff] }
 0x1e2   : > { %4540 = vmatmul.mubr.msk.bf16.gmra.mxu0 %vm7024_vm1, %v6673_v42  ;;  %5029 = vmatprep.subr.bf16.mxu1 %v5539_v9  ;;  %vm8330_vm1 = vnez %v8329_v2  ;;  %v8331_v9 = vld [vmem:[#allocation15_spill] sm:$0xff] }
 0x1e3   : > { %2576 = vmatprep.mubr.bf16.mxu0 %v7016_v31 }
 0x1e4   : > { %5288 = vmatmul.mubr.msk.bf16.gmra.mxu1 %vm8324_vm9, %v8322_v48 }
 0x1e5   : > { %5291 = vmatprep.mubr.msk.bf16.mxu1 %vm8327_vm8, %v8325_v4  ;;  %5030 = vmatpush3.bf16.msra.mxu1 %v5540_v1  ;;  %v8334_v1 = vld [vmem:[#allocation43_spill] sm:$0xff] }
 0x1e6   : > { %5031 = vmatprep.subr.bf16.mxu1 %v5541_v27  ;;  %v8337_v27 = vld [vmem:[#allocation19_spill] sm:$0xff] }
 0x1e7   : > { %vm8338_vm13 = vnez %v8337_v27 }
 0x1e9   : > { %5032 = vmatpush3.bf16.msra.mxu1 %v5542_v58 }
 0x1ea   : > { %4543 = vmatmul.mubr.msk.bf16.gmra.mxu0 %vm7042_vm10, %v6685_v49  ;;  %vm8336_vm10 = vnez %v8237_v29  ;;  %v5229_v58 = vpop.f32.mrf.mxu0 }
 0x1eb   : > { %2584 = vmatprep.mubr.bf16.mxu0 %v7034_v11 }
 0x1ec   : > { %5292 = vmatmul.mubr.msk.bf16.gmra.mxu1 %vm8330_vm1, %v8328_v56  ;;  %v2169_v45 = vpop.f32.mrf.mxu0 }
 0x1ed   : > { %5295 = vmatprep.mubr.msk.bf16.mxu1 %vm8333_vm11, %v8331_v9 }
 0x1ee   : > { %v5230_v23 = vpop.f32.mrf.mxu0 }
 0x1f2   : > { %4546 = vmatmul.mubr.msk.bf16.gmra.mxu0 %vm7056_vm0, %v6708_v43  ;;  %vm8339_vm0 = vnez %v8253_v57 }
 0x1f3   : > { %2592 = vmatprep.mubr.bf16.mxu0 %v6700_v3 }
 0x1f4   : > { %5296 = vmatmul.mubr.msk.bf16.gmra.mxu1 %vm8335_vm14, %v8334_v1 }
 0x1f5   : > { %5299 = vmatprep.mubr.msk.bf16.mxu1 %vm8336_vm10, %v6767_v33 }
 0x1fa   : > { %4549 = vmatmul.mubr.msk.bf16.gmra.mxu0 %vm7069_vm15, %v8303_v30  ;;  %vm8340_vm15 = vnez %v8260_v35 }
 0x1fb   : > { %5323 = vmatprep.mubr.msk.bf16.mxu0 %vm8338_vm13, %v8309_v26  ;;  %v2172_v26 = vpop.f32.mrf.mxu0 }
 0x1fc   : > { %5300 = vmatmul.mubr.msk.bf16.gmra.mxu1 %vm6820_vm3, %v6778_v21 }
 0x1fd   : > { %5303 = vmatprep.mubr.msk.bf16.mxu1 %vm8339_vm0, %v6830_v10  ;;  %v5233_v27 = vpop.f32.mrf.mxu0  ;;  %v4761_v38 = vpop.f32.mrf.mxu1 }
 0x202   : > { %5324 = vmatmul.mubr.msk.bf16.vlgmr.msra.gmra.mxu0 %vm6148_vm7, %v8311_v13  ;;  %v2185_v13 = vpop.f32.mrf.mxu0  ;;  %vm8342_vm7 = vnez %v8341_v22 }
 0x203   : > { %5327 = vmatprep.mubr.msk.bf16.mxu0 %vm6233_vm12, %v8313_v37  ;;  %vm8343_vm12 = vnez %v8137_v19 }
 0x204   : > { %5304 = vmatmul.mubr.msk.bf16.gmra.mxu1 %vm8340_vm15, %v6838_v59  ;;  %v5234_v35 = vpop.f32.mrf.mxu0  ;;  %vm8375_vm15 = vcmask 130048  }
 0x205   : > { %3387 = vmatprep.mubr.bf16.mxu1 %v6342_v54  ;;  %v4762_v54 = vpop.f32.mrf.mxu1 }
 0x206   : > { %v4763_v37 = vadd.f32 %v4762_v54, %v4761_v38  ;;  %v2188_v12 = vpop.f32.mrf.mxu0 }
 0x207   : > { %v4764_v30 = vpop.f32.mrf.mxu1 }
 0x208   : > { %v7173_v3 = vadd.f32 %v4763_v37, %v2169_v45 }
 0x209   : > { %v4765_v55 = vpop.f32.mrf.mxu1 }
 0x20a   : > { %5328 = vmatmul.mubr.msk.bf16.gmra.mxu0 %vm6284_vm2, %v8316_v51  ;;  %v7175_v51 = vpop.f32.mrf.mxu0  ;;  %vm8344_vm2 = vnez %v8168_v7 }
 0x20b   : > { %5331 = vmatprep.mubr.msk.bf16.mxu0 %vm8315_vm4, %v8319_v18  ;;  %v4767_v18 = vpop.f32.mrf.mxu1 }
 0x20c   : > { %4621 = vmatmul.mubr.msk.bf16.vlgmr.msra.gmra.mxu1 %vm8342_vm7, %v6446_v17  ;;  %v4766_v17 = vadd.f32 %v4765_v55, %v4764_v30  ;;  %vm8376_vm7 = vmmov %vm8375_vm15 }
 0x20d   : > { %3395 = vmatprep.mubr.bf16.mxu1 %v6456_v25  ;;  %v2201_v25 = vpop.f32.mrf.mxu0  ;;  %v4768_v0 = vpop.f32.mrf.mxu1 }
 0x20e   : > { %v7186_v45 = vadd.f32 %v4766_v17, %v2172_v26 }
 0x20f   : > { %v7189_v24 = vpop.f32.mrf.mxu0  ;;  %v4770_v22 = vpop.f32.mrf.mxu1 }
 0x211   : > { %v2204_v38 = vpop.f32.mrf.mxu0  ;;  %v4771_v19 = vpop.f32.mrf.mxu1 }
 0x212   : > { %5332 = vmatmul.mubr.msk.bf16.gmra.mxu0 %vm8318_vm6, %v8322_v48  ;;  %v4769_v48 = vadd.f32 %v4768_v0, %v4767_v18 }
 0x213   : > { %5335 = vmatprep.mubr.msk.bf16.mxu0 %vm8321_vm5, %v8325_v4  ;;  %v7193_v62 = vpop.f32.mrf.mxu0 }
 0x214   : > { %4624 = vmatmul.mubr.msk.bf16.gmra.mxu1 %vm8343_vm12, %v6561_v53  ;;  %v7191_v54 = vadd.f32 %v5229_v58, %v4769_v48  ;;  %v4772_v53 = vadd.f32 %v4771_v19, %v4770_v22  ;;  %vm8377_vm12 = vmmov %vm8376_vm7 }
 0x215   : > { %3403 = vmatprep.mubr.bf16.mxu1 %v8287_v63  ;;  %v7201_v4 = vpop.f32.mrf.mxu0  ;;  %v4773_v63 = vpop.f32.mrf.mxu1 }
 0x216   : > { %v7206_v30 = vadd.f32 %v5230_v23, %v4772_v53 }
 0x217   : > { %v7209_v58 = vpop.f32.mrf.mxu0  ;;  %v4774_v41 = vpop.f32.mrf.mxu1 }
 0x219   : > { %v7211_v26 = vpop.f32.mrf.mxu0  ;;  %v4776_v16 = vpop.f32.mrf.mxu1 }
 0x21a   : > { %5336 = vmatmul.mubr.msk.bf16.gmra.mxu0 %vm8324_vm9, %v8328_v56  ;;  %v4775_v56 = vadd.f32 %v4774_v41, %v4773_v63 }
 0x21b   : > { %5339 = vmatprep.mubr.msk.bf16.mxu0 %vm8327_vm8, %v8331_v9  ;;  %v7215_v37 = vpop.f32.mrf.mxu0  ;;  %v4777_v7 = vpop.f32.mrf.mxu1  ;;  %vm8345_vm8 = vnez %v8207_v52 }
 0x21c   : > { %4627 = vmatmul.mubr.msk.bf16.gmra.mxu1 %vm8344_vm2, %v6683_v40  ;;  %v7213_v9 = vadd.f32 %v4775_v56, %v2185_v13  ;;  %v4778_v40 = vadd.f32 %v4777_v7, %v4776_v16  ;;  %v8348_v56 = vmov 0.0|0.0   ;;  %vm8378_vm2 = vmmov %vm8376_vm7 }
 0x21d   : > { %3411 = vmatprep.mubr.bf16.mxu1 %v6694_v44  ;;  %v7223_v44 = vpop.f32.mrf.mxu0 }
 0x21e   : > { %v4779_v23 = vpop.f32.mrf.mxu1  ;;  %v7228_v13 = vadd.f32 %v4778_v40, %v2188_v12 }
 0x21f   : > { %v7231_v55 = vpop.f32.mrf.mxu0 }
 0x220   : > { %v4780_v2 = vpop.f32.mrf.mxu1 }
 0x221   : > { %v7233_v17 = vpop.f32.mrf.mxu0 }
 0x222   : > { %5340 = vmatmul.mubr.msk.bf16.gmra.mxu0 %vm8330_vm1, %v8334_v1  ;;  %v4781_v1 = vadd.f32 %v4780_v2, %v4779_v23  ;;  %v4782_v14 = vpop.f32.mrf.mxu1 }
 0x223   : > { %5343 = vmatprep.mubr.msk.bf16.mxu0 %vm8333_vm11, %v6767_v33  ;;  %vm8346_vm11 = vnez %v8241_v47 }
 0x224   : > { %4630 = vmatmul.mubr.msk.bf16.gmra.mxu1 %vm8345_vm8, %v6792_v28  ;;  %v7235_v33 = vadd.f32 %v5233_v27, %v4781_v1  ;;  %v4783_v52 = vpop.f32.mrf.mxu1  ;;  %vm8379_vm8 = vmmov %vm8378_vm2 }
 0x225   : > { %3419 = vmatprep.mubr.bf16.mxu1 %v6802_v5  ;;  %v4784_v28 = vadd.f32 %v4783_v52, %v4782_v14 }
 0x227   : > { %v7250_v27 = vadd.f32 %v5234_v35, %v4784_v28 }
 0x22a   : > { %v7237_v18 = vpop.f32.mrf.mxu0  ;;  %5344 = vmatmul.mubr.msk.bf16.gmra.mxu0 %vm8335_vm14, %v6778_v21 }
 0x22b   : > { %5347 = vmatprep.mubr.msk.bf16.mxu0 %vm8336_vm10, %v6830_v10  ;;  %vm8347_vm10 = vnez %v8255_v32 }
 0x22c   : > { %v7245_v5 = vpop.f32.mrf.mxu0  ;;  %v4785_v12 = vpop.f32.mrf.mxu1  ;;  %4633 = vmatmul.mubr.msk.bf16.gmra.mxu1 %vm8346_vm11, %v6848_v61  ;;  %vm8380_vm11 = vmmov %vm8378_vm2 }
 0x22d   : > { %3427 = vmatprep.mubr.bf16.mxu1 %v6857_v36 }
 0x22e   : > { %v7253_v0 = vpop.f32.mrf.mxu0  ;;  %v4786_v34 = vpop.f32.mrf.mxu1 }
 0x22f   : > { %v4787_v21 = vadd.f32 %v4786_v34, %v4785_v12  ;;  %v8352_v12 = vld [vmem:[#allocation23_spill] sm:$0xff] }
 0x230   : > { %v7255_v48 = vpop.f32.mrf.mxu0  ;;  %v4788_v29 = vpop.f32.mrf.mxu1 }
 0x231   : > { %v7257_v10 = vadd.f32 %v4787_v21, %v2201_v25 }
 0x232   : > { %v7259_v22 = vpop.f32.mrf.mxu0  ;;  %5348 = vmatmul.mubr.msk.bf16.gmra.mxu0 %vm6820_vm3, %v6838_v59  ;;  %v4789_v47 = vpop.f32.mrf.mxu1  ;;  %vm8349_vm3 = vnez %v8264_v50 }
 0x233   : > { %5351 = vmatprep.mubr.msk.bf16.mxu0 %vm8339_vm0, %v6879_v15  ;;  %v4790_v61 = vadd.f32 %v4789_v47, %v4788_v29 }
 0x234   : > { %v7267_v36 = vpop.f32.mrf.mxu0  ;;  %v4791_v35 = vpop.f32.mrf.mxu1  ;;  %4636 = vmatmul.mubr.msk.bf16.gmra.mxu1 %vm8347_vm10, %v6889_v8  ;;  %vm8381_vm10 = vmmov %vm8378_vm2 }
 0x235   : > { %v7272_v25 = vadd.f32 %v4790_v61, %v2204_v38  ;;  %3435 = vmatprep.mubr.bf16.mxu1 %v6895_v6 }
 0x236   : > { %v7275_v19 = vpop.f32.mrf.mxu0  ;;  %v4792_v20 = vpop.f32.mrf.mxu1 }
 0x237   : > { %v4793_v59 = vadd.f32 %v4792_v20, %v4791_v35 }
 0x238   : > { %v7277_v53 = vpop.f32.mrf.mxu0  ;;  %v4794_v57 = vpop.f32.mrf.mxu1 }
 0x239   : > { %v7280_v15 = vadd.f32 %v7175_v51, %v4793_v59 }
 0x23a   : > { %v7282_v63 = vpop.f32.mrf.mxu0  ;;  %v4795_v41 = vpop.f32.mrf.mxu1  ;;  %5352 = vmatmul.mubr.bf16.gmra.mxu0 %v8348_v56 }
 0x23b   : > { %v4796_v32 = vadd.f32 %v4795_v41, %v4794_v57 }
 0x23c   : > { %v7285_v8 = vpop.f32.mrf.mxu0  ;;  %v4797_v38 = vpop.f32.mrf.mxu1  ;;  %4639 = vmatmul.mubr.msk.bf16.gmra.mxu1 %vm8349_vm3, %v6913_v39  ;;  %vm8382_vm3 = vmmov %vm8378_vm2 }
 0x23d   : > { %v7291_v6 = vadd.f32 %v7189_v24, %v4796_v32  ;;  %3443 = vmatprep.mubr.bf16.mxu1 %v6918_v60  ;;  %v8350_v24 = vld [vmem:[#allocation16_spill] sm:$0xff] }
 0x23e   : > { %v7294_v51 = vpop.f32.mrf.mxu0  ;;  %v4798_v16 = vpop.f32.mrf.mxu1  ;;  %vm8351_vm14 = vnez %v8350_v24 }
 0x23f   : > { %v4799_v7 = vadd.f32 %v4798_v16, %v4797_v38  ;;  %v8353_v38 = vld [vmem:[#allocation48_spill] sm:$0xff]  ;;  %v8354_v16 = vld [vmem:[#allocation22_spill] sm:$0xff] }
 0x240   : > { %v7296_v40 = vpop.f32.mrf.mxu0  ;;  %v4800_v23 = vpop.f32.mrf.mxu1  ;;  %vm8355_vm13 = vnez %v8354_v16  ;;  %v5545_v16 = vld [vmem:[%s7910_s3 + $0x28] sm:$0xff]  }
 0x241   : > { %v7299_v2 = vadd.f32 %v4799_v7, %v7201_v4 }
 0x242   : > { %v4897_v1 = vpop.f32.mrf.mxu0  ;;  %v4801_v14 = vpop.f32.mrf.mxu1 }
 0x243   : > { %v4802_v52 = vadd.f32 %v4801_v14, %v4800_v23  ;;  %v8356_v23 = vld [vmem:[#allocation49_spill] sm:$0xff] }
 0x244   : > { %v4898_v50 = vpop.f32.mrf.mxu0  ;;  %v4803_v39 = vpop.f32.mrf.mxu1  ;;  %4642 = vmatmul.mubr.msk.bf16.gmra.mxu1 %vm8351_vm14, %v6940_v46  ;;  %vm8383_vm14 = vmmov %vm8378_vm2 }
 0x245   : > { %v4899_v60 = vadd.f32 %v4898_v50, %v4897_v1  ;;  %v7305_v28 = vadd.f32 %v4802_v52, %v7211_v26  ;;  %3451 = vmatprep.mubr.bf16.mxu1 %v8352_v12 }
 0x246   : > { %v4900_v34 = vpop.f32.mrf.mxu0  ;;  %v4804_v21 = vpop.f32.mrf.mxu1 }
 0x247   : > { %v4805_v29 = vadd.f32 %v4804_v21, %v4803_v39  ;;  %v7309_v4 = vadd.f32 %v4899_v60, %v7173_v3  ;;  %v5543_v39 = vld [vmem:[%s7910_s3 + $0x38] sm:$0xff]  }
 0x248   : > { %v4901_v47 = vpop.f32.mrf.mxu0  ;;  %v4806_v61 = vpop.f32.mrf.mxu1  ;;  %5355 = vmatprep.subr.bf16.mxu0 %v5543_v39 }
 0x249   : > { %v4902_v35 = vadd.f32 %v4901_v47, %v4900_v34  ;;  %v7312_v20 = vadd.f32 %v7193_v62, %v4805_v29  ;;  %5356 = vmatpush3.bf16.msra.mxu0 %v5543_v39  ;;  %v8357_v47 = vld [vmem:[#allocation51_spill] sm:$0xff]  ;;  %v8361_v39 = vld [vmem:[#allocation50_spill] sm:$0xff] }
 0x24a   : > { %v4903_v59 = vpop.f32.mrf.mxu0  ;;  %v4807_v46 = vpop.f32.mrf.mxu1  ;;  %vm8362_vm1 = vnez %v8361_v39 }
 0x24b   : > { %v4808_v57 = vadd.f32 %v4807_v46, %v4806_v61  ;;  %v7315_v26 = vadd.f32 %v4902_v35, %v7186_v45  ;;  %v8358_v61 = vld [vmem:[#allocation47_spill] sm:$0xff] }
 0x24c   : > { %v4904_v41 = vpop.f32.mrf.mxu0  ;;  %v4809_v32 = vpop.f32.mrf.mxu1  ;;  %4645 = vmatmul.mubr.msk.bf16.gmra.mxu1 %vm8355_vm13, %v8353_v38  ;;  %vm8359_vm9 = vnez %v8358_v61  ;;  %vm8384_vm13 = vmmov %vm8378_vm2 }
 0x24d   : > { %v4905_v3 = vadd.f32 %v4904_v41, %v4903_v59  ;;  %v7321_v7 = vadd.f32 %v7209_v58, %v4808_v57  ;;  %3459 = vmatprep.mubr.bf16.mxu1 %v8356_v23  ;;  %v8360_v59 = vld [vmem:[#allocation41_spill] sm:$0xff] }
 0x24e   : > { %v4906_v62 = vpop.f32.mrf.mxu0  ;;  %v4810_v1 = vpop.f32.mrf.mxu1 }
 0x24f   : > { %v4811_v14 = vadd.f32 %v4810_v1, %v4809_v32  ;;  %v7325_v52 = vadd.f32 %v4905_v3, %v7191_v54 }
 0x250   : > { %v4907_v45 = vpop.f32.mrf.mxu0  ;;  %v4812_v50 = vpop.f32.mrf.mxu1 }
 0x251   : > { %v4908_v24 = vadd.f32 %v4907_v45, %v4906_v62  ;;  %v7331_v60 = vadd.f32 %v4811_v14, %v7223_v44  ;;  %v5544_v44 = vld [vmem:[%s7910_s3 + $0x30] sm:$0xff]  }
 0x252   : > { %v4909_v58 = vpop.f32.mrf.mxu0  ;;  %v4813_v12 = vpop.f32.mrf.mxu1  ;;  %5357 = vmatprep.subr.bf16.mxu0 %v5544_v44 }
 0x253   : > { %v7333_v34 = vadd.f32 %v4813_v12, %v4812_v50  ;;  %v7336_v21 = vadd.f32 %v4908_v24, %v7206_v30  ;;  %5358 = vmatpush3.bf16.msra.mxu0 %v5544_v44  ;;  %v5546_v24 = vld [vmem:[%s7910_s3 + $0x20] sm:$0xff]  }
 0x254   : > { %v4910_v54 = vpop.f32.mrf.mxu0  ;;  %v4815_v29 = vpop.f32.mrf.mxu1  ;;  %4648 = vmatmul.mubr.msk.bf16.gmra.mxu1 %vm8359_vm9, %v8357_v47  ;;  %5359 = vmatprep.subr.bf16.mxu0 %v5545_v16  ;;  %vm8385_vm9 = vmmov %vm8378_vm2 }
 0x255   : > { %v4911_v35 = vadd.f32 %v4910_v54, %v4909_v58  ;;  %3467 = vmatprep.mubr.bf16.mxu1 %v8360_v59 }
 0x256   : > { %v4912_v46 = vpop.f32.mrf.mxu0  ;;  %v4816_v57 = vpop.f32.mrf.mxu1 }
 0x257   : > { %v4817_v41 = vadd.f32 %v4816_v57, %v4815_v29  ;;  %v7346_v30 = vadd.f32 %v4911_v35, %v7213_v9  ;;  %5360 = vmatpush3.bf16.msra.mxu0 %v5545_v16 }
 0x258   : > { %v4913_v32 = vpop.f32.mrf.mxu0  ;;  %v4818_v38 = vpop.f32.mrf.mxu1  ;;  %5361 = vmatprep.subr.bf16.mxu0 %v5546_v24 }
 0x259   : > { %v4914_v3 = vadd.f32 %v4913_v32, %v4912_v46  ;;  %v7352_v23 = vadd.f32 %v7215_v37, %v4817_v41  ;;  %v8363_v41 = vld [vmem:[#allocation52_spill] sm:$0xff] }
 0x25a   : > { %v4915_v62 = vpop.f32.mrf.mxu0  ;;  %v4819_v1 = vpop.f32.mrf.mxu1  ;;  %vm8364_vm0 = vnez %v8363_v41 }
 0x25b   : > { %v4820_v14 = vadd.f32 %v4819_v1, %v4818_v38  ;;  %v7355_v45 = vadd.f32 %v4914_v3, %v7228_v13  ;;  %5362 = vmatpush3.bf16.msra.mxu0 %v5546_v24 }
 0x25c   : > { %v4916_v9 = vpop.f32.mrf.mxu0  ;;  %v4821_v50 = vpop.f32.mrf.mxu1  ;;  %4651 = vmatmul.mubr.msk.bf16.gmra.mxu1 %vm8362_vm1, %v6673_v42  ;;  %vm8386_vm1 = vmmov %vm8378_vm2 }
 0x25d   : > { %v4917_v37 = vadd.f32 %v4916_v9, %v4915_v62  ;;  %v7364_v58 = vadd.f32 %v7231_v55, %v4820_v14  ;;  %3475 = vmatprep.mubr.bf16.mxu1 %v7016_v31  ;;  %v5547_v55 = vld [vmem:[%s7910_s3 + $0x18] sm:$0xff]  }
 0x25e   : > { %v4918_v12 = vpop.f32.mrf.mxu0  ;;  %v4822_v13 = vpop.f32.mrf.mxu1  ;;  %5363 = vmatprep.subr.bf16.mxu0 %v5547_v55 }
 0x25f   : > { %v4823_v54 = vadd.f32 %v4822_v13, %v4821_v50  ;;  %v7368_v29 = vadd.f32 %v4917_v37, %v7235_v33  ;;  %5364 = vmatpush3.bf16.msra.mxu0 %v5547_v55 }
 0x260   : > { %v4919_v47 = vpop.f32.mrf.mxu0  ;;  %v4824_v42 = vpop.f32.mrf.mxu1 }
 0x261   : > { %v4920_v61 = vadd.f32 %v4919_v47, %v4918_v12  ;;  %v7371_v44 = vadd.f32 %v4823_v54, %v7245_v5  ;;  %v8365_v12 = vld [vmem:[#allocation36_spill] sm:$0xff] }
 0x262   : > { %v4921_v35 = vpop.f32.mrf.mxu0  ;;  %v4825_v31 = vpop.f32.mrf.mxu1  ;;  %vm8366_vm4 = vnez %v8365_v12  ;;  %v8367_v47 = vld [vmem:[#allocation44_spill] sm:$0xff] }
 0x263   : > { %v7376_v59 = vadd.f32 %v4825_v31, %v4824_v42  ;;  %v7379_v46 = vadd.f32 %v4920_v61, %v7250_v27  ;;  %v5548_v27 = vld [vmem:[%s7910_s3 + $0x10] sm:$0xff]  }
 0x264   : > { %v4922_v33 = vpop.f32.mrf.mxu0  ;;  %v4827_v57 = vpop.f32.mrf.mxu1  ;;  %4654 = vmatmul.mubr.msk.bf16.gmra.mxu1 %vm8364_vm0, %v6685_v49  ;;  %v5549_v49 = vld [vmem:[%s7910_s3 + $0x8] sm:$0xff]   ;;  %5365 = vmatprep.subr.bf16.mxu0 %v5548_v27  ;;  %vm8387_vm0 = vmmov %vm8386_vm1 }
 0x265   : > { %v4923_v5 = vadd.f32 %v4922_v33, %v4921_v35  ;;  %3483 = vmatprep.mubr.bf16.mxu1 %v7034_v11  ;;  %5366 = vmatpush3.bf16.msra.mxu0 %v5548_v27 }
 0x266   : > { %v4924_v32 = vpop.f32.mrf.mxu0  ;;  %v4828_v38 = vpop.f32.mrf.mxu1  ;;  %5367 = vmatprep.subr.bf16.mxu0 %v5549_v49 }
 0x267   : > { %v4829_v16 = vadd.f32 %v4828_v38, %v4827_v57  ;;  %v7386_v3 = vadd.f32 %v4923_v5, %v7257_v10 }
 0x268   : > { %v4925_v62 = vpop.f32.mrf.mxu0  ;;  %v4830_v1 = vpop.f32.mrf.mxu1 }
 0x269   : > { %v4926_v14 = vadd.f32 %v4925_v62, %v4924_v32  ;;  %v7395_v9 = vadd.f32 %v7237_v18, %v4829_v16  ;;  %v5550_v18 = vld [vmem:[%s7910_s3] sm:$0xff]   ;;  %5368 = vmatpush3.bf16.msra.mxu0 %v5549_v49  ;;  %v8368_v16 = vld [vmem:[#allocation17_spill] sm:$0xff] }
 0x26a   : > { %v4927_v11 = vpop.f32.mrf.mxu0  ;;  %v4831_v50 = vpop.f32.mrf.mxu1  ;;  %5369 = vmatprep.subr.bf16.mxu0 %v5550_v18  ;;  %v8371_v62 = vld [vmem:[#allocation45_spill] sm:$0xff] }
 0x26b   : > { %v4832_v10 = vadd.f32 %v4831_v50, %v4830_v1  ;;  %v7398_v39 = vadd.f32 %v4926_v14, %v7272_v25 }
 0x26c   : > { %v4928_v24 = vpop.f32.mrf.mxu0  ;;  %v4833_v37 = vpop.f32.mrf.mxu1  ;;  %4657 = vmatmul.mubr.msk.bf16.gmra.mxu1 %vm8366_vm4, %v6708_v43  ;;  %vm8388_vm4 = vmmov %vm8387_vm0 }
 0x26d   : > { %v4929_v13 = vadd.f32 %v4928_v24, %v4927_v11  ;;  %v7407_v54 = vadd.f32 %v7253_v0, %v4832_v10  ;;  %3491 = vmatprep.mubr.bf16.mxu1 %v8367_v47  ;;  %5370 = vmatpush3.bf16.msra.mxu0 %v5550_v18  ;;  %v8372_v47 = vld [vmem:[#allocation46_spill] sm:$0xff] }
 0x26e   : > { %v4930_v42 = vpop.f32.mrf.mxu0  ;;  %v4834_v25 = vpop.f32.mrf.mxu1 }
 0x26f   : > { %v4835_v61 = vadd.f32 %v4834_v25, %v4833_v37  ;;  %v7411_v55 = vadd.f32 %v4929_v13, %v7280_v15  ;;  %v8369_v15 = vld [vmem:[#allocation39_spill] sm:$0xff] }
 0x270   : > { %v4931_v35 = vpop.f32.mrf.mxu0  ;;  %v4836_v43 = vpop.f32.mrf.mxu1  ;;  %vm8370_vm6 = vnez %v8369_v15 }
 0x271   : > { %v4932_v31 = vadd.f32 %v4931_v35, %v4930_v42  ;;  %v7414_v33 = vadd.f32 %v4835_v61, %v7267_v36  ;;  %v8373_v42 = vld [vmem:[#allocation53_spill] sm:$0xff] }
 0x272   : > { %v4933_v57 = vpop.f32.mrf.mxu0  ;;  %v4837_v41 = vpop.f32.mrf.mxu1  ;;  %vm8374_vm5 = vnez %v8373_v42 }
 0x273   : > { %v7416_v0 = vadd.f32 %v4837_v41, %v4836_v43  ;;  %v7419_v5 = vadd.f32 %v4932_v31, %v7291_v6 }
 0x274   : > { %v4934_v32 = vpop.f32.mrf.mxu0  ;;  %v4839_v38 = vpop.f32.mrf.mxu1  ;;  %4660 = vmatmul.mubr.msk.bf16.gmra.mxu1 %vm8370_vm6, %v8368_v16  ;;  %vm8389_vm6 = vmmov %vm8387_vm0 }
 0x275   : > { %v4935_v27 = vadd.f32 %v4934_v32, %v4933_v57  ;;  %3499 = vmatprep.mubr.bf16.mxu1 %v8371_v62 }
 0x276   : > { %v4936_v1 = vpop.f32.mrf.mxu0  ;;  %v4840_v36 = vpop.f32.mrf.mxu1 }
 0x277   : > { %v7425_v49 = vadd.f32 %v4840_v36, %v4839_v38  ;;  %v7428_v14 = vadd.f32 %v4935_v27, %v7299_v2 }
 0x278   : > { %v4937_v11 = vpop.f32.mrf.mxu0  ;;  %v4842_v50 = vpop.f32.mrf.mxu1 }
 0x279   : > { %v4938_v6 = vadd.f32 %v4937_v11, %v4936_v1 }
 0x27a   : > { %v4939_v10 = vpop.f32.mrf.mxu0  ;;  %v4843_v24 = vpop.f32.mrf.mxu1 }
 0x27b   : > { %v7430_v37 = vadd.f32 %v4843_v24, %v4842_v50  ;;  %v7433_v12 = vadd.f32 %v4938_v6, %v7305_v28 }
 0x27c   : > { %v4940_v18 = vpop.f32.mrf.mxu0  ;;  %v4845_v13 = vpop.f32.mrf.mxu1  ;;  %4663 = vmatmul.mubr.msk.bf16.gmra.mxu1 %vm8374_vm5, %v8372_v47  ;;  %vm8390_vm5 = vmmov %vm8387_vm0 }
 0x27d   : > { %v4941_v25 = vadd.f32 %v4940_v18, %v4939_v10  ;;  %3507 = vmatprep.mubr.bf16.mxu1 %v8348_v56  ;;  %v2237_v10 = vadd.f32 %v7333_v34, %v7233_v17 }
 0x27e   : > { %v4942_v2 = vpop.f32.mrf.mxu0  ;;  %v4846_v61 = vpop.f32.mrf.mxu1 }
 0x27f   : > { %v7439_v35 = vadd.f32 %v4846_v61, %v4845_v13  ;;  %v7442_v43 = vadd.f32 %v4941_v25, %v7312_v20 }
 0x280   : > { %v4943_v31 = vpop.f32.mrf.mxu0  ;;  %v4848_v57 = vpop.f32.mrf.mxu1 }
 0x281   : > { %v4944_v28 = vadd.f32 %v4943_v31, %v4942_v2 }
 0x282   : > { %v4945_v41 = vpop.f32.mrf.mxu0  ;;  %v4849_v32 = vpop.f32.mrf.mxu1 }
 0x283   : > { %v7444_v38 = vadd.f32 %v4849_v32, %v4848_v57  ;;  %v7447_v16 = vadd.f32 %v4944_v28, %v7321_v7 }
 0x284   : > { %v4946_v15 = vpop.f32.mrf.mxu0  ;;  %v4851_v27 = vpop.f32.mrf.mxu1  ;;  %3508 = vmatmul.mubr.bf16.gmra.mxu1 %v8348_v56 }
 0x285   : > { %v4947_v62 = vadd.f32 %v4946_v15, %v4945_v41 }
 0x286   : > { %v4948_v1 = vpop.f32.mrf.mxu0  ;;  %v4852_v36 = vpop.f32.mrf.mxu1 }
 0x287   : > { %v7450_v11 = vadd.f32 %v4852_v36, %v4851_v27  ;;  %v7453_v20 = vadd.f32 %v4947_v62, %v7331_v60 }
 0x288   : > { %v4949_v50 = vpop.f32.mrf.mxu0  ;;  %v4854_v6 = vpop.f32.mrf.mxu1 }
 0x289   : > { %v4950_v24 = vadd.f32 %v4949_v50, %v4948_v1 }
 0x28a   : > { %v4951_v7 = vpop.f32.mrf.mxu0  ;;  %v4855_v18 = vpop.f32.mrf.mxu1 }
 0x28b   : > { %v7457_v13 = vadd.f32 %v4855_v18, %v4854_v6  ;;  %v7459_v47 = vadd.f32 %v4950_v24, %v2237_v10 }
 0x28c   : > { %v4952_v56 = vpop.f32.mrf.mxu0  ;;  %v5277_v42 = vpop.f32.mrf.mxu1 }
 0x28d   : > { %v4953_v25 = vadd.f32 %v4952_v56, %v4951_v7  ;;  %v7462_v2 = vadd.f32 %v5277_v42, %v7325_v52 }
 0x28e   : > { %v4954_v60 = vpop.f32.mrf.mxu0  ;;  %v2635_v61 = vpop.f32.mrf.mxu1 }
 0x28f   : > { %v7465_v31 = vadd.f32 %v2635_v61, %v7309_v4  ;;  %v7468_v17 = vadd.f32 %v4953_v25, %v7352_v23 }
 0x290   : > { %v4955_v34 = vpop.f32.mrf.mxu0  ;;  %v5278_v57 = vpop.f32.mrf.mxu1 }
 0x291   : > { %v4956_v28 = vadd.f32 %v4955_v34, %v4954_v60  ;;  %v7471_v41 = vadd.f32 %v5278_v57, %v7336_v21 }
 0x292   : > { %v4957_v32 = vpop.f32.mrf.mxu0  ;;  %v2638_v15 = vpop.f32.mrf.mxu1 }
 0x293   : > { %v7474_v27 = vadd.f32 %v2638_v15, %v7315_v26  ;;  %v7477_v52 = vadd.f32 %v4956_v28, %v7364_v58  ;;  %v2253_v58 = vadd.f32 %v7376_v59, %v7255_v48 }
 0x294   : > { %v4958_v62 = vpop.f32.mrf.mxu0  ;;  %v5281_v4 = vpop.f32.mrf.mxu1 }
 0x295   : > { %v4959_v1 = vadd.f32 %v4958_v62, %v4957_v32  ;;  %v7480_v23 = vadd.f32 %v5281_v4, %v7368_v29 }
 0x296   : > { %v4960_v36 = vpop.f32.mrf.mxu0  ;;  %v2651_v50 = vpop.f32.mrf.mxu1 }
 0x297   : > { %v7483_v6 = vadd.f32 %v2651_v50, %v7346_v30  ;;  %v7486_v21 = vadd.f32 %v4959_v1, %v7371_v44 }
 0x298   : > { %v4961_v10 = vpop.f32.mrf.mxu0  ;;  %v5282_v26 = vpop.f32.mrf.mxu1 }
 0x299   : > { %v4962_v24 = vadd.f32 %v4961_v10, %v4960_v36  ;;  %v7491_v7 = vadd.f32 %v5282_v26, %v7379_v46 }
 0x29a   : > { %v4963_v18 = vpop.f32.mrf.mxu0  ;;  %v2654_v29 = vpop.f32.mrf.mxu1 }
 0x29b   : > { %v7494_v56 = vadd.f32 %v2654_v29, %v7355_v45  ;;  %v7496_v42 = vadd.f32 %v4962_v24, %v2253_v58 }
 0x29c   : > { %v4964_v30 = vpop.f32.mrf.mxu0  ;;  %v5285_v25 = vpop.f32.mrf.mxu1 }
 0x29d   : > { %v4965_v44 = vadd.f32 %v4964_v30, %v4963_v18  ;;  %v7499_v60 = vadd.f32 %v5285_v25, %v7411_v55 }
 0x29e   : > { %v4966_v61 = vpop.f32.mrf.mxu0  ;;  %v2667_v34 = vpop.f32.mrf.mxu1 }
 0x29f   : > { %v7502_v48 = vadd.f32 %v2667_v34, %v7386_v3  ;;  %v2563_v59 = vadd.f32 %v4965_v44, %v7395_v9 }
 0x2a0   : > { %v4967_v46 = vpop.f32.mrf.mxu0  ;;  %v5286_v57 = vpop.f32.mrf.mxu1 }
 0x2a1   : > { %v4968_v28 = vadd.f32 %v4967_v46, %v4966_v61  ;;  %v7506_v45 = vadd.f32 %v5286_v57, %v7419_v5 }
 0x2a2   : > { %v4969_v32 = vpop.f32.mrf.mxu0  ;;  %v2670_v15 = vpop.f32.mrf.mxu1 }
 0x2a3   : > { %v7509_v62 = vadd.f32 %v2670_v15, %v7398_v39  ;;  %v2566_v55 = vadd.f32 %v4968_v28, %v7407_v54  ;;  %v2269_v39 = vadd.f32 %v7416_v0, %v7277_v53 }
 0x2a4   : > { %v4970_v4 = vpop.f32.mrf.mxu0  ;;  %v5289_v1 = vpop.f32.mrf.mxu1 }
 0x2a5   : > { %v4971_v36 = vadd.f32 %v4970_v4, %v4969_v32  ;;  %v7513_v3 = vadd.f32 %v5289_v1, %v7442_v43 }
 0x2a6   : > { %v4972_v9 = vpop.f32.mrf.mxu0  ;;  %v2683_v50 = vpop.f32.mrf.mxu1 }
 0x2a7   : > { %v7516_v10 = vadd.f32 %v2683_v50, %v7428_v14  ;;  %v2571_v5 = vadd.f32 %v4971_v36, %v7414_v33  ;;  %v2274_v33 = vadd.f32 %v7259_v22, %v7425_v49 }
 0x2a8   : > { %v4973_v26 = vpop.f32.mrf.mxu0  ;;  %v5290_v58 = vpop.f32.mrf.mxu1 }
 0x2a9   : > { %v4974_v24 = vadd.f32 %v4973_v26, %v4972_v9  ;;  %v7522_v54 = vadd.f32 %v5290_v58, %v7447_v16 }
 0x2aa   : > { %v4975_v18 = vpop.f32.mrf.mxu0  ;;  %v2686_v29 = vpop.f32.mrf.mxu1 }
 0x2ab   : > { %v7525_v43 = vadd.f32 %v2686_v29, %v7433_v12  ;;  %v2574_v30 = vadd.f32 %v4974_v24, %v2269_v39  ;;  %v2277_v12 = vadd.f32 %v7275_v19, %v7430_v37 }
 0x2ac   : > { %v4976_v25 = vpop.f32.mrf.mxu0  ;;  %v5293_v14 = vpop.f32.mrf.mxu1 }
 0x2ad   : > { %v4977_v44 = vadd.f32 %v4976_v25, %v4975_v18  ;;  %v7530_v61 = vadd.f32 %v5293_v14, %v7468_v17 }
 0x2ae   : > { %v4978_v53 = vpop.f32.mrf.mxu0  ;;  %v2699_v0 = vpop.f32.mrf.mxu1 }
 0x2af   : > { %v7533_v16 = vadd.f32 %v2699_v0, %v7453_v20  ;;  %v2579_v34 = vadd.f32 %v4977_v44, %v2274_v33  ;;  %v2282_v20 = vadd.f32 %v7439_v35, %v7285_v8 }
 0x2b0   : > { %v4979_v46 = vpop.f32.mrf.mxu0  ;;  %v5294_v57 = vpop.f32.mrf.mxu1 }
 0x2b1   : > { %v4980_v28 = vadd.f32 %v4979_v46, %v4978_v53  ;;  %v7538_v32 = vadd.f32 %v5294_v57, %v7477_v52 }
 0x2b2   : > { %v4981_v22 = vpop.f32.mrf.mxu0  ;;  %v2702_v49 = vpop.f32.mrf.mxu1 }
 0x2b3   : > { %v7541_v17 = vadd.f32 %v2702_v49, %v7459_v47  ;;  %v2582_v15 = vadd.f32 %v4980_v28, %v2277_v12  ;;  %v2285_v47 = vadd.f32 %v7444_v38, %v7296_v40 }
 0x2b4   : > { %v4982_v4 = vpop.f32.mrf.mxu0  ;;  %v5297_v1 = vpop.f32.mrf.mxu1 }
 0x2b5   : > { %v4983_v36 = vadd.f32 %v4982_v4, %v4981_v22  ;;  %v7545_v9 = vadd.f32 %v5297_v1, %v2563_v59 }
 0x2b6   : > { %v4984_v50 = vpop.f32.mrf.mxu0  ;;  %v2715_v19 = vpop.f32.mrf.mxu1 }
 0x2b7   : > { %v7548_v37 = vadd.f32 %v2715_v19, %v7486_v21  ;;  %v2587_v52 = vadd.f32 %v4983_v36, %v2282_v20  ;;  %v2290_v21 = vadd.f32 %v7282_v63, %v7450_v11 }
 0x2b8   : > { %v4985_v26 = vpop.f32.mrf.mxu0  ;;  %v5298_v58 = vpop.f32.mrf.mxu1 }
 0x2b9   : > { %v4986_v39 = vadd.f32 %v4985_v26, %v4984_v50  ;;  %v7552_v24 = vadd.f32 %v5298_v58, %v2566_v55  ;;  %v7580_v58 = vld [vmem:[%s7913_s6] ss:$0 sm:$0xff] }
 0x2ba   : > { %v4987_v18 = vpop.f32.mrf.mxu0  ;;  %v2718_v29 = vpop.f32.mrf.mxu1 }
 0x2bb   : > { %v7555_v8 = vadd.f32 %v2718_v29, %v7496_v42  ;;  %v2590_v35 = vadd.f32 %v4986_v39, %v2285_v47  ;;  %v2293_v42 = vadd.f32 %v7294_v51, %v7457_v13 }
 0x2bc   : > { %v4988_v59 = vpop.f32.mrf.mxu0  ;;  %v5301_v25 = vpop.f32.mrf.mxu1 }
 0x2bd   : > { %v4989_v14 = vadd.f32 %v4988_v59, %v4987_v18  ;;  %v7559_v33 = vadd.f32 %v5301_v25, %v2579_v34 }
 0x2be   : > { %v4990_v44 = vpop.f32.mrf.mxu0  ;;  %v2731_v53 = vpop.f32.mrf.mxu1 }
 0x2bf   : > { %v7561_v40 = vadd.f32 %v2731_v53, %v2571_v5  ;;  %v2595_v38 = vadd.f32 %v4989_v14, %v2290_v21  ;;  %v7587_v21 = vld [vmem:[%s7914_s7] ss:$0 sm:$0xff] }
 0x2c0   : > { %v4991_v55 = vpop.f32.mrf.mxu0  ;;  %v5302_v0 = vpop.f32.mrf.mxu1 }
 0x2c1   : > { %v4992_v46 = vadd.f32 %v4991_v55, %v4990_v44  ;;  %v7565_v57 = vadd.f32 %v5302_v0, %v2582_v15 }
 0x2c2   : > { %v2734_v12 = vpop.f32.mrf.mxu1  ;;  %v5325_v5 = vpop.f32.mrf.mxu0 }
 0x2c3   : > { %v7567_v28 = vadd.f32 %v2734_v12, %v2574_v30  ;;  %v2598_v63 = vadd.f32 %v4992_v46, %v2293_v42 }
 0x2c4   : > { %v5305_v11 = vpop.f32.mrf.mxu1  ;;  %v3550_v51 = vpop.f32.mrf.mxu0 }
 0x2c5   : > { %v7569_v34 = vadd.f32 %v5305_v11, %v2595_v38 }
 0x2c6   : > { %v2747_v22 = vpop.f32.mrf.mxu1  ;;  %v5326_v30 = vpop.f32.mrf.mxu0 }
 0x2c7   : > { %v7571_v49 = vadd.f32 %v2747_v22, %v2587_v52 }
 0x2c8   : > { %v5306_v4 = vpop.f32.mrf.mxu1  ;;  %v3553_v18 = vpop.f32.mrf.mxu0 }
 0x2c9   : > { %v7573_v1 = vadd.f32 %v5306_v4, %v2598_v63 }
 0x2ca   : > { %v2750_v20 = vpop.f32.mrf.mxu1  ;;  %v5329_v53 = vpop.f32.mrf.mxu0 }
 0x2cb   : > { %v7575_v36 = vadd.f32 %v2750_v20, %v2590_v35 }
 0x2cc   : > { %v5033_v13 = vpop.f32.mrf.mxu1  ;;  %v3566_v11 = vpop.f32.mrf.mxu0 }
 0x2ce   : > { %v5034_v15 = vpop.f32.mrf.mxu1 }
 0x2cf   : > { %v5035_v50 = vadd.f32 %v5034_v15, %v5033_v13 }
 0x2d0   : > { %v5036_v19 = vpop.f32.mrf.mxu1 }
 0x2d1   : > { %v3551_v26 = vadd.f32 %v5035_v50, %v3550_v51 }
 0x2d2   : > { %v5037_v52 = vpop.f32.mrf.mxu1 }
 0x2d3   : > { %v3677_v47 = vadd.f32 %v3551_v26, %v7465_v31  ;;  %v5038_v39 = vadd.f32 %v5037_v52, %v5036_v19  ;;  %v5330_v19 = vpop.f32.mrf.mxu0 }
 0x2d4   : > { %v5039_v29 = vpop.f32.mrf.mxu1 }
 0x2d5   : > { %v3716_v35 = vmul.f32 %v7580_v58, %v3677_v47  ;;  %v3554_v59 = vadd.f32 %v5038_v39, %v3553_v18 }
 0x2d6   : > { %v5040_v25 = vpop.f32.mrf.mxu1 }
 0x2d7   : > { %v3678_v14 = vadd.f32 %v3554_v59, %v7474_v27  ;;  %v5041_v44 = vadd.f32 %v5040_v25, %v5039_v29  ;;  %v3755_v0 = vadd.f32 %v7587_v21, %v3716_v35  ;;  %v3569_v35 = vpop.f32.mrf.mxu0 }
 0x2d8   : > { %v5042_v38 = vpop.f32.mrf.mxu1 }
 0x2d9   : > { %v3717_v55 = vmul.f32 %v7580_v58, %v3678_v14  ;;  %v3559_v31 = vadd.f32 %v5325_v5, %v5041_v44  ;;  %v3787_v27 = vmax.f32 %v3755_v0, 0.0 }
 0x2da   : > { %v5043_v42 = vpop.f32.mrf.mxu1 }
 0x2db   : > { %v3679_v46 = vadd.f32 %v3559_v31, %v7462_v2  ;;  %v5044_v12 = vadd.f32 %v5043_v42, %v5042_v38  ;;  %v3756_v63 = vadd.f32 %v7587_v21, %v3717_v55  ;;  %v5333_v42 = vpop.f32.mrf.mxu0 }
 0x2dc   : > { %v5045_v22 = vpop.f32.mrf.mxu1 }
 0x2dd   : > { %v3718_v4 = vmul.f32 %v7580_v58, %v3679_v46  ;;  %v3562_v20 = vadd.f32 %v5326_v30, %v5044_v12  ;;  %v3788_v51 = vmax.f32 %v3756_v63, 0.0 }
 0x2de   : > { %v5046_v13 = vpop.f32.mrf.mxu1 }
 0x2df   : > { %v3680_v15 = vadd.f32 %v3562_v20, %v7471_v41  ;;  %v5047_v50 = vadd.f32 %v5046_v13, %v5045_v22  ;;  %v3819_v5 = vpack.c.bf16 %v3788_v51, %v3787_v27  ;;  %v3757_v52 = vadd.f32 %v7587_v21, %v3718_v4  ;;  %v3582_v27 = vpop.f32.mrf.mxu0 }
 0x2e0   : > { %v5048_v26 = vpop.f32.mrf.mxu1 }
 0x2e1   : > { %v3719_v2 = vmul.f32 %v7580_v58, %v3680_v15  ;;  %v3567_v47 = vadd.f32 %v5047_v50, %v3566_v11  ;;  %5371 = vmatprep.mubr.bf16.mxu0 %v3819_v5  ;;  %v3789_v25 = vmax.f32 %v3757_v52, 0.0 }
 0x2e2   : > { %v5049_v39 = vpop.f32.mrf.mxu1 }
 0x2e3   : > { %v3758_v18 = vadd.f32 %v7587_v21, %v3719_v2  ;;  %v3681_v30 = vadd.f32 %v3567_v47, %v7483_v6  ;;  %v5050_v29 = vadd.f32 %v5049_v39, %v5048_v26  ;;  %v5334_v2 = vpop.f32.mrf.mxu0 }
 0x2e4   : > { %v5051_v59 = vpop.f32.mrf.mxu1 }
 0x2e5   : > { %v3790_v41 = vmax.f32 %v3758_v18, 0.0  ;;  %v3720_v14 = vmul.f32 %v7580_v58, %v3681_v30  ;;  %v3570_v44 = vadd.f32 %v5050_v29, %v3569_v35 }
 0x2e6   : > { %v5052_v38 = vpop.f32.mrf.mxu1 }
 0x2e7   : > { %v3820_v55 = vpack.c.bf16 %v3790_v41, %v3789_v25  ;;  %v3682_v31 = vadd.f32 %v3570_v44, %v7494_v56  ;;  %v5053_v0 = vadd.f32 %v5052_v38, %v5051_v59  ;;  %v3759_v6 = vadd.f32 %v7587_v21, %v3720_v14  ;;  %v3585_v59 = vpop.f32.mrf.mxu0 }
 0x2e8   : > { %v5054_v46 = vpop.f32.mrf.mxu1 }
 0x2e9   : > { %v3721_v12 = vmul.f32 %v7580_v58, %v3682_v31  ;;  %v3575_v63 = vadd.f32 %v5329_v53, %v5053_v0  ;;  %5372 = vmatmul.mubr.bf16.vlgmr.msra.gmra.mxu0 %v3820_v55  ;;  %v3791_v15 = vmax.f32 %v3759_v6, 0.0 }
 0x2ea   : > { %v5055_v11 = vpop.f32.mrf.mxu1 }
 0x2eb   : > { %v3683_v22 = vadd.f32 %v3575_v63, %v7480_v23  ;;  %v5056_v4 = vadd.f32 %v5055_v11, %v5054_v46  ;;  %v3760_v20 = vadd.f32 %v7587_v21, %v3721_v12  ;;  %v5337_v46 = vpop.f32.mrf.mxu0 }
 0x2ec   : > { %v5057_v51 = vpop.f32.mrf.mxu1 }
 0x2ed   : > { %v3722_v13 = vmul.f32 %v7580_v58, %v3683_v22  ;;  %v3578_v56 = vadd.f32 %v5330_v19, %v5056_v4  ;;  %v3792_v50 = vmax.f32 %v3760_v20, 0.0 }
 0x2ee   : > { %v5058_v5 = vpop.f32.mrf.mxu1 }
 0x2ef   : > { %v3684_v26 = vadd.f32 %v3578_v56, %v7491_v7  ;;  %v5059_v53 = vadd.f32 %v5058_v5, %v5057_v51  ;;  %v3821_v52 = vpack.c.bf16 %v3792_v50, %v3791_v15  ;;  %v3761_v39 = vadd.f32 %v7587_v21, %v3722_v13 }
 0x2f0   : > { %v5060_v47 = vpop.f32.mrf.mxu1 }
 0x2f1   : > { %v3723_v23 = vmul.f32 %v7580_v58, %v3684_v26  ;;  %v3583_v18 = vadd.f32 %v5059_v53, %v3582_v27  ;;  %5375 = vmatprep.mubr.bf16.mxu0 %v3821_v52  ;;  %v3793_v41 = vmax.f32 %v3761_v39, 0.0  ;;  %v3598_v27 = vpop.f32.mrf.mxu0 }
 0x2f2   : > { %v5061_v30 = vpop.f32.mrf.mxu1 }
 0x2f3   : > { %v3762_v29 = vadd.f32 %v7587_v21, %v3723_v23  ;;  %v3685_v19 = vadd.f32 %v3583_v18, %v7502_v48  ;;  %v5062_v35 = vadd.f32 %v5061_v30, %v5060_v47  ;;  %v5338_v53 = vpop.f32.mrf.mxu0 }
 0x2f4   : > { %v5063_v25 = vpop.f32.mrf.mxu1 }
 0x2f5   : > { %v3794_v7 = vmax.f32 %v3762_v29, 0.0  ;;  %v3724_v14 = vmul.f32 %v7580_v58, %v3685_v19  ;;  %v3586_v44 = vadd.f32 %v5062_v35, %v3585_v59  ;;  %v3601_v29 = vpop.f32.mrf.mxu0 }
 0x2f6   : > { %v5064_v38 = vpop.f32.mrf.mxu1 }
 0x2f7   : > { %v3686_v55 = vadd.f32 %v3586_v44, %v7509_v62  ;;  %v5065_v31 = vadd.f32 %v5064_v38, %v5063_v25  ;;  %v3822_v0 = vpack.c.bf16 %v3794_v7, %v3793_v41  ;;  %v3763_v48 = vadd.f32 %v7587_v21, %v3724_v14  ;;  %v5341_v38 = vpop.f32.mrf.mxu0 }
 0x2f8   : > { %v5066_v12 = vpop.f32.mrf.mxu1 }
 0x2f9   : > { %v3725_v63 = vmul.f32 %v7580_v58, %v3686_v55  ;;  %v3591_v6 = vadd.f32 %v5333_v42, %v5065_v31  ;;  %5376 = vmatmul.mubr.bf16.gmra.mxu0 %v3822_v0  ;;  %v3795_v56 = vmax.f32 %v3763_v48, 0.0 }
 0x2fa   : > { %v5067_v11 = vpop.f32.mrf.mxu1 }
 0x2fb   : > { %v3687_v22 = vadd.f32 %v3591_v6, %v7499_v60  ;;  %v5068_v4 = vadd.f32 %v5067_v11, %v5066_v12  ;;  %v3764_v20 = vadd.f32 %v7587_v21, %v3725_v63  ;;  %v3614_v11 = vpop.f32.mrf.mxu0 }
 0x2fc   : > { %v5069_v51 = vpop.f32.mrf.mxu1 }
 0x2fd   : > { %v3726_v62 = vmul.f32 %v7580_v58, %v3687_v22  ;;  %v3594_v13 = vadd.f32 %v5334_v2, %v5068_v4  ;;  %v3796_v15 = vmax.f32 %v3764_v20, 0.0 }
 0x2fe   : > { %v5070_v50 = vpop.f32.mrf.mxu1 }
 0x2ff   : > { %v3688_v5 = vadd.f32 %v3594_v13, %v7506_v45  ;;  %v5071_v42 = vadd.f32 %v5070_v50, %v5069_v51  ;;  %v3823_v26 = vpack.c.bf16 %v3796_v15, %v3795_v56  ;;  %v3765_v47 = vadd.f32 %v7587_v21, %v3726_v62  ;;  %v5342_v56 = vpop.f32.mrf.mxu0 }
 0x300   : > { %v5072_v52 = vpop.f32.mrf.mxu1 }
 0x301   : > { %v3727_v60 = vmul.f32 %v7580_v58, %v3688_v5  ;;  %v3599_v39 = vadd.f32 %v5071_v42, %v3598_v27  ;;  %5379 = vmatprep.mubr.bf16.mxu0 %v3823_v26  ;;  %v3797_v35 = vmax.f32 %v3765_v47, 0.0  ;;  %v3617_v47 = vpop.f32.mrf.mxu0 }
 0x302   : > { %v5073_v23 = vpop.f32.mrf.mxu1 }
 0x303   : > { %v3766_v18 = vadd.f32 %v7587_v21, %v3727_v60  ;;  %v3689_v2 = vadd.f32 %v3599_v39, %v7516_v10  ;;  %v5074_v30 = vadd.f32 %v5073_v23, %v5072_v52 }
 0x304   : > { %v5075_v19 = vpop.f32.mrf.mxu1 }
 0x305   : > { %v3798_v45 = vmax.f32 %v3766_v18, 0.0  ;;  %v3728_v59 = vmul.f32 %v7580_v58, %v3689_v2  ;;  %v3602_v25 = vadd.f32 %v5074_v30, %v3601_v29 }
 0x306   : > { %v5076_v41 = vpop.f32.mrf.mxu1 }
 0x307   : > { %v3690_v7 = vadd.f32 %v3602_v25, %v7525_v43  ;;  %v5077_v14 = vadd.f32 %v5076_v41, %v5075_v19  ;;  %v3824_v44 = vpack.c.bf16 %v3798_v45, %v3797_v35  ;;  %v3767_v10 = vadd.f32 %v7587_v21, %v3728_v59  ;;  %v5345_v35 = vpop.f32.mrf.mxu0 }
 0x308   : > { %v5078_v55 = vpop.f32.mrf.mxu1 }
 0x309   : > { %v3729_v31 = vmul.f32 %v7580_v58, %v3690_v7  ;;  %v3607_v0 = vadd.f32 %v5337_v46, %v5077_v14  ;;  %5380 = vmatmul.mubr.bf16.gmra.mxu0 %v3824_v44  ;;  %v3799_v20 = vmax.f32 %v3767_v10, 0.0 }
 0x30a   : > { %v5079_v12 = vpop.f32.mrf.mxu1 }
 0x30b   : > { %v3691_v63 = vadd.f32 %v3607_v0, %v7513_v3  ;;  %v5080_v6 = vadd.f32 %v5079_v12, %v5078_v55  ;;  %v3768_v48 = vadd.f32 %v7587_v21, %v3729_v31  ;;  %v3630_v55 = vpop.f32.mrf.mxu0 }
 0x30c   : > { %v5081_v22 = vpop.f32.mrf.mxu1 }
 0x30d   : > { %v3730_v43 = vmul.f32 %v7580_v58, %v3691_v63  ;;  %v3610_v4 = vadd.f32 %v5338_v53, %v5080_v6  ;;  %v3800_v27 = vmax.f32 %v3768_v48, 0.0 }
 0x30e   : > { %v5082_v51 = vpop.f32.mrf.mxu1 }
 0x30f   : > { %v3692_v62 = vadd.f32 %v3610_v4, %v7522_v54  ;;  %v5083_v46 = vadd.f32 %v5082_v51, %v5081_v22  ;;  %v3825_v13 = vpack.c.bf16 %v3800_v27, %v3799_v20  ;;  %v3769_v50 = vadd.f32 %v7587_v21, %v3730_v43 }
 0x310   : > { %v5084_v15 = vpop.f32.mrf.mxu1 }
 0x311   : > { %v3731_v3 = vmul.f32 %v7580_v58, %v3692_v62  ;;  %v3615_v5 = vadd.f32 %v5083_v46, %v3614_v11  ;;  %5383 = vmatprep.mubr.bf16.mxu0 %v3825_v13  ;;  %v3801_v39 = vmax.f32 %v3769_v50, 0.0  ;;  %v5346_v11 = vpop.f32.mrf.mxu0 }
 0x312   : > { %v5085_v42 = vpop.f32.mrf.mxu1 }
 0x313   : > { %v3770_v26 = vadd.f32 %v7587_v21, %v3731_v3  ;;  %v3693_v53 = vadd.f32 %v3615_v5, %v7533_v16  ;;  %v5086_v52 = vadd.f32 %v5085_v42, %v5084_v15  ;;  %v3633_v46 = vpop.f32.mrf.mxu0 }
 0x314   : > { %v5087_v60 = vpop.f32.mrf.mxu1 }
 0x315   : > { %v3802_v54 = vmax.f32 %v3770_v26, 0.0  ;;  %v3732_v23 = vmul.f32 %v7580_v58, %v3693_v53  ;;  %v3618_v18 = vadd.f32 %v5086_v52, %v3617_v47  ;;  %v5349_v53 = vpop.f32.mrf.mxu0 }
 0x316   : > { %v5088_v2 = vpop.f32.mrf.mxu1 }
 0x317   : > { %v3694_v30 = vadd.f32 %v3618_v18, %v7541_v17  ;;  %v5089_v29 = vadd.f32 %v5088_v2, %v5087_v60  ;;  %v3826_v19 = vpack.c.bf16 %v3802_v54, %v3801_v39  ;;  %v3771_v16 = vadd.f32 %v7587_v21, %v3732_v23  ;;  %v3646_v2 = vpop.f32.mrf.mxu0 }
 0x318   : > { %v5090_v45 = vpop.f32.mrf.mxu1 }
 0x319   : > { %v3733_v59 = vmul.f32 %v7580_v58, %v3694_v30  ;;  %v3623_v25 = vadd.f32 %v5341_v38, %v5089_v29  ;;  %5384 = vmatmul.mubr.bf16.gmra.mxu0 %v3826_v19  ;;  %v3803_v10 = vmax.f32 %v3771_v16, 0.0 }
 0x31a   : > { %v5091_v41 = vpop.f32.mrf.mxu1 }
 0x31b   : > { %v3695_v7 = vadd.f32 %v3623_v25, %v7530_v61  ;;  %v5092_v14 = vadd.f32 %v5091_v41, %v5090_v45  ;;  %v3772_v44 = vadd.f32 %v7587_v21, %v3733_v59  ;;  %v5350_v41 = vpop.f32.mrf.mxu0 }
 0x31c   : > { %v5093_v31 = vpop.f32.mrf.mxu1 }
 0x31d   : > { %v3734_v17 = vmul.f32 %v7580_v58, %v3695_v7  ;;  %v3626_v0 = vadd.f32 %v5342_v56, %v5092_v14  ;;  %v3804_v12 = vmax.f32 %v3772_v44, 0.0 }
 0x31e   : > { %v5094_v63 = vpop.f32.mrf.mxu1 }
 0x31f   : > { %v3696_v6 = vadd.f32 %v3626_v0, %v7538_v32  ;;  %v5095_v38 = vadd.f32 %v5094_v63, %v5093_v31  ;;  %v3827_v48 = vpack.c.bf16 %v3804_v12, %v3803_v10  ;;  %v3773_v43 = vadd.f32 %v7587_v21, %v3734_v17  ;;  %v3649_v10 = vpop.f32.mrf.mxu0 }
 0x320   : > { %v5096_v22 = vpop.f32.mrf.mxu1 }
 0x321   : > { %v3735_v61 = vmul.f32 %v7580_v58, %v3696_v6  ;;  %v3631_v4 = vadd.f32 %v5095_v38, %v3630_v55  ;;  %5387 = vmatprep.mubr.bf16.mxu0 %v3827_v48  ;;  %v3805_v56 = vmax.f32 %v3773_v43, 0.0 }
 0x322   : > { %v5097_v20 = vpop.f32.mrf.mxu1 }
 0x323   : > { %v3774_v27 = vadd.f32 %v7587_v21, %v3735_v61  ;;  %v3697_v51 = vadd.f32 %v3631_v4, %v7548_v37  ;;  %v5098_v62 = vadd.f32 %v5097_v20, %v5096_v22 }
 0x324   : > { %v5099_v13 = vpop.f32.mrf.mxu1 }
 0x325   : > { %v3806_v32 = vmax.f32 %v3774_v27, 0.0  ;;  %v3736_v15 = vmul.f32 %v7580_v58, %v3697_v51  ;;  %v3634_v50 = vadd.f32 %v5098_v62, %v3633_v46 }
 0x326   : > { %v5100_v3 = vpop.f32.mrf.mxu1 }
 0x327   : > { %v3698_v5 = vadd.f32 %v3634_v50, %v7555_v8  ;;  %v5101_v42 = vadd.f32 %v5100_v3, %v5099_v13  ;;  %v3828_v26 = vpack.c.bf16 %v3806_v32, %v3805_v56  ;;  %v3775_v37 = vadd.f32 %v7587_v21, %v3736_v15 }
 0x328   : > { %v5102_v52 = vpop.f32.mrf.mxu1 }
 0x329   : > { %v3737_v47 = vmul.f32 %v7580_v58, %v3698_v5  ;;  %v3639_v60 = vadd.f32 %v5345_v35, %v5101_v42  ;;  %5388 = vmatmul.mubr.bf16.gmra.mxu0 %v3828_v26  ;;  %v3807_v19 = vmax.f32 %v3775_v37, 0.0 }
 0x32a   : > { %v5103_v39 = vpop.f32.mrf.mxu1 }
 0x32b   : > { %v3699_v54 = vadd.f32 %v3639_v60, %v7545_v9  ;;  %v5104_v23 = vadd.f32 %v5103_v39, %v5102_v52  ;;  %v3776_v18 = vadd.f32 %v7587_v21, %v3737_v47 }
 0x32c   : > { %v5105_v30 = vpop.f32.mrf.mxu1 }
 0x32d   : > { %v3738_v8 = vmul.f32 %v7580_v58, %v3699_v54  ;;  %v3642_v29 = vadd.f32 %v5346_v11, %v5104_v23  ;;  %v3808_v45 = vmax.f32 %v3776_v18, 0.0  ;;  %v5353_v11 = vpop.f32.mrf.mxu0 }
 0x32e   : > { %v5106_v59 = vpop.f32.mrf.mxu1 }
 0x32f   : > { %v3700_v25 = vadd.f32 %v3642_v29, %v7552_v24  ;;  %v5107_v35 = vadd.f32 %v5106_v59, %v5105_v30  ;;  %v3829_v16 = vpack.c.bf16 %v3808_v45, %v3807_v19  ;;  %v3777_v14 = vadd.f32 %v7587_v21, %v3738_v8  ;;  %v3662_v62 = vpop.f32.mrf.mxu0 }
 0x330   : > { %v5108_v7 = vpop.f32.mrf.mxu1 }
 0x331   : > { %v3739_v9 = vmul.f32 %v7580_v58, %v3700_v25  ;;  %v3647_v44 = vadd.f32 %v5107_v35, %v3646_v2  ;;  %5391 = vmatprep.mubr.bf16.mxu0 %v3829_v16  ;;  %v3809_v63 = vmax.f32 %v3777_v14, 0.0  ;;  %v5354_v42 = vpop.f32.mrf.mxu0 }
 0x332   : > { %v5109_v55 = vpop.f32.mrf.mxu1 }
 0x333   : > { %v3778_v31 = vadd.f32 %v7587_v21, %v3739_v9  ;;  %v3701_v17 = vadd.f32 %v3647_v44, %v7561_v40  ;;  %v5110_v0 = vadd.f32 %v5109_v55, %v5108_v7  ;;  %v3665_v54 = vpop.f32.mrf.mxu0 }
 0x334   : > { %v5111_v12 = vpop.f32.mrf.mxu1 }
 0x335   : > { %v3810_v24 = vmax.f32 %v3778_v31, 0.0  ;;  %v3740_v6 = vmul.f32 %v7580_v58, %v3701_v17  ;;  %v3650_v38 = vadd.f32 %v5110_v0, %v3649_v10 }
 0x336   : > { %v5112_v48 = vpop.f32.mrf.mxu1 }
 0x337   : > { %v3702_v22 = vadd.f32 %v3650_v38, %v7567_v28  ;;  %v5113_v43 = vadd.f32 %v5112_v48, %v5111_v12  ;;  %v3830_v61 = vpack.c.bf16 %v3810_v24, %v3809_v63  ;;  %v3779_v40 = vadd.f32 %v7587_v21, %v3740_v6 }
 0x338   : > { %v5114_v4 = vpop.f32.mrf.mxu1 }
 0x339   : > { %v3741_v20 = vmul.f32 %v7580_v58, %v3702_v22  ;;  %v3655_v27 = vadd.f32 %v5349_v53, %v5113_v43  ;;  %5392 = vmatmul.mubr.bf16.gmra.mxu0 %v3830_v61  ;;  %v3811_v50 = vmax.f32 %v3779_v40, 0.0  ;;  %v7691_v22 = vld [vmem:[%s7916_s9] ss:$0 sm:$0xff] }
 0x33a   : > { %v5115_v51 = vpop.f32.mrf.mxu1 }
 0x33b   : > { %v3703_v46 = vadd.f32 %v3655_v27, %v7559_v33  ;;  %v5116_v13 = vadd.f32 %v5115_v51, %v5114_v4  ;;  %v3780_v56 = vadd.f32 %v7587_v21, %v3741_v20  ;;  %v5551_v20 = vld [vmem:[%s5895_s24 + $0x10] sm:$0xff] }
 0x33c   : > { %v5117_v32 = vpop.f32.mrf.mxu1 }
 0x33d   : > { %v3742_v15 = vmul.f32 %v7580_v58, %v3703_v46  ;;  %v3658_v28 = vadd.f32 %v5350_v41, %v5116_v13  ;;  %v3812_v3 = vmax.f32 %v3780_v56, 0.0  ;;  %v5552_v13 = vld [vmem:[%s5895_s24] sm:$0xff] }
 0x33e   : > { %v5118_v5 = vpop.f32.mrf.mxu1 }
 0x33f   : > { %v3704_v26 = vadd.f32 %v3658_v28, %v7565_v57  ;;  %v5119_v53 = vadd.f32 %v5118_v5, %v5117_v32  ;;  %v3831_v52 = vpack.c.bf16 %v3812_v3, %v3811_v50  ;;  %v3781_v60 = vadd.f32 %v7587_v21, %v3742_v15  ;;  %v5553_v50 = vld [vmem:[%s5895_s24 + $0x18] sm:$0xff] }
 0x340   : > { %v5120_v47 = vpop.f32.mrf.mxu1 }
 0x341   : > { %v3743_v33 = vmul.f32 %v7580_v58, %v3704_v26  ;;  %v3663_v37 = vadd.f32 %v5119_v53, %v3662_v62  ;;  %5395 = vmatprep.mubr.bf16.mxu0 %v3831_v52  ;;  %v3813_v8 = vmax.f32 %v3781_v60, 0.0  ;;  %v5554_v26 = vld [vmem:[%s5895_s24 + $0x8] sm:$0xff] }
 0x342   : > { %v5121_v39 = vpop.f32.mrf.mxu1 }
 0x343   : > { %v3782_v23 = vadd.f32 %v7587_v21, %v3743_v33  ;;  %v3705_v18 = vadd.f32 %v3663_v37, %v7571_v49  ;;  %v5122_v2 = vadd.f32 %v5121_v39, %v5120_v47 }
 0x344   : > { %v5123_v30 = vpop.f32.mrf.mxu1 }
 0x345   : > { %v3814_v29 = vmax.f32 %v3782_v23, 0.0  ;;  %v3744_v57 = vmul.f32 %v7580_v58, %v3705_v18  ;;  %v3666_v19 = vadd.f32 %v5122_v2, %v3665_v54  ;;  %v5555_v23 = vld [vmem:[%s5895_s24 + $0x30] sm:$0xff] }
 0x346   : > { %v5124_v45 = vpop.f32.mrf.mxu1 }
 0x347   : > { %v3706_v59 = vadd.f32 %v3666_v19, %v7575_v36  ;;  %v5125_v25 = vadd.f32 %v5124_v45, %v5123_v30  ;;  %v3832_v35 = vpack.c.bf16 %v3814_v29, %v3813_v8  ;;  %v3783_v14 = vadd.f32 %v7587_v21, %v3744_v57  ;;  %v5556_v57 = vld [vmem:[%s5895_s24 + $0x20] sm:$0xff] }
 0x348   : > { %v5126_v16 = vpop.f32.mrf.mxu1 }
 0x349   : > { %v3745_v41 = vmul.f32 %v7580_v58, %v3706_v59  ;;  %v3671_v7 = vadd.f32 %v5353_v11, %v5125_v25  ;;  %5396 = vmatmul.mubr.bf16.gmra.mxu0 %v3832_v35  ;;  %v3815_v0 = vmax.f32 %v3783_v14, 0.0  ;;  %v7686_v11 = vld [vmem:[%s7915_s8] ss:$0 sm:$0xff]  ;;  %v5557_v35 = vld [vmem:[%s5895_s24 + $0x38] sm:$0xff]  ;;  %v5558_v14 = vld [vmem:[%s5895_s24 + $0x28] sm:$0xff] }
 0x34a   : > { %v5127_v49 = vpop.f32.mrf.mxu1 }
 0x34b   : > { %v3707_v9 = vadd.f32 %v3671_v7, %v7569_v34  ;;  %v5128_v44 = vadd.f32 %v5127_v49, %v5126_v16  ;;  %v3784_v55 = vadd.f32 %v7587_v21, %v3745_v41 }
 0x34d   : > { %v3746_v31 = vmul.f32 %v7580_v58, %v3707_v9  ;;  %v3674_v17 = vadd.f32 %v5354_v42, %v5128_v44  ;;  %v3816_v36 = vmax.f32 %v3784_v55, 0.0 }
 0x34f   : > { %v3708_v10 = vadd.f32 %v3674_v17, %v7573_v1  ;;  %v3833_v12 = vpack.c.bf16 %v3816_v36, %v3815_v0  ;;  %v3785_v63 = vadd.f32 %v7587_v21, %v3746_v31 }
 0x351   : > { %v3747_v24 = vmul.f32 %v7580_v58, %v3708_v10  ;;  %5399 = vmatprep.mubr.bf16.mxu0 %v3833_v12  ;;  %v3817_v34 = vmax.f32 %v3785_v63, 0.0  ;;  %v5559_v10 = vld [vmem:[%s5895_s24 + $0x50] sm:$0xff] }
 0x353   : > { %v3786_v6 = vadd.f32 %v7587_v21, %v3747_v24 }
 0x355   : > { %v3818_v38 = vmax.f32 %v3786_v6, 0.0 }
 0x357   : > { %v3834_v48 = vpack.c.bf16 %v3818_v38, %v3817_v34  ;;  %v5560_v38 = vld [vmem:[%s5895_s24 + $0x40] sm:$0xff] }
 0x359   : > { %5400 = vmatmul.mubr.bf16.gmra.mxu0 %v3834_v48 }
 0x3a9   : > { %v5373_v1 = vpop.f32.mrf.mxu0 }
 0x3aa   : > { %v4069_v58 = vmul.f32 %v5373_v1, %v7686_v11 }
 0x3ab   : > { %v3933_v21 = vpop.f32.mrf.mxu0 }
 0x3ac   : > { %v4108_v43 = vadd.f32 %v7691_v22, %v4069_v58  ;;  %v4067_v61 = vmul.f32 %v7686_v11, %v3933_v21 }
 0x3ad   : > { %v5374_v4 = vpop.f32.mrf.mxu0 }
 0x3ae   : > { %v4140_v27 = vadd.f32 %v5551_v20, %v4108_v43  ;;  %v4106_v40 = vadd.f32 %v7691_v22, %v4067_v61  ;;  %v4070_v51 = vmul.f32 %v5374_v4, %v7686_v11  ;;  %v5561_v43 = vld [vmem:[%s5895_s24 + $0x58] sm:$0xff] }
 0x3af   : > { %v3936_v62 = vpop.f32.mrf.mxu0 }
 0x3b0   : > { %v4172_v46 = vmax.f32 %v4140_v27, 0.0  ;;  %v4138_v56 = vadd.f32 %v5552_v13, %v4106_v40  ;;  %v4109_v32 = vadd.f32 %v7691_v22, %v4070_v51  ;;  %v4068_v15 = vmul.f32 %v7686_v11, %v3936_v62  ;;  %v5562_v27 = vld [vmem:[%s5895_s24 + $0x48] sm:$0xff] }
 0x3b2   : > { %4204 = vst.msk [vmem:[%s7704_s28 + $0x10] sm:$0xff] %vm8375_vm15, %v4172_v46  ;;  %v4170_v28 = vmax.f32 %v4138_v56, 0.0  ;;  %v4141_v3 = vadd.f32 %v5553_v50, %v4109_v32  ;;  %v4107_v5 = vadd.f32 %v7691_v22, %v4068_v15  ;;  %vm8391_vm15 = vmmov %vm8387_vm0 }
 0x3b4   : > { %4202 = vst.msk [vmem:[%s7704_s28] sm:$0xff] %vm8376_vm7, %v4170_v28  ;;  %v4173_v42 = vmax.f32 %v4141_v3, 0.0  ;;  %v4139_v53 = vadd.f32 %v5554_v26, %v4107_v5  ;;  %v5563_v28 = vld [vmem:[%s5895_s24 + $0x70] sm:$0xff]  ;;  %vm8392_vm7 = vmmov %vm8387_vm0 }
 0x3b6   : > { %4205 = vst.msk [vmem:[%s7704_s28 + $0x18] sm:$0xff] %vm8377_vm12, %v4173_v42  ;;  %v4171_v52 = vmax.f32 %v4139_v53, 0.0  ;;  %v5564_v53 = vld [vmem:[%s5895_s24 + $0x60] sm:$0xff]  ;;  %vm8393_vm12 = vmmov %vm8387_vm0 }
 0x3b8   : > { %4203 = vst.msk [vmem:[%s7704_s28 + $0x8] sm:$0xff] %vm8378_vm2, %v4171_v52  ;;  %vm8394_vm2 = vmmov %vm8387_vm0 }
 0x3b9   : > { %v5377_v47 = vpop.f32.mrf.mxu0 }
 0x3ba   : > { %v4073_v60 = vmul.f32 %v5377_v47, %v7686_v11 }
 0x3bb   : > { %v3949_v33 = vpop.f32.mrf.mxu0 }
 0x3bc   : > { %v4112_v37 = vadd.f32 %v7691_v22, %v4073_v60  ;;  %v4071_v39 = vmul.f32 %v7686_v11, %v3949_v33 }
 0x3bd   : > { %v5378_v54 = vpop.f32.mrf.mxu0 }
 0x3be   : > { %v4144_v18 = vadd.f32 %v5555_v23, %v4112_v37  ;;  %v4110_v2 = vadd.f32 %v7691_v22, %v4071_v39  ;;  %v4074_v30 = vmul.f32 %v5378_v54, %v7686_v11  ;;  %v5565_v37 = vld [vmem:[%s5895_s24 + $0x78] sm:$0xff] }
 0x3bf   : > { %v3952_v8 = vpop.f32.mrf.mxu0 }
 0x3c0   : > { %v4176_v29 = vmax.f32 %v4144_v18, 0.0  ;;  %v4142_v19 = vadd.f32 %v5556_v57, %v4110_v2  ;;  %v4113_v45 = vadd.f32 %v7691_v22, %v4074_v30  ;;  %v4072_v59 = vmul.f32 %v7686_v11, %v3952_v8  ;;  %v5566_v18 = vld [vmem:[%s5895_s24 + $0x68] sm:$0xff] }
 0x3c2   : > { %4208 = vst.msk [vmem:[%s7704_s28 + $0x30] sm:$0xff] %vm8379_vm8, %v4176_v29  ;;  %v4174_v25 = vmax.f32 %v4142_v19, 0.0  ;;  %v4145_v16 = vadd.f32 %v5557_v35, %v4113_v45  ;;  %v4111_v41 = vadd.f32 %v7691_v22, %v4072_v59  ;;  %vm8395_vm8 = vmmov %vm8387_vm0 }
 0x3c4   : > { %4206 = vst.msk [vmem:[%s7704_s28 + $0x20] sm:$0xff] %vm8380_vm11, %v4174_v25  ;;  %v4177_v7 = vmax.f32 %v4145_v16, 0.0  ;;  %v4143_v49 = vadd.f32 %v5558_v14, %v4111_v41  ;;  %v5567_v25 = vld [vmem:[%s5895_s24 + $0x90] sm:$0xff]  ;;  %vm8396_vm11 = vmmov %vm8387_vm0 }
 0x3c6   : > { %4209 = vst.msk [vmem:[%s7704_s28 + $0x38] sm:$0xff] %vm8381_vm10, %v4177_v7  ;;  %v4175_v9 = vmax.f32 %v4143_v49, 0.0  ;;  %v5568_v49 = vld [vmem:[%s5895_s24 + $0x80] sm:$0xff]  ;;  %vm8397_vm10 = vmmov %vm8387_vm0 }
 0x3c8   : > { %4207 = vst.msk [vmem:[%s7704_s28 + $0x28] sm:$0xff] %vm8382_vm3, %v4175_v9  ;;  %vm8398_vm3 = vmmov %vm8387_vm0 }
 0x3c9   : > { %v5381_v44 = vpop.f32.mrf.mxu0 }
 0x3ca   : > { %v4077_v55 = vmul.f32 %v5381_v44, %v7686_v11 }
 0x3cb   : > { %v3965_v31 = vpop.f32.mrf.mxu0 }
 0x3cc   : > { %v4116_v17 = vadd.f32 %v7691_v22, %v4077_v55  ;;  %v4075_v0 = vmul.f32 %v7686_v11, %v3965_v31 }
 0x3cd   : > { %v5382_v36 = vpop.f32.mrf.mxu0 }
 0x3ce   : > { %v4148_v12 = vadd.f32 %v5559_v10, %v4116_v17  ;;  %v4114_v63 = vadd.f32 %v7691_v22, %v4075_v0  ;;  %v4078_v24 = vmul.f32 %v5382_v36, %v7686_v11  ;;  %v5569_v17 = vld [vmem:[%s5895_s24 + $0x98] sm:$0xff] }
 0x3cf   : > { %v3968_v6 = vpop.f32.mrf.mxu0 }
 0x3d0   : > { %v4180_v34 = vmax.f32 %v4148_v12, 0.0  ;;  %v4146_v48 = vadd.f32 %v5560_v38, %v4114_v63  ;;  %v4117_v1 = vadd.f32 %v7691_v22, %v4078_v24  ;;  %v4076_v58 = vmul.f32 %v7686_v11, %v3968_v6  ;;  %v5570_v12 = vld [vmem:[%s5895_s24 + $0x88] sm:$0xff] }
 0x3d2   : > { %4212 = vst.msk [vmem:[%s7704_s28 + $0x50] sm:$0xff] %vm8383_vm14, %v4180_v34  ;;  %v4178_v21 = vmax.f32 %v4146_v48, 0.0  ;;  %v4149_v61 = vadd.f32 %v5561_v43, %v4117_v1  ;;  %v4115_v4 = vadd.f32 %v7691_v22, %v4076_v58  ;;  %vm8399_vm14 = vmmov %vm8387_vm0 }
 0x3d4   : > { %4210 = vst.msk [vmem:[%s7704_s28 + $0x40] sm:$0xff] %vm8384_vm13, %v4178_v21  ;;  %v4181_v20 = vmax.f32 %v4149_v61, 0.0  ;;  %v4147_v40 = vadd.f32 %v5562_v27, %v4115_v4  ;;  %v5571_v21 = vld [vmem:[%s5895_s24 + $0xb0] sm:$0xff]  ;;  %vm8400_vm13 = vmmov %vm8387_vm0 }
 0x3d6   : > { %4213 = vst.msk [vmem:[%s7704_s28 + $0x58] sm:$0xff] %vm8385_vm9, %v4181_v20  ;;  %v4179_v51 = vmax.f32 %v4147_v40, 0.0  ;;  %v5572_v40 = vld [vmem:[%s5895_s24 + $0xa0] sm:$0xff]  ;;  %vm8401_vm9 = vmmov %vm8387_vm0 }
 0x3d8   : > { %4211 = vst.msk [vmem:[%s7704_s28 + $0x48] sm:$0xff] %vm8386_vm1, %v4179_v51  ;;  %vm8402_vm1 = vmmov %vm8387_vm0 }
 0x3d9   : > { %v5385_v62 = vpop.f32.mrf.mxu0 }
 0x3da   : > { %v4081_v46 = vmul.f32 %v5385_v62, %v7686_v11 }
 0x3db   : > { %v3981_v13 = vpop.f32.mrf.mxu0 }
 0x3dc   : > { %v4120_v56 = vadd.f32 %v7691_v22, %v4081_v46  ;;  %v4079_v32 = vmul.f32 %v7686_v11, %v3981_v13 }
 0x3dd   : > { %v5386_v15 = vpop.f32.mrf.mxu0 }
 0x3de   : > { %v4152_v50 = vadd.f32 %v5563_v28, %v4120_v56  ;;  %v4118_v3 = vadd.f32 %v7691_v22, %v4079_v32  ;;  %v4082_v5 = vmul.f32 %v5386_v15, %v7686_v11  ;;  %v5573_v56 = vld [vmem:[%s5895_s24 + $0xb8] sm:$0xff] }
 0x3df   : > { %v3984_v42 = vpop.f32.mrf.mxu0 }
 0x3e0   : > { %v4184_v26 = vmax.f32 %v4152_v50, 0.0  ;;  %v4150_v52 = vadd.f32 %v5564_v53, %v4118_v3  ;;  %v4121_v47 = vadd.f32 %v7691_v22, %v4082_v5  ;;  %v4080_v60 = vmul.f32 %v7686_v11, %v3984_v42  ;;  %v5574_v50 = vld [vmem:[%s5895_s24 + $0xa8] sm:$0xff] }
 0x3e2   : > { %4216 = vst.msk [vmem:[%s7704_s28 + $0x70] sm:$0xff] %vm8387_vm0, %v4184_v26  ;;  %v4182_v33 = vmax.f32 %v4150_v52, 0.0  ;;  %v4153_v39 = vadd.f32 %v5565_v37, %v4121_v47  ;;  %v4119_v54 = vadd.f32 %v7691_v22, %v4080_v60 }
 0x3e4   : > { %4214 = vst.msk [vmem:[%s7704_s28 + $0x60] sm:$0xff] %vm8388_vm4, %v4182_v33  ;;  %v4185_v23 = vmax.f32 %v4153_v39, 0.0  ;;  %v4151_v2 = vadd.f32 %v5566_v18, %v4119_v54  ;;  %v5575_v33 = vld [vmem:[%s5895_s24 + $0xd0] sm:$0xff]  ;;  %vm8403_vm4 = vmmov %vm8387_vm0 }
 0x3e6   : > { %4217 = vst.msk [vmem:[%s7704_s28 + $0x78] sm:$0xff] %vm8389_vm6, %v4185_v23  ;;  %v4183_v30 = vmax.f32 %v4151_v2, 0.0  ;;  %v5576_v2 = vld [vmem:[%s5895_s24 + $0xc0] sm:$0xff]  ;;  %vm8404_vm6 = vmmov %vm8387_vm0 }
 0x3e8   : > { %4215 = vst.msk [vmem:[%s7704_s28 + $0x68] sm:$0xff] %vm8390_vm5, %v4183_v30  ;;  %vm8405_vm5 = vmmov %vm8387_vm0 }
 0x3e9   : > { %v5389_v8 = vpop.f32.mrf.mxu0 }
 0x3ea   : > { %v4085_v29 = vmul.f32 %v5389_v8, %v7686_v11 }
 0x3eb   : > { %v3997_v57 = vpop.f32.mrf.mxu0 }
 0x3ec   : > { %v4124_v19 = vadd.f32 %v7691_v22, %v4085_v29  ;;  %v4083_v45 = vmul.f32 %v7686_v11, %v3997_v57 }
 0x3ed   : > { %v5390_v59 = vpop.f32.mrf.mxu0 }
 0x3ee   : > { %v4156_v35 = vadd.f32 %v5567_v25, %v4124_v19  ;;  %v4122_v16 = vadd.f32 %v7691_v22, %v4083_v45  ;;  %v4086_v41 = vmul.f32 %v5390_v59, %v7686_v11  ;;  %v5577_v19 = vld [vmem:[%s5895_s24 + $0xd8] sm:$0xff] }
 0x3ef   : > { %v4000_v7 = vpop.f32.mrf.mxu0 }
 0x3f0   : > { %v4188_v14 = vmax.f32 %v4156_v35, 0.0  ;;  %v4154_v9 = vadd.f32 %v5568_v49, %v4122_v16  ;;  %v4125_v44 = vadd.f32 %v7691_v22, %v4086_v41  ;;  %v4084_v55 = vmul.f32 %v7686_v11, %v4000_v7  ;;  %v5578_v35 = vld [vmem:[%s5895_s24 + $0xc8] sm:$0xff] }
 0x3f2   : > { %4220 = vst.msk [vmem:[%s7704_s28 + $0x90] sm:$0xff] %vm8391_vm15, %v4188_v14  ;;  %v4186_v31 = vmax.f32 %v4154_v9, 0.0  ;;  %v4157_v0 = vadd.f32 %v5569_v17, %v4125_v44  ;;  %v4123_v36 = vadd.f32 %v7691_v22, %v4084_v55 }
 0x3f4   : > { %4218 = vst.msk [vmem:[%s7704_s28 + $0x80] sm:$0xff] %vm8392_vm7, %v4186_v31  ;;  %v4189_v10 = vmax.f32 %v4157_v0, 0.0  ;;  %v4155_v63 = vadd.f32 %v5570_v12, %v4123_v36  ;;  %v5579_v31 = vld [vmem:[%s5895_s24 + $0xf0] sm:$0xff] }
 0x3f6   : > { %4221 = vst.msk [vmem:[%s7704_s28 + $0x98] sm:$0xff] %vm8393_vm12, %v4189_v10  ;;  %v4187_v24 = vmax.f32 %v4155_v63, 0.0  ;;  %v5580_v63 = vld [vmem:[%s5895_s24 + $0xe0] sm:$0xff] }
 0x3f8   : > { %4219 = vst.msk [vmem:[%s7704_s28 + $0x88] sm:$0xff] %vm8394_vm2, %v4187_v24 }
 0x3f9   : > { %v5393_v6 = vpop.f32.mrf.mxu0 }
 0x3fa   : > { %v4089_v34 = vmul.f32 %v5393_v6, %v7686_v11 }
 0x3fb   : > { %v4013_v38 = vpop.f32.mrf.mxu0 }
 0x3fc   : > { %v4128_v48 = vadd.f32 %v7691_v22, %v4089_v34  ;;  %v4087_v1 = vmul.f32 %v7686_v11, %v4013_v38 }
 0x3fd   : > { %v5394_v58 = vpop.f32.mrf.mxu0 }
 0x3fe   : > { %v4160_v43 = vadd.f32 %v5571_v21, %v4128_v48  ;;  %v4126_v61 = vadd.f32 %v7691_v22, %v4087_v1  ;;  %v4090_v4 = vmul.f32 %v5394_v58, %v7686_v11  ;;  %v5581_v48 = vld [vmem:[%s5895_s24 + $0xf8] sm:$0xff] }
 0x3ff   : > { %v4016_v20 = vpop.f32.mrf.mxu0 }
 0x400   : > { %v4192_v27 = vmax.f32 %v4160_v43, 0.0  ;;  %v4158_v51 = vadd.f32 %v5572_v40, %v4126_v61  ;;  %v4129_v62 = vadd.f32 %v7691_v22, %v4090_v4  ;;  %v4088_v46 = vmul.f32 %v7686_v11, %v4016_v20  ;;  %v5582_v43 = vld [vmem:[%s5895_s24 + $0xe8] sm:$0xff]  ;;  %s5715_s24 = smov [#allocation7]  }
 0x401   : > { %s5641_s21 = sshll.u32 %s5715_s24, 4  ;;  %s5642_s21 = int_to_ptr.vmem [resolvable:$false] %s5641_s21 }
 0x402   : > { %4224 = vst.msk [vmem:[%s7704_s28 + $0xb0] sm:$0xff] %vm8395_vm8, %v4192_v27  ;;  %v4190_v13 = vmax.f32 %v4158_v51, 0.0  ;;  %v4161_v32 = vadd.f32 %v5573_v56, %v4129_v62  ;;  %v4127_v15 = vadd.f32 %v7691_v22, %v4088_v46  ;;  %s5643_s11 = scalar_lea.vmem %s5642_s21, 8192  ;;  %p5644_p10 = scmp.lt.s32.totalorder %s7860_s23, %s5642_s21 }
 0x403   : > { %p5645_p2 = scmp.lt.s32.totalorder %s5643_s11, %s5637_s12 }
 0x404   : > { %4222 = vst.msk [vmem:[%s7704_s28 + $0xa0] sm:$0xff] %vm8396_vm11, %v4190_v13  ;;  %v4193_v28 = vmax.f32 %v4161_v32, 0.0  ;;  %v4159_v3 = vadd.f32 %v5574_v50, %v4127_v15 }
 0x405   : > { %p5646_p13 = por %p5645_p2, %p5644_p10 }
 0x406   : > { %4225 = vst.msk [vmem:[%s7704_s28 + $0xb8] sm:$0xff] %vm8397_vm10, %v4193_v28  ;;  %v4191_v5 = vmax.f32 %v4159_v3, 0.0 }
 0x407   : > { %p5647_p0 = pnand %p5646_p13, %p5640_p12 }
 0x408   : > { %4223 = vst.msk [vmem:[%s7704_s28 + $0xa8] sm:$0xff] %vm8398_vm3, %v4191_v5 }
 0x409   : > { %v5397_v42 = vpop.f32.mrf.mxu0 }
 0x40a   : > { %v4093_v26 = vmul.f32 %v5397_v42, %v7686_v11 }
 0x40b   : > { %v4029_v53 = vpop.f32.mrf.mxu0 }
 0x40c   : > { %v4132_v52 = vadd.f32 %v7691_v22, %v4093_v26  ;;  %v4091_v47 = vmul.f32 %v7686_v11, %v4029_v53 }
 0x40d   : > { %v5398_v60 = vpop.f32.mrf.mxu0 }
 0x40e   : > { %v4164_v37 = vadd.f32 %v5575_v33, %v4132_v52  ;;  %v4130_v39 = vadd.f32 %v7691_v22, %v4091_v47  ;;  %v4094_v54 = vmul.f32 %v5398_v60, %v7686_v11 }
 0x40f   : > { %v4032_v23 = vpop.f32.mrf.mxu0 }
 0x410   : > { %v4196_v18 = vmax.f32 %v4164_v37, 0.0  ;;  %v4162_v30 = vadd.f32 %v5576_v2, %v4130_v39  ;;  %v4133_v8 = vadd.f32 %v7691_v22, %v4094_v54  ;;  %v4092_v29 = vmul.f32 %v7686_v11, %v4032_v23 }
 0x412   : > { %4228 = vst.msk [vmem:[%s7704_s28 + $0xd0] sm:$0xff] %vm8399_vm14, %v4196_v18  ;;  %v4194_v57 = vmax.f32 %v4162_v30, 0.0  ;;  %v4165_v45 = vadd.f32 %v5577_v19, %v4133_v8  ;;  %v4131_v59 = vadd.f32 %v7691_v22, %v4092_v29 }
 0x414   : > { %4226 = vst.msk [vmem:[%s7704_s28 + $0xc0] sm:$0xff] %vm8400_vm13, %v4194_v57  ;;  %v4197_v25 = vmax.f32 %v4165_v45, 0.0  ;;  %v4163_v16 = vadd.f32 %v5578_v35, %v4131_v59 }
 0x416   : > { %4229 = vst.msk [vmem:[%s7704_s28 + $0xd8] sm:$0xff] %vm8401_vm9, %v4197_v25  ;;  %v4195_v41 = vmax.f32 %v4163_v16, 0.0 }
 0x418   : > { %4227 = vst.msk [vmem:[%s7704_s28 + $0xc8] sm:$0xff] %vm8402_vm1, %v4195_v41 }
 0x419   : > { %v5401_v7 = vpop.f32.mrf.mxu0 }
 0x41a   : > { %v4097_v14 = vmul.f32 %v5401_v7, %v7686_v11 }
 0x41b   : > { %v4045_v49 = vpop.f32.mrf.mxu0 }
 0x41c   : > { %v4136_v9 = vadd.f32 %v7691_v22, %v4097_v14  ;;  %v4095_v44 = vmul.f32 %v7686_v11, %v4045_v49 }
 0x41d   : > { %v5402_v55 = vpop.f32.mrf.mxu0 }
 0x41e   : > { %v4168_v17 = vadd.f32 %v5579_v31, %v4136_v9  ;;  %v4134_v0 = vadd.f32 %v7691_v22, %v4095_v44  ;;  %v4098_v36 = vmul.f32 %v5402_v55, %v7686_v11 }
 0x41f   : > { %v4048_v10 = vpop.f32.mrf.mxu0 }
 0x420   : > { %v4200_v12 = vmax.f32 %v4168_v17, 0.0  ;;  %v4166_v24 = vadd.f32 %v5580_v63, %v4134_v0  ;;  %v4137_v6 = vadd.f32 %v7691_v22, %v4098_v36  ;;  %v4096_v34 = vmul.f32 %v7686_v11, %v4048_v10 }
 0x422   : > { %4232 = vst.msk [vmem:[%s7704_s28 + $0xf0] sm:$0xff] %vm8387_vm0, %v4200_v12  ;;  %v4198_v38 = vmax.f32 %v4166_v24, 0.0  ;;  %v4169_v1 = vadd.f32 %v5581_v48, %v4137_v6  ;;  %v4135_v58 = vadd.f32 %v7691_v22, %v4096_v34 }
 0x424   : > { %4230 = vst.msk [vmem:[%s7704_s28 + $0xe0] sm:$0xff] %vm8403_vm4, %v4198_v38  ;;  %v4201_v21 = vmax.f32 %v4169_v1, 0.0  ;;  %v4167_v61 = vadd.f32 %v5582_v43, %v4135_v58 }
 0x426   : > { %4233 = vst.msk [vmem:[%s7704_s28 + $0xf8] sm:$0xff] %vm8404_vm6, %v4201_v21  ;;  %v4199_v11 = vmax.f32 %v4167_v61, 0.0 }
 0x428   : > { %4231 = vst.msk [vmem:[%s7704_s28 + $0xe8] sm:$0xff] %vm8405_vm5, %v4199_v11 }
 0x429   : > { %5650 = shalt.err (!%p5647_p0)
}
 0x42a   : > { %s5651_s19 = scalar_lea.hbm %s7858_s25, 4096  ;;  %s5655_s29 = scalar_lea.hbm %s7917_s10, 8192 }
 0x42b   : > { %p5652_p5 = scmp.ne.s32.totalorder %s7858_s25, %s5651_s19  ;;  %p5656_p4 = scmp.lt.s32.totalorder %s7858_s25, %s7917_s10 }
 0x42c   : > { %p5657_p6 = scmp.lt.s32.totalorder %s5655_s29, %s5651_s19 }
 0x42d   : > { %p5653_p9 = pnand %p5652_p5, %p8406_p11 }
 0x42e   : > { %p5658_p8 = por %p5657_p6, %p5656_p4 }
 0x42f   : > { %p5654_p1 = pneg %p5653_p9 }
 0x431   : > { %p5659_p3 = pnand %p5658_p8, %p5654_p1 }
 0x433   : > { %5662 = shalt.err (!%p5659_p3)
}
 0x434   : > { %s5716_s13 = smov 128   ;;  %s5717_s30 = smov 8  }
 0x435   : > { %5411 = dma.vmem_to_hbm [thread:$0]  (%p8406_p11), %s7860_s23, 4096, %s7858_s25, %s4235_s17, %s5716_s13, %s5716_s13, %s5717_s30  }
 0x436 PF: > { %s8407_s12 = sld [smem:[#allocation11_spill]]  ;;  %p8410_p12 = scmp.ge.s32.totalorder %s5705_s16, 2 }
 0x437   : > { %s8408_s24 = sld [smem:[#allocation12_spill]] }
 0x43c   : > { %s4263_s21 = sand.u32 1, %s8407_s12  }
 0x43d   : > { %p8409_p7 = scmp.ne.s32.totalorder %s8408_s24, 0  ;;  %s4264_s11 = scalar_lea.sflag [#allocation4], %s4263_s21 }
 0x43f   : > { %p5422_p10 = pnand %p8410_p12, %p8409_p7 }
 0x441   : > { %p5423_p2 = pneg %p5422_p10 }
 0x443   : > { %5688 = dma.done.wait (%p5423_p2), %s4264_s11, 4096  }
 0x444   : > { %5690 = vsyncadd (%p5423_p2), %s4264_s11, 4294963200  ;;  %s8411_s16 = sld [smem:[#allocation13_spill]]  ;;  %s8412_s13 = smov %s5697_s14 }
 0x445   : > { %s8413_s14 = smov %s5701_s15  ;;  %s8414_s15 = smov %s5844_s18 }
 0x44a   : > { %p24_p13 = scmp.ge.s32.totalorder %s8411_s16, 4  }
 0x44c   :  { %26 = sbr.rel (!%p24_p13) target bundleno = 8 (0x8), region = 111 }
 0x451   :  { %4269 = vsyncpa [#allocation3], 1 }
 0x452   :  { %4271 = vsyncpa [#allocation3 + $0x1], 1 }
 0x453   :  { %4272 = vsyncpa [#allocation6], 1 }
 0x454   :  { %4273 = vsyncpa [#allocation4], 1 }
 0x455   :  { %4275 = vsyncpa [#allocation4 + $0x1], 1 }

</bundles_post_ra>
